<compile_context>
chip_gen: v7x
topology: tpu7x:2x2x1
jax: 0.10.0
libtpu: 0.0.40
codegen_flags: <defaults>
</compile_context>

<pallas_src>
import jax
import jax.numpy as jnp
from jax import lax
from jax.experimental import pallas as pl
from jax.experimental.pallas import tpu as pltpu

BN_EPS = 1e-5
LRELU_SLOPE = 0.2
KSIZE = 4                      # conv kernel size (4x4, stride 2, pad 1)
MXU_DTYPE = jnp.bfloat16       # MXU operand dtype (accumulation stays f32)


# --------------------------------------------------------------------------- kernel
def _conv_bn_lrelu_stage(a, shb_ref, ww, gat_ref, sct_ref, gam_ref, bet_ref):
    """Fused Conv2d(4,2,1,bias=False) + BatchNorm2d(train) + LeakyReLU(0.2).

    a      : [B*Hin, Cin*Win] bf16   activation, rows=(b,h), cols=(cin,w)
    shb_ref: [4*B*Ho, B*Hin]  bf16   stacked per-kh one-hot row gather (stride-2 H + pad)
    ww     : [4, Cin*Win, Cout*Wo] bf16  conv weights with stride-2 W-selection folded in
             (regular VMEM input ref for stage 1, VMEM scratch ref filled by DMA for 2/3)
    gat_ref: [Cout*Wo, Cout] f32  exact 0/1 within-channel column gather
    sct_ref: [Cout, Cout*Wo] f32  exact 0/1 per-channel broadcast back
    gam_ref, bet_ref: [1, Cout*Wo] f32  BN gamma/beta repeated Wo times per channel
    returns: [B*Ho, Cout*Wo] bf16   rows=(b,ho), cols=(cout,wo)
    """
    m4 = shb_ref.shape[0]
    m = m4 // KSIZE                                     # B*Ho (multiple of 8 here)

    # One big gather matmul (M = 4*B*Ho) instead of 4 small ones; result is an exact
    # row selection of `a`, so the bf16 cast loses nothing.
    g = jnp.dot(shb_ref[...], a, preferred_element_type=jnp.float32)
    g = g.astype(MXU_DTYPE)

    # Per-kh weight matmuls on static, sublane-aligned row slices; f32 accumulation.
    s = jnp.dot(g[0:m], ww[0], preferred_element_type=jnp.float32)
    for kh in range(1, KSIZE):
        s = s + jnp.dot(g[kh * m:(kh + 1) * m], ww[kh],
                        preferred_element_type=jnp.float32)

    # One-pass training-mode BN statistics (biased variance), per output channel.
    cw = s.shape[1]
    cout = gat_ref.shape[1]
    inv_n = 1.0 / float(s.shape[0] * (cw // cout))      # 1/(B*Ho*Wo), exact f32 scalar
    col_sum = jnp.sum(s, axis=0, keepdims=True)         # [1, CW]
    col_sq = jnp.sum(s * s, axis=0, keepdims=True)      # [1, CW]
    stats = jnp.concatenate([col_sum, col_sq], axis=0)  # [2, CW]  (one reduce matmul)
    ch = jnp.dot(stats, gat_ref[...], preferred_element_type=jnp.float32) * inv_n  # [2, Cout]
    bc = jnp.dot(ch, sct_ref[...], preferred_element_type=jnp.float32)             # [2, CW]
    mean = bc[0:1, :]
    var = jnp.maximum(bc[1:2, :] - mean * mean, 0.0)     # clamp one-pass cancellation
    y = (s - mean) * lax.rsqrt(var + BN_EPS) * gam_ref[...] + bet_ref[...]
    y = jnp.where(y > 0, y, LRELU_SLOPE * y)
    return y.astype(MXU_DTYPE)


def classifier_kernel(a0_ref,
                      shb1, ww1, gat1, sct1, gam1, bet1,
                      shb2, ww2_hbm, gat2, sct2, gam2, bet2,
                      shb3, ww3_hbm, gat3, sct3, gam3, bet3,
                      wfc1, maskr, rcr, ccr, b1r, wfc2, b2r,
                      out_ref,
                      ww2_vmem, ww3_vmem, dma_sem):
    # Overlap the stage-2/3 weight DMA (the two largest constants) with stage-1 compute.
    cp2 = pltpu.make_async_copy(ww2_hbm, ww2_vmem, dma_sem.at[0])
    cp3 = pltpu.make_async_copy(ww3_hbm, ww3_vmem, dma_sem.at[1])
    cp2.start()
    cp3.start()

    a = a0_ref[...]                                                     # [B*64, nc*64] bf16
    a = _conv_bn_lrelu_stage(a, shb1, ww1, gat1, sct1, gam1, bet1)      # [B*32, ncf*32]
    cp2.wait()
    a = _conv_bn_lrelu_stage(a, shb2, ww2_vmem, gat2, sct2, gam2, bet2)  # [B*16, 2ncf*16]
    cp3.wait()
    a = _conv_bn_lrelu_stage(a, shb3, ww3_vmem, gat3, sct3, gam3, bet3)  # [B*8, 4ncf*8]

    # MLP head.  PyTorch's NCHW Flatten and the fc1 transpose are folded into
    # wfc1 / mask / rc / cc so the conv output is consumed in-place.
    g = jnp.dot(a, wfc1[...], preferred_element_type=jnp.float32)        # [B*8, 8*J]
    gm = (g * maskr[...]).astype(MXU_DTYPE)
    z = jnp.dot(rcr[...], gm, preferred_element_type=jnp.float32)        # [B, 8*J]
    h = jnp.dot(z.astype(MXU_DTYPE), ccr[...],
                preferred_element_type=jnp.float32) + b1r[...]            # [B, J]
    h = jnp.maximum(h, 0.0)
    out_ref[...] = jnp.dot(h.astype(MXU_DTYPE), wfc2[...],
                           preferred_element_type=jnp.float32) + b2r[...]  # [B, 6]


# ----------------------------------------------------------------- operand preparation
def _sel_h(hin):
    """[4, Ho, Hin] one-hot: sel[kh, ho, h] = (h == 2*ho + kh - 1)  (pad=1, stride=2)."""
    ho = hin // 2
    r = jnp.arange(ho)[:, None]
    c = jnp.arange(hin)[None, :]
    return jnp.stack([(c == 2 * r + kh - 1) for kh in range(KSIZE)]).astype(jnp.float32)


def _sel_w(win):
    """[4, Win, Wo] one-hot: sel[kw, w, wo] = (w == 2*wo + kw - 1)."""
    wo = win // 2
    r = jnp.arange(win)[:, None]
    c = jnp.arange(wo)[None, :]
    return jnp.stack([(r == 2 * c + kw - 1) for kw in range(KSIZE)]).astype(jnp.float32)


def _stage_operands(conv_w_oihw, gamma, beta, batch, hin, win):
    """Fold conv-weight / BN / layout constants for one stage (done once, eagerly)."""
    cout, cin, _, _ = conv_w_oihw.shape
    ho, wo = hin // 2, win // 2
    # Stacked row gather [4*B*Ho, B*Hin]; 0/1 entries are exact in bf16.
    sh = _sel_h(hin)
    eye_b = jnp.eye(batch, dtype=jnp.float32)
    shb = jnp.concatenate([jnp.kron(eye_b, sh[kh]) for kh in range(KSIZE)], axis=0)
    # Conv weight with the stride-2 W selection folded in:
    # ww[kh, (cin,w), (cout,wo)] = sum_kw W[cout,cin,kh,kw] * (w == 2*wo + kw - 1)
    sw = _sel_w(win)
    ww = jnp.einsum('oikl,lwv->kiwov', conv_w_oihw.astype(jnp.float32), sw)
    ww = ww.reshape(KSIZE, cin * win, cout * wo)
    # Factorized within-channel block sum: gather [CW, Cout], scatter [Cout, CW].
    ch_of_col = jnp.arange(cout * wo) // wo
    gat = (ch_of_col[:, None] == jnp.arange(cout)[None, :]).astype(jnp.float32)
    sct = gat.T
    g_row = jnp.repeat(gamma.astype(jnp.float32), wo)[None, :]
    b_row = jnp.repeat(beta.astype(jnp.float32), wo)[None, :]
    return [shb.astype(MXU_DTYPE), ww.astype(MXU_DTYPE), gat, sct, g_row, b_row]


def _head_operands(fc1_w, fc1_b, fc2_w, fc2_b, batch, c3, h3):
    """Fold nn.Flatten's NCHW order and the fc1 transpose into the MLP operands."""
    j = fc1_w.shape[0]
    w3 = h3
    # wfc1[(c,w), (h,j)] = fc1_w[j, c*h3*w3 + h*w3 + w]
    wfc1 = (fc1_w.astype(jnp.float32).reshape(j, c3, h3, w3)
            .transpose(1, 3, 2, 0).reshape(c3 * w3, h3 * j))
    row_h = jnp.arange(batch * h3) % h3
    col_h = jnp.arange(h3 * j) // j
    mask = (row_h[:, None] == col_h[None, :]).astype(jnp.float32)            # [B*H3, H3*J]
    rc = (jnp.arange(batch)[:, None] ==
          (jnp.arange(batch * h3) // h3)[None, :]).astype(jnp.float32)       # [B, B*H3]
    cc = ((jnp.arange(h3 * j) % j)[:, None] ==
          jnp.arange(j)[None, :]).astype(jnp.float32)                        # [H3*J, J]
    return [wfc1.astype(MXU_DTYPE), mask, rc.astype(MXU_DTYPE), cc.astype(MXU_DTYPE),
            fc1_b.astype(jnp.float32)[None, :],
            fc2_w.astype(jnp.float32).T.astype(MXU_DTYPE),
            fc2_b.astype(jnp.float32)[None, :]]


def prepare_kernel_operands(params, batch, spatial=64):
    """One-time preparation of all layout-folded kernel operands."""
    ops = []
    ops += _stage_operands(params["conv1_w"], params["bn1_g"], params["bn1_b"],
                           batch, spatial, spatial)
    ops += _stage_operands(params["conv2_w"], params["bn2_g"], params["bn2_b"],
                           batch, spatial // 2, spatial // 2)
    ops += _stage_operands(params["conv3_w"], params["bn3_g"], params["bn3_b"],
                           batch, spatial // 4, spatial // 4)
    c3 = params["conv3_w"].shape[0]
    ops += _head_operands(params["fc1_w"], params["fc1_b"],
                          params["fc2_w"], params["fc2_b"], batch, c3, spatial // 8)
    return tuple(ops)


def _zero_index_map(ndim):
    return lambda i: (0,) * ndim


# Operand-tuple positions (without a0) of the two constants routed through pl.ANY + DMA.
_ANY_OPERAND_IDX = (7, 13)   # ww2, ww3


@jax.jit
def classifier_forward(operands, x_nchw):
    """x_nchw: [B, nc, 64, 64] (PyTorch NCHW). Returns [B, 6]."""
    b, c, h, w = x_nchw.shape
    # Single cheap layout transform of the raw input into the kernel's [(b,h),(c,w)] layout.
    a0 = jnp.transpose(x_nchw, (0, 2, 1, 3)).reshape(b * h, c * w).astype(MXU_DTYPE)
    all_inputs = (a0,) + tuple(operands)
    any_idx = {i + 1 for i in _ANY_OPERAND_IDX}        # +1 for the prepended a0
    in_specs = []
    for i, op in enumerate(all_inputs):
        if i in any_idx:
            in_specs.append(pl.BlockSpec(memory_space=pl.ANY))
        else:
            in_specs.append(pl.BlockSpec(op.shape, _zero_index_map(op.ndim)))
    ww2, ww3 = operands[_ANY_OPERAND_IDX[0]], operands[_ANY_OPERAND_IDX[1]]
    return pl.pallas_call(
        classifier_kernel,
        grid=(1,),
        in_specs=in_specs,
        out_specs=pl.BlockSpec((b, 6), lambda i: (0, 0)),
        out_shape=jax.ShapeDtypeStruct((b, 6), jnp.float32),
        scratch_shapes=[pltpu.VMEM(ww2.shape, MXU_DTYPE),
                        pltpu.VMEM(ww3.shape, MXU_DTYPE),
                        pltpu.SemaphoreType.DMA((2,))],
        compiler_params=pltpu.CompilerParams(vmem_limit_bytes=32 * 1024 * 1024),
    )(*all_inputs)


# --------------------------------------------------------------------------- model glue
def init_params(key, nc, ncf):
    """Parameters in native PyTorch layouts (conv OIHW, linear [out, in])."""
    ks = jax.random.split(key, 7)
    s = 0.05
    return {
        "conv1_w": jax.random.normal(ks[0], (ncf, nc, 4, 4), jnp.float32) * s,
        "conv2_w": jax.random.normal(ks[1], (ncf * 2, ncf, 4, 4), jnp.float32) * s,
        "conv3_w": jax.random.normal(ks[2], (ncf * 4, ncf * 2, 4, 4), jnp.float32) * s,
        "bn1_g": jnp.ones((ncf,), jnp.float32), "bn1_b": jnp.zeros((ncf,), jnp.float32),
        "bn2_g": jnp.ones((ncf * 2,), jnp.float32), "bn2_b": jnp.zeros((ncf * 2,), jnp.float32),
        "bn3_g": jnp.ones((ncf * 4,), jnp.float32), "bn3_b": jnp.zeros((ncf * 4,), jnp.float32),
        "fc1_w": jax.random.normal(ks[3], (ncf * 2, ncf * 4 * 8 * 8), jnp.float32) * s,
        "fc1_b": jax.random.normal(ks[4], (ncf * 2,), jnp.float32) * s,
        "fc2_w": jax.random.normal(ks[5], (6, ncf * 2), jnp.float32) * s,
        "fc2_b": jax.random.normal(ks[6], (6,), jnp.float32) * s,
    }


def reference_forward(params, x):
    """Plain-JAX reference mirroring the PyTorch module (training-mode BN)."""
    def conv(h, w):
        return lax.conv_general_dilated(h, w, (2, 2), ((1, 1), (1, 1)),
                                        dimension_numbers=("NCHW", "OIHW", "NCHW"))

    def bn_lrelu(h, g, b):
        mean = jnp.mean(h, axis=(0, 2, 3), keepdims=True)
        var = jnp.var(h, axis=(0, 2, 3), keepdims=True)  # biased, as PyTorch train-mode BN
        y = (h - mean) * lax.rsqrt(var + BN_EPS) * g.reshape(1, -1, 1, 1) + b.reshape(1, -1, 1, 1)
        return jnp.where(y > 0, y, LRELU_SLOPE * y)

    h = bn_lrelu(conv(x, params["conv1_w"]), params["bn1_g"], params["bn1_b"])
    h = bn_lrelu(conv(h, params["conv2_w"]), params["bn2_g"], params["bn2_b"])
    h = bn_lrelu(conv(h, params["conv3_w"]), params["bn3_g"], params["bn3_b"])
    f = h.reshape(h.shape[0], -1)
    z = jnp.maximum(f @ params["fc1_w"].T + params["fc1_b"], 0.0)
    return z @ params["fc2_w"].T + params["fc2_b"]


if __name__ == "__main__":
    nc, ncf = 3, 8
    B, H, W = 2, 64, 64  # spatial must be 64: three stride-2 convs -> 8x8 before Flatten

    key = jax.random.PRNGKey(0)
    kx, kp = jax.random.split(key)
    x = jax.random.normal(kx, (B, nc, H, W), jnp.float32)  # NCHW, like PyTorch
    params = init_params(kp, nc, ncf)

    operands = prepare_kernel_operands(params, B, spatial=H)  # one-time, layout folded

    out = jax.block_until_ready(classifier_forward(operands, x))
    assert out.shape == (B, 6), out.shape
    assert bool(jnp.all(jnp.isfinite(out)))

    # Loose tolerance: bf16 MXU operands (with f32 accumulation) introduce ~1% relative
    # error per stage vs the f32 XLA reference; structural bugs would show O(1) errors.
    ref = reference_forward(params, x)
    err = float(jnp.max(jnp.abs(out - ref)))
    scale = float(jnp.max(jnp.abs(ref))) + 1e-6
    assert err <= 0.1 * scale + 1e-2, (err, scale)

    print("KERNEL_OK")
</pallas_src>

<mosaic_0001>
module attributes {stable_mosaic.version = 11 : i64} {
  func.func @classifier_kernel(%arg0: i32, %arg1: memref<128x192xbf16, #tpu.memory_space<vmem>>, %arg2: memref<256x128xbf16, #tpu.memory_space<vmem>>, %arg3: memref<4x192x256xbf16, #tpu.memory_space<vmem>>, %arg4: memref<256x8xf32, #tpu.memory_space<vmem>>, %arg5: memref<8x256xf32, #tpu.memory_space<vmem>>, %arg6: memref<1x256xf32, #tpu.memory_space<vmem>>, %arg7: memref<1x256xf32, #tpu.memory_space<vmem>>, %arg8: memref<128x64xbf16, #tpu.memory_space<vmem>>, %arg9: memref<4x256x256xbf16, #tpu.memory_space<any>>, %arg10: memref<256x16xf32, #tpu.memory_space<vmem>>, %arg11: memref<16x256xf32, #tpu.memory_space<vmem>>, %arg12: memref<1x256xf32, #tpu.memory_space<vmem>>, %arg13: memref<1x256xf32, #tpu.memory_space<vmem>>, %arg14: memref<64x32xbf16, #tpu.memory_space<vmem>>, %arg15: memref<4x256x256xbf16, #tpu.memory_space<any>>, %arg16: memref<256x32xf32, #tpu.memory_space<vmem>>, %arg17: memref<32x256xf32, #tpu.memory_space<vmem>>, %arg18: memref<1x256xf32, #tpu.memory_space<vmem>>, %arg19: memref<1x256xf32, #tpu.memory_space<vmem>>, %arg20: memref<256x128xbf16, #tpu.memory_space<vmem>>, %arg21: memref<16x128xf32, #tpu.memory_space<vmem>>, %arg22: memref<2x16xbf16, #tpu.memory_space<vmem>>, %arg23: memref<128x16xbf16, #tpu.memory_space<vmem>>, %arg24: memref<1x16xf32, #tpu.memory_space<vmem>>, %arg25: memref<16x6xbf16, #tpu.memory_space<vmem>>, %arg26: memref<1x6xf32, #tpu.memory_space<vmem>>, %arg27: memref<2x6xf32, #tpu.memory_space<vmem>>, %arg28: memref<4x256x256xbf16, #tpu.memory_space<vmem>>, %arg29: memref<4x256x256xbf16, #tpu.memory_space<vmem>>, %arg30: memref<2x!tpu.dma_semaphore, #tpu.memory_space<semaphore_mem>>) attributes {dimension_semantics = [#tpu.dimension_semantics<arbitrary>], iteration_bounds = array<i64: 1>, scalar_prefetch = 0 : i64, scratch_operands = 3 : i64, tpu.core_type = #tpu.core_type<tc>, window_params = [{pipeline_mode = #tpu.pipeline_mode<synchronous>, transform_indices = @transform_0, window_bounds = array<i64: 128, 192>}, {pipeline_mode = #tpu.pipeline_mode<synchronous>, transform_indices = @transform_1, window_bounds = array<i64: 256, 128>}, {pipeline_mode = #tpu.pipeline_mode<synchronous>, transform_indices = @transform_2, window_bounds = array<i64: 4, 192, 256>}, {pipeline_mode = #tpu.pipeline_mode<synchronous>, transform_indices = @transform_3, window_bounds = array<i64: 256, 8>}, {pipeline_mode = #tpu.pipeline_mode<synchronous>, transform_indices = @transform_4, window_bounds = array<i64: 8, 256>}, {pipeline_mode = #tpu.pipeline_mode<synchronous>, transform_indices = @transform_5, window_bounds = array<i64: 1, 256>}, {pipeline_mode = #tpu.pipeline_mode<synchronous>, transform_indices = @transform_6, window_bounds = array<i64: 1, 256>}, {pipeline_mode = #tpu.pipeline_mode<synchronous>, transform_indices = @transform_7, window_bounds = array<i64: 128, 64>}, {}, {pipeline_mode = #tpu.pipeline_mode<synchronous>, transform_indices = @transform_9, window_bounds = array<i64: 256, 16>}, {pipeline_mode = #tpu.pipeline_mode<synchronous>, transform_indices = @transform_10, window_bounds = array<i64: 16, 256>}, {pipeline_mode = #tpu.pipeline_mode<synchronous>, transform_indices = @transform_11, window_bounds = array<i64: 1, 256>}, {pipeline_mode = #tpu.pipeline_mode<synchronous>, transform_indices = @transform_12, window_bounds = array<i64: 1, 256>}, {pipeline_mode = #tpu.pipeline_mode<synchronous>, transform_indices = @transform_13, window_bounds = array<i64: 64, 32>}, {}, {pipeline_mode = #tpu.pipeline_mode<synchronous>, transform_indices = @transform_15, window_bounds = array<i64: 256, 32>}, {pipeline_mode = #tpu.pipeline_mode<synchronous>, transform_indices = @transform_16, window_bounds = array<i64: 32, 256>}, {pipeline_mode = #tpu.pipeline_mode<synchronous>, transform_indices = @transform_17, window_bounds = array<i64: 1, 256>}, {pipeline_mode = #tpu.pipeline_mode<synchronous>, transform_indices = @transform_18, window_bounds = array<i64: 1, 256>}, {pipeline_mode = #tpu.pipeline_mode<synchronous>, transform_indices = @transform_19, window_bounds = array<i64: 256, 128>}, {pipeline_mode = #tpu.pipeline_mode<synchronous>, transform_indices = @transform_20, window_bounds = array<i64: 16, 128>}, {pipeline_mode = #tpu.pipeline_mode<synchronous>, transform_indices = @transform_21, window_bounds = array<i64: 2, 16>}, {pipeline_mode = #tpu.pipeline_mode<synchronous>, transform_indices = @transform_22, window_bounds = array<i64: 128, 16>}, {pipeline_mode = #tpu.pipeline_mode<synchronous>, transform_indices = @transform_23, window_bounds = array<i64: 1, 16>}, {pipeline_mode = #tpu.pipeline_mode<synchronous>, transform_indices = @transform_24, window_bounds = array<i64: 16, 6>}, {pipeline_mode = #tpu.pipeline_mode<synchronous>, transform_indices = @transform_25, window_bounds = array<i64: 1, 6>}, {pipeline_mode = #tpu.pipeline_mode<synchronous>, transform_indices = @transform_26, window_bounds = array<i64: 2, 6>}]} {
    %c0_i32 = arith.constant 0 : i32
    %0 = tpu.memref_slice %arg30[%c0_i32] : memref<2x!tpu.dma_semaphore, #tpu.memory_space<semaphore_mem>> -> memref<1x!tpu.dma_semaphore, #tpu.memory_space<semaphore_mem>>
    %1 = tpu.memref_squeeze %0 : memref<1x!tpu.dma_semaphore, #tpu.memory_space<semaphore_mem>> -> memref<!tpu.dma_semaphore, #tpu.memory_space<semaphore_mem>>
    tpu.enqueue_dma source(%arg9 : memref<4x256x256xbf16, #tpu.memory_space<any>>) target(%arg28 : memref<4x256x256xbf16, #tpu.memory_space<vmem>>) target_semaphore(%1 : memref<!tpu.dma_semaphore, #tpu.memory_space<semaphore_mem>>)
    %c1_i32 = arith.constant 1 : i32
    %2 = tpu.memref_slice %arg30[%c1_i32] : memref<2x!tpu.dma_semaphore, #tpu.memory_space<semaphore_mem>> -> memref<1x!tpu.dma_semaphore, #tpu.memory_space<semaphore_mem>>
    %3 = tpu.memref_squeeze %2 : memref<1x!tpu.dma_semaphore, #tpu.memory_space<semaphore_mem>> -> memref<!tpu.dma_semaphore, #tpu.memory_space<semaphore_mem>>
    tpu.enqueue_dma source(%arg15 : memref<4x256x256xbf16, #tpu.memory_space<any>>) target(%arg29 : memref<4x256x256xbf16, #tpu.memory_space<vmem>>) target_semaphore(%3 : memref<!tpu.dma_semaphore, #tpu.memory_space<semaphore_mem>>)
    %c0 = arith.constant 0 : index
    %c0_0 = arith.constant 0 : index
    %4 = vector.load %arg1[%c0, %c0_0] : memref<128x192xbf16, #tpu.memory_space<vmem>>, vector<128x192xbf16>
    %c0_1 = arith.constant 0 : index
    %c0_2 = arith.constant 0 : index
    %5 = vector.load %arg2[%c0_1, %c0_2] : memref<256x128xbf16, #tpu.memory_space<vmem>>, vector<256x128xbf16>
    %cst = arith.constant dense<0.000000e+00> : vector<256x192xf32>
    %6 = tpu.matmul %5, %4, %cst {dimension_numbers = #tpu.dot_dimension_numbers<[1], [0], [0], [1], [0, 0, 1, 1], [], []>} : vector<256x128xbf16>, vector<128x192xbf16>, vector<256x192xf32> -> vector<256x192xf32>
    %7 = arith.truncf %6 : vector<256x192xf32> to vector<256x192xbf16>
    %8 = vector.extract_strided_slice %7 {offsets = [0, 0], sizes = [64, 192], strides = [1, 1]} : vector<256x192xbf16> to vector<64x192xbf16>
    %c0_3 = arith.constant 0 : index
    %c0_4 = arith.constant 0 : index
    %c0_5 = arith.constant 0 : index
    %9 = vector.load %arg3[%c0_3, %c0_4, %c0_5] : memref<4x192x256xbf16, #tpu.memory_space<vmem>>, vector<1x192x256xbf16>
    %10 = vector.shape_cast %9 : vector<1x192x256xbf16> to vector<192x256xbf16>
    %cst_6 = arith.constant dense<0.000000e+00> : vector<64x256xf32>
    %11 = tpu.matmul %8, %10, %cst_6 {dimension_numbers = #tpu.dot_dimension_numbers<[1], [0], [0], [1], [0, 0, 1, 1], [], []>} : vector<64x192xbf16>, vector<192x256xbf16>, vector<64x256xf32> -> vector<64x256xf32>
    %12 = vector.extract_strided_slice %7 {offsets = [64, 0], sizes = [64, 192], strides = [1, 1]} : vector<256x192xbf16> to vector<64x192xbf16>
    %c1 = arith.constant 1 : index
    %c0_7 = arith.constant 0 : index
    %c0_8 = arith.constant 0 : index
    %13 = vector.load %arg3[%c1, %c0_7, %c0_8] : memref<4x192x256xbf16, #tpu.memory_space<vmem>>, vector<1x192x256xbf16>
    %14 = vector.shape_cast %13 : vector<1x192x256xbf16> to vector<192x256xbf16>
    %cst_9 = arith.constant dense<0.000000e+00> : vector<64x256xf32>
    %15 = tpu.matmul %12, %14, %cst_9 {dimension_numbers = #tpu.dot_dimension_numbers<[1], [0], [0], [1], [0, 0, 1, 1], [], []>} : vector<64x192xbf16>, vector<192x256xbf16>, vector<64x256xf32> -> vector<64x256xf32>
    %16 = arith.addf %11, %15 : vector<64x256xf32>
    %17 = vector.extract_strided_slice %7 {offsets = [128, 0], sizes = [64, 192], strides = [1, 1]} : vector<256x192xbf16> to vector<64x192xbf16>
    %c2 = arith.constant 2 : index
    %c0_10 = arith.constant 0 : index
    %c0_11 = arith.constant 0 : index
    %18 = vector.load %arg3[%c2, %c0_10, %c0_11] : memref<4x192x256xbf16, #tpu.memory_space<vmem>>, vector<1x192x256xbf16>
    %19 = vector.shape_cast %18 : vector<1x192x256xbf16> to vector<192x256xbf16>
    %cst_12 = arith.constant dense<0.000000e+00> : vector<64x256xf32>
    %20 = tpu.matmul %17, %19, %cst_12 {dimension_numbers = #tpu.dot_dimension_numbers<[1], [0], [0], [1], [0, 0, 1, 1], [], []>} : vector<64x192xbf16>, vector<192x256xbf16>, vector<64x256xf32> -> vector<64x256xf32>
    %21 = arith.addf %16, %20 : vector<64x256xf32>
    %22 = vector.extract_strided_slice %7 {offsets = [192, 0], sizes = [64, 192], strides = [1, 1]} : vector<256x192xbf16> to vector<64x192xbf16>
    %c3 = arith.constant 3 : index
    %c0_13 = arith.constant 0 : index
    %c0_14 = arith.constant 0 : index
    %23 = vector.load %arg3[%c3, %c0_13, %c0_14] : memref<4x192x256xbf16, #tpu.memory_space<vmem>>, vector<1x192x256xbf16>
    %24 = vector.shape_cast %23 : vector<1x192x256xbf16> to vector<192x256xbf16>
    %cst_15 = arith.constant dense<0.000000e+00> : vector<64x256xf32>
    %25 = tpu.matmul %22, %24, %cst_15 {dimension_numbers = #tpu.dot_dimension_numbers<[1], [0], [0], [1], [0, 0, 1, 1], [], []>} : vector<64x192xbf16>, vector<192x256xbf16>, vector<64x256xf32> -> vector<64x256xf32>
    %26 = arith.addf %21, %25 : vector<64x256xf32>
    %cst_16 = arith.constant dense<0.000000e+00> : vector<256xf32>
    %27 = vector.multi_reduction <add>, %26, %cst_16 [0] : vector<64x256xf32> to vector<256xf32>
    %28 = vector.shape_cast %27 : vector<256xf32> to vector<1x256xf32>
    %29 = arith.mulf %26, %26 : vector<64x256xf32>
    %cst_17 = arith.constant dense<0.000000e+00> : vector<256xf32>
    %30 = vector.multi_reduction <add>, %29, %cst_17 [0] : vector<64x256xf32> to vector<256xf32>
    %31 = vector.shape_cast %30 : vector<256xf32> to vector<1x256xf32>
    %32 = tpu.concatenate %28, %31 in 0 : vector<1x256xf32>, vector<1x256xf32> -> vector<2x256xf32>
    %c0_18 = arith.constant 0 : index
    %c0_19 = arith.constant 0 : index
    %33 = vector.load %arg4[%c0_18, %c0_19] : memref<256x8xf32, #tpu.memory_space<vmem>>, vector<256x8xf32>
    %cst_20 = arith.constant dense<0.000000e+00> : vector<2x8xf32>
    %34 = tpu.matmul %32, %33, %cst_20 {dimension_numbers = #tpu.dot_dimension_numbers<[1], [0], [0], [1], [0, 0, 1, 1], [], []>} : vector<2x256xf32>, vector<256x8xf32>, vector<2x8xf32> -> vector<2x8xf32>
    %cst_21 = arith.constant 4.8828125E-4 : f32
    %35 = vector.broadcast %cst_21 : f32 to vector<2x8xf32>
    %36 = arith.mulf %34, %35 : vector<2x8xf32>
    %c0_22 = arith.constant 0 : index
    %c0_23 = arith.constant 0 : index
    %37 = vector.load %arg5[%c0_22, %c0_23] : memref<8x256xf32, #tpu.memory_space<vmem>>, vector<8x256xf32>
    %cst_24 = arith.constant dense<0.000000e+00> : vector<2x256xf32>
    %38 = tpu.matmul %36, %37, %cst_24 {dimension_numbers = #tpu.dot_dimension_numbers<[1], [0], [0], [1], [0, 0, 1, 1], [], []>} : vector<2x8xf32>, vector<8x256xf32>, vector<2x256xf32> -> vector<2x256xf32>
    %39 = vector.extract_strided_slice %38 {offsets = [0, 0], sizes = [1, 256], strides = [1, 1]} : vector<2x256xf32> to vector<1x256xf32>
    %40 = vector.extract_strided_slice %38 {offsets = [1, 0], sizes = [1, 256], strides = [1, 1]} : vector<2x256xf32> to vector<1x256xf32>
    %41 = arith.mulf %39, %39 : vector<1x256xf32>
    %42 = arith.subf %40, %41 : vector<1x256xf32>
    %cst_25 = arith.constant 0.000000e+00 : f32
    %43 = vector.broadcast %cst_25 : f32 to vector<1x256xf32>
    %44 = arith.maximumf %42, %43 : vector<1x256xf32>
    %45 = vector.broadcast %39 : vector<1x256xf32> to vector<64x256xf32>
    %46 = arith.subf %26, %45 : vector<64x256xf32>
    %cst_26 = arith.constant 9.99999974E-6 : f32
    %47 = vector.broadcast %cst_26 : f32 to vector<1x256xf32>
    %48 = arith.addf %44, %47 : vector<1x256xf32>
    %49 = math.rsqrt %48 : vector<1x256xf32>
    %50 = vector.broadcast %49 : vector<1x256xf32> to vector<64x256xf32>
    %51 = arith.mulf %46, %50 : vector<64x256xf32>
    %c0_27 = arith.constant 0 : index
    %c0_28 = arith.constant 0 : index
    %52 = vector.load %arg6[%c0_27, %c0_28] : memref<1x256xf32, #tpu.memory_space<vmem>>, vector<1x256xf32>
    %53 = vector.broadcast %52 : vector<1x256xf32> to vector<64x256xf32>
    %54 = arith.mulf %51, %53 : vector<64x256xf32>
    %c0_29 = arith.constant 0 : index
    %c0_30 = arith.constant 0 : index
    %55 = vector.load %arg7[%c0_29, %c0_30] : memref<1x256xf32, #tpu.memory_space<vmem>>, vector<1x256xf32>
    %56 = vector.broadcast %55 : vector<1x256xf32> to vector<64x256xf32>
    %57 = arith.addf %54, %56 : vector<64x256xf32>
    %cst_31 = arith.constant 0.000000e+00 : f32
    %58 = vector.broadcast %cst_31 : f32 to vector<64x256xf32>
    %59 = arith.cmpf ogt, %57, %58 : vector<64x256xf32>
    %cst_32 = arith.constant 2.000000e-01 : f32
    %60 = vector.broadcast %cst_32 : f32 to vector<64x256xf32>
    %61 = arith.mulf %60, %57 : vector<64x256xf32>
    %62 = arith.select %59, %57, %61 : vector<64x256xi1>, vector<64x256xf32>
    %63 = arith.truncf %62 : vector<64x256xf32> to vector<64x256xbf16>
    %c0_i32_33 = arith.constant 0 : i32
    %64 = tpu.memref_slice %arg30[%c0_i32_33] : memref<2x!tpu.dma_semaphore, #tpu.memory_space<semaphore_mem>> -> memref<1x!tpu.dma_semaphore, #tpu.memory_space<semaphore_mem>>
    %65 = tpu.memref_squeeze %64 : memref<1x!tpu.dma_semaphore, #tpu.memory_space<semaphore_mem>> -> memref<!tpu.dma_semaphore, #tpu.memory_space<semaphore_mem>>
    tpu.wait_dma2 semaphore(%65 : memref<!tpu.dma_semaphore, #tpu.memory_space<semaphore_mem>>) src(%arg9 : memref<4x256x256xbf16, #tpu.memory_space<any>>) dst(%arg28 : memref<4x256x256xbf16, #tpu.memory_space<vmem>>)
    %c0_34 = arith.constant 0 : index
    %c0_35 = arith.constant 0 : index
    %66 = vector.load %arg8[%c0_34, %c0_35] : memref<128x64xbf16, #tpu.memory_space<vmem>>, vector<128x64xbf16>
    %cst_36 = arith.constant dense<0.000000e+00> : vector<128x256xf32>
    %67 = tpu.matmul %66, %63, %cst_36 {dimension_numbers = #tpu.dot_dimension_numbers<[1], [0], [0], [1], [0, 0, 1, 1], [], []>} : vector<128x64xbf16>, vector<64x256xbf16>, vector<128x256xf32> -> vector<128x256xf32>
    %68 = arith.truncf %67 : vector<128x256xf32> to vector<128x256xbf16>
    %69 = vector.extract_strided_slice %68 {offsets = [0, 0], sizes = [32, 256], strides = [1, 1]} : vector<128x256xbf16> to vector<32x256xbf16>
    %c0_37 = arith.constant 0 : index
    %c0_38 = arith.constant 0 : index
    %c0_39 = arith.constant 0 : index
    %70 = vector.load %arg28[%c0_37, %c0_38, %c0_39] : memref<4x256x256xbf16, #tpu.memory_space<vmem>>, vector<1x256x256xbf16>
    %71 = vector.shape_cast %70 : vector<1x256x256xbf16> to vector<256x256xbf16>
    %cst_40 = arith.constant dense<0.000000e+00> : vector<32x256xf32>
    %72 = tpu.matmul %69, %71, %cst_40 {dimension_numbers = #tpu.dot_dimension_numbers<[1], [0], [0], [1], [0, 0, 1, 1], [], []>} : vector<32x256xbf16>, vector<256x256xbf16>, vector<32x256xf32> -> vector<32x256xf32>
    %73 = vector.extract_strided_slice %68 {offsets = [32, 0], sizes = [32, 256], strides = [1, 1]} : vector<128x256xbf16> to vector<32x256xbf16>
    %c1_41 = arith.constant 1 : index
    %c0_42 = arith.constant 0 : index
    %c0_43 = arith.constant 0 : index
    %74 = vector.load %arg28[%c1_41, %c0_42, %c0_43] : memref<4x256x256xbf16, #tpu.memory_space<vmem>>, vector<1x256x256xbf16>
    %75 = vector.shape_cast %74 : vector<1x256x256xbf16> to vector<256x256xbf16>
    %cst_44 = arith.constant dense<0.000000e+00> : vector<32x256xf32>
    %76 = tpu.matmul %73, %75, %cst_44 {dimension_numbers = #tpu.dot_dimension_numbers<[1], [0], [0], [1], [0, 0, 1, 1], [], []>} : vector<32x256xbf16>, vector<256x256xbf16>, vector<32x256xf32> -> vector<32x256xf32>
    %77 = arith.addf %72, %76 : vector<32x256xf32>
    %78 = vector.extract_strided_slice %68 {offsets = [64, 0], sizes = [32, 256], strides = [1, 1]} : vector<128x256xbf16> to vector<32x256xbf16>
    %c2_45 = arith.constant 2 : index
    %c0_46 = arith.constant 0 : index
    %c0_47 = arith.constant 0 : index
    %79 = vector.load %arg28[%c2_45, %c0_46, %c0_47] : memref<4x256x256xbf16, #tpu.memory_space<vmem>>, vector<1x256x256xbf16>
    %80 = vector.shape_cast %79 : vector<1x256x256xbf16> to vector<256x256xbf16>
    %cst_48 = arith.constant dense<0.000000e+00> : vector<32x256xf32>
    %81 = tpu.matmul %78, %80, %cst_48 {dimension_numbers = #tpu.dot_dimension_numbers<[1], [0], [0], [1], [0, 0, 1, 1], [], []>} : vector<32x256xbf16>, vector<256x256xbf16>, vector<32x256xf32> -> vector<32x256xf32>
    %82 = arith.addf %77, %81 : vector<32x256xf32>
    %83 = vector.extract_strided_slice %68 {offsets = [96, 0], sizes = [32, 256], strides = [1, 1]} : vector<128x256xbf16> to vector<32x256xbf16>
    %c3_49 = arith.constant 3 : index
    %c0_50 = arith.constant 0 : index
    %c0_51 = arith.constant 0 : index
    %84 = vector.load %arg28[%c3_49, %c0_50, %c0_51] : memref<4x256x256xbf16, #tpu.memory_space<vmem>>, vector<1x256x256xbf16>
    %85 = vector.shape_cast %84 : vector<1x256x256xbf16> to vector<256x256xbf16>
    %cst_52 = arith.constant dense<0.000000e+00> : vector<32x256xf32>
    %86 = tpu.matmul %83, %85, %cst_52 {dimension_numbers = #tpu.dot_dimension_numbers<[1], [0], [0], [1], [0, 0, 1, 1], [], []>} : vector<32x256xbf16>, vector<256x256xbf16>, vector<32x256xf32> -> vector<32x256xf32>
    %87 = arith.addf %82, %86 : vector<32x256xf32>
    %cst_53 = arith.constant dense<0.000000e+00> : vector<256xf32>
    %88 = vector.multi_reduction <add>, %87, %cst_53 [0] : vector<32x256xf32> to vector<256xf32>
    %89 = vector.shape_cast %88 : vector<256xf32> to vector<1x256xf32>
    %90 = arith.mulf %87, %87 : vector<32x256xf32>
    %cst_54 = arith.constant dense<0.000000e+00> : vector<256xf32>
    %91 = vector.multi_reduction <add>, %90, %cst_54 [0] : vector<32x256xf32> to vector<256xf32>
    %92 = vector.shape_cast %91 : vector<256xf32> to vector<1x256xf32>
    %93 = tpu.concatenate %89, %92 in 0 : vector<1x256xf32>, vector<1x256xf32> -> vector<2x256xf32>
    %c0_55 = arith.constant 0 : index
    %c0_56 = arith.constant 0 : index
    %94 = vector.load %arg10[%c0_55, %c0_56] : memref<256x16xf32, #tpu.memory_space<vmem>>, vector<256x16xf32>
    %cst_57 = arith.constant dense<0.000000e+00> : vector<2x16xf32>
    %95 = tpu.matmul %93, %94, %cst_57 {dimension_numbers = #tpu.dot_dimension_numbers<[1], [0], [0], [1], [0, 0, 1, 1], [], []>} : vector<2x256xf32>, vector<256x16xf32>, vector<2x16xf32> -> vector<2x16xf32>
    %cst_58 = arith.constant 0.001953125 : f32
    %96 = vector.broadcast %cst_58 : f32 to vector<2x16xf32>
    %97 = arith.mulf %95, %96 : vector<2x16xf32>
    %c0_59 = arith.constant 0 : index
    %c0_60 = arith.constant 0 : index
    %98 = vector.load %arg11[%c0_59, %c0_60] : memref<16x256xf32, #tpu.memory_space<vmem>>, vector<16x256xf32>
    %cst_61 = arith.constant dense<0.000000e+00> : vector<2x256xf32>
    %99 = tpu.matmul %97, %98, %cst_61 {dimension_numbers = #tpu.dot_dimension_numbers<[1], [0], [0], [1], [0, 0, 1, 1], [], []>} : vector<2x16xf32>, vector<16x256xf32>, vector<2x256xf32> -> vector<2x256xf32>
    %100 = vector.extract_strided_slice %99 {offsets = [0, 0], sizes = [1, 256], strides = [1, 1]} : vector<2x256xf32> to vector<1x256xf32>
    %101 = vector.extract_strided_slice %99 {offsets = [1, 0], sizes = [1, 256], strides = [1, 1]} : vector<2x256xf32> to vector<1x256xf32>
    %102 = arith.mulf %100, %100 : vector<1x256xf32>
    %103 = arith.subf %101, %102 : vector<1x256xf32>
    %cst_62 = arith.constant 0.000000e+00 : f32
    %104 = vector.broadcast %cst_62 : f32 to vector<1x256xf32>
    %105 = arith.maximumf %103, %104 : vector<1x256xf32>
    %106 = vector.broadcast %100 : vector<1x256xf32> to vector<32x256xf32>
    %107 = arith.subf %87, %106 : vector<32x256xf32>
    %cst_63 = arith.constant 9.99999974E-6 : f32
    %108 = vector.broadcast %cst_63 : f32 to vector<1x256xf32>
    %109 = arith.addf %105, %108 : vector<1x256xf32>
    %110 = math.rsqrt %109 : vector<1x256xf32>
    %111 = vector.broadcast %110 : vector<1x256xf32> to vector<32x256xf32>
    %112 = arith.mulf %107, %111 : vector<32x256xf32>
    %c0_64 = arith.constant 0 : index
    %c0_65 = arith.constant 0 : index
    %113 = vector.load %arg12[%c0_64, %c0_65] : memref<1x256xf32, #tpu.memory_space<vmem>>, vector<1x256xf32>
    %114 = vector.broadcast %113 : vector<1x256xf32> to vector<32x256xf32>
    %115 = arith.mulf %112, %114 : vector<32x256xf32>
    %c0_66 = arith.constant 0 : index
    %c0_67 = arith.constant 0 : index
    %116 = vector.load %arg13[%c0_66, %c0_67] : memref<1x256xf32, #tpu.memory_space<vmem>>, vector<1x256xf32>
    %117 = vector.broadcast %116 : vector<1x256xf32> to vector<32x256xf32>
    %118 = arith.addf %115, %117 : vector<32x256xf32>
    %cst_68 = arith.constant 0.000000e+00 : f32
    %119 = vector.broadcast %cst_68 : f32 to vector<32x256xf32>
    %120 = arith.cmpf ogt, %118, %119 : vector<32x256xf32>
    %cst_69 = arith.constant 2.000000e-01 : f32
    %121 = vector.broadcast %cst_69 : f32 to vector<32x256xf32>
    %122 = arith.mulf %121, %118 : vector<32x256xf32>
    %123 = arith.select %120, %118, %122 : vector<32x256xi1>, vector<32x256xf32>
    %124 = arith.truncf %123 : vector<32x256xf32> to vector<32x256xbf16>
    %c1_i32_70 = arith.constant 1 : i32
    %125 = tpu.memref_slice %arg30[%c1_i32_70] : memref<2x!tpu.dma_semaphore, #tpu.memory_space<semaphore_mem>> -> memref<1x!tpu.dma_semaphore, #tpu.memory_space<semaphore_mem>>
    %126 = tpu.memref_squeeze %125 : memref<1x!tpu.dma_semaphore, #tpu.memory_space<semaphore_mem>> -> memref<!tpu.dma_semaphore, #tpu.memory_space<semaphore_mem>>
    tpu.wait_dma2 semaphore(%126 : memref<!tpu.dma_semaphore, #tpu.memory_space<semaphore_mem>>) src(%arg15 : memref<4x256x256xbf16, #tpu.memory_space<any>>) dst(%arg29 : memref<4x256x256xbf16, #tpu.memory_space<vmem>>)
    %c0_71 = arith.constant 0 : index
    %c0_72 = arith.constant 0 : index
    %127 = vector.load %arg14[%c0_71, %c0_72] : memref<64x32xbf16, #tpu.memory_space<vmem>>, vector<64x32xbf16>
    %cst_73 = arith.constant dense<0.000000e+00> : vector<64x256xf32>
    %128 = tpu.matmul %127, %124, %cst_73 {dimension_numbers = #tpu.dot_dimension_numbers<[1], [0], [0], [1], [0, 0, 1, 1], [], []>} : vector<64x32xbf16>, vector<32x256xbf16>, vector<64x256xf32> -> vector<64x256xf32>
    %129 = arith.truncf %128 : vector<64x256xf32> to vector<64x256xbf16>
    %130 = vector.extract_strided_slice %129 {offsets = [0, 0], sizes = [16, 256], strides = [1, 1]} : vector<64x256xbf16> to vector<16x256xbf16>
    %c0_74 = arith.constant 0 : index
    %c0_75 = arith.constant 0 : index
    %c0_76 = arith.constant 0 : index
    %131 = vector.load %arg29[%c0_74, %c0_75, %c0_76] : memref<4x256x256xbf16, #tpu.memory_space<vmem>>, vector<1x256x256xbf16>
    %132 = vector.shape_cast %131 : vector<1x256x256xbf16> to vector<256x256xbf16>
    %cst_77 = arith.constant dense<0.000000e+00> : vector<16x256xf32>
    %133 = tpu.matmul %130, %132, %cst_77 {dimension_numbers = #tpu.dot_dimension_numbers<[1], [0], [0], [1], [0, 0, 1, 1], [], []>} : vector<16x256xbf16>, vector<256x256xbf16>, vector<16x256xf32> -> vector<16x256xf32>
    %134 = vector.extract_strided_slice %129 {offsets = [16, 0], sizes = [16, 256], strides = [1, 1]} : vector<64x256xbf16> to vector<16x256xbf16>
    %c1_78 = arith.constant 1 : index
    %c0_79 = arith.constant 0 : index
    %c0_80 = arith.constant 0 : index
    %135 = vector.load %arg29[%c1_78, %c0_79, %c0_80] : memref<4x256x256xbf16, #tpu.memory_space<vmem>>, vector<1x256x256xbf16>
    %136 = vector.shape_cast %135 : vector<1x256x256xbf16> to vector<256x256xbf16>
    %cst_81 = arith.constant dense<0.000000e+00> : vector<16x256xf32>
    %137 = tpu.matmul %134, %136, %cst_81 {dimension_numbers = #tpu.dot_dimension_numbers<[1], [0], [0], [1], [0, 0, 1, 1], [], []>} : vector<16x256xbf16>, vector<256x256xbf16>, vector<16x256xf32> -> vector<16x256xf32>
    %138 = arith.addf %133, %137 : vector<16x256xf32>
    %139 = vector.extract_strided_slice %129 {offsets = [32, 0], sizes = [16, 256], strides = [1, 1]} : vector<64x256xbf16> to vector<16x256xbf16>
    %c2_82 = arith.constant 2 : index
    %c0_83 = arith.constant 0 : index
    %c0_84 = arith.constant 0 : index
    %140 = vector.load %arg29[%c2_82, %c0_83, %c0_84] : memref<4x256x256xbf16, #tpu.memory_space<vmem>>, vector<1x256x256xbf16>
    %141 = vector.shape_cast %140 : vector<1x256x256xbf16> to vector<256x256xbf16>
    %cst_85 = arith.constant dense<0.000000e+00> : vector<16x256xf32>
    %142 = tpu.matmul %139, %141, %cst_85 {dimension_numbers = #tpu.dot_dimension_numbers<[1], [0], [0], [1], [0, 0, 1, 1], [], []>} : vector<16x256xbf16>, vector<256x256xbf16>, vector<16x256xf32> -> vector<16x256xf32>
    %143 = arith.addf %138, %142 : vector<16x256xf32>
    %144 = vector.extract_strided_slice %129 {offsets = [48, 0], sizes = [16, 256], strides = [1, 1]} : vector<64x256xbf16> to vector<16x256xbf16>
    %c3_86 = arith.constant 3 : index
    %c0_87 = arith.constant 0 : index
    %c0_88 = arith.constant 0 : index
    %145 = vector.load %arg29[%c3_86, %c0_87, %c0_88] : memref<4x256x256xbf16, #tpu.memory_space<vmem>>, vector<1x256x256xbf16>
    %146 = vector.shape_cast %145 : vector<1x256x256xbf16> to vector<256x256xbf16>
    %cst_89 = arith.constant dense<0.000000e+00> : vector<16x256xf32>
    %147 = tpu.matmul %144, %146, %cst_89 {dimension_numbers = #tpu.dot_dimension_numbers<[1], [0], [0], [1], [0, 0, 1, 1], [], []>} : vector<16x256xbf16>, vector<256x256xbf16>, vector<16x256xf32> -> vector<16x256xf32>
    %148 = arith.addf %143, %147 : vector<16x256xf32>
    %cst_90 = arith.constant dense<0.000000e+00> : vector<256xf32>
    %149 = vector.multi_reduction <add>, %148, %cst_90 [0] : vector<16x256xf32> to vector<256xf32>
    %150 = vector.shape_cast %149 : vector<256xf32> to vector<1x256xf32>
    %151 = arith.mulf %148, %148 : vector<16x256xf32>
    %cst_91 = arith.constant dense<0.000000e+00> : vector<256xf32>
    %152 = vector.multi_reduction <add>, %151, %cst_91 [0] : vector<16x256xf32> to vector<256xf32>
    %153 = vector.shape_cast %152 : vector<256xf32> to vector<1x256xf32>
    %154 = tpu.concatenate %150, %153 in 0 : vector<1x256xf32>, vector<1x256xf32> -> vector<2x256xf32>
    %c0_92 = arith.constant 0 : index
    %c0_93 = arith.constant 0 : index
    %155 = vector.load %arg16[%c0_92, %c0_93] : memref<256x32xf32, #tpu.memory_space<vmem>>, vector<256x32xf32>
    %cst_94 = arith.constant dense<0.000000e+00> : vector<2x32xf32>
    %156 = tpu.matmul %154, %155, %cst_94 {dimension_numbers = #tpu.dot_dimension_numbers<[1], [0], [0], [1], [0, 0, 1, 1], [], []>} : vector<2x256xf32>, vector<256x32xf32>, vector<2x32xf32> -> vector<2x32xf32>
    %cst_95 = arith.constant 7.812500e-03 : f32
    %157 = vector.broadcast %cst_95 : f32 to vector<2x32xf32>
    %158 = arith.mulf %156, %157 : vector<2x32xf32>
    %c0_96 = arith.constant 0 : index
    %c0_97 = arith.constant 0 : index
    %159 = vector.load %arg17[%c0_96, %c0_97] : memref<32x256xf32, #tpu.memory_space<vmem>>, vector<32x256xf32>
    %cst_98 = arith.constant dense<0.000000e+00> : vector<2x256xf32>
    %160 = tpu.matmul %158, %159, %cst_98 {dimension_numbers = #tpu.dot_dimension_numbers<[1], [0], [0], [1], [0, 0, 1, 1], [], []>} : vector<2x32xf32>, vector<32x256xf32>, vector<2x256xf32> -> vector<2x256xf32>
    %161 = vector.extract_strided_slice %160 {offsets = [0, 0], sizes = [1, 256], strides = [1, 1]} : vector<2x256xf32> to vector<1x256xf32>
    %162 = vector.extract_strided_slice %160 {offsets = [1, 0], sizes = [1, 256], strides = [1, 1]} : vector<2x256xf32> to vector<1x256xf32>
    %163 = arith.mulf %161, %161 : vector<1x256xf32>
    %164 = arith.subf %162, %163 : vector<1x256xf32>
    %cst_99 = arith.constant 0.000000e+00 : f32
    %165 = vector.broadcast %cst_99 : f32 to vector<1x256xf32>
    %166 = arith.maximumf %164, %165 : vector<1x256xf32>
    %167 = vector.broadcast %161 : vector<1x256xf32> to vector<16x256xf32>
    %168 = arith.subf %148, %167 : vector<16x256xf32>
    %cst_100 = arith.constant 9.99999974E-6 : f32
    %169 = vector.broadcast %cst_100 : f32 to vector<1x256xf32>
    %170 = arith.addf %166, %169 : vector<1x256xf32>
    %171 = math.rsqrt %170 : vector<1x256xf32>
    %172 = vector.broadcast %171 : vector<1x256xf32> to vector<16x256xf32>
    %173 = arith.mulf %168, %172 : vector<16x256xf32>
    %c0_101 = arith.constant 0 : index
    %c0_102 = arith.constant 0 : index
    %174 = vector.load %arg18[%c0_101, %c0_102] : memref<1x256xf32, #tpu.memory_space<vmem>>, vector<1x256xf32>
    %175 = vector.broadcast %174 : vector<1x256xf32> to vector<16x256xf32>
    %176 = arith.mulf %173, %175 : vector<16x256xf32>
    %c0_103 = arith.constant 0 : index
    %c0_104 = arith.constant 0 : index
    %177 = vector.load %arg19[%c0_103, %c0_104] : memref<1x256xf32, #tpu.memory_space<vmem>>, vector<1x256xf32>
    %178 = vector.broadcast %177 : vector<1x256xf32> to vector<16x256xf32>
    %179 = arith.addf %176, %178 : vector<16x256xf32>
    %cst_105 = arith.constant 0.000000e+00 : f32
    %180 = vector.broadcast %cst_105 : f32 to vector<16x256xf32>
    %181 = arith.cmpf ogt, %179, %180 : vector<16x256xf32>
    %cst_106 = arith.constant 2.000000e-01 : f32
    %182 = vector.broadcast %cst_106 : f32 to vector<16x256xf32>
    %183 = arith.mulf %182, %179 : vector<16x256xf32>
    %184 = arith.select %181, %179, %183 : vector<16x256xi1>, vector<16x256xf32>
    %185 = arith.truncf %184 : vector<16x256xf32> to vector<16x256xbf16>
    %c0_107 = arith.constant 0 : index
    %c0_108 = arith.constant 0 : index
    %186 = vector.load %arg20[%c0_107, %c0_108] : memref<256x128xbf16, #tpu.memory_space<vmem>>, vector<256x128xbf16>
    %cst_109 = arith.constant dense<0.000000e+00> : vector<16x128xf32>
    %187 = tpu.matmul %185, %186, %cst_109 {dimension_numbers = #tpu.dot_dimension_numbers<[1], [0], [0], [1], [0, 0, 1, 1], [], []>} : vector<16x256xbf16>, vector<256x128xbf16>, vector<16x128xf32> -> vector<16x128xf32>
    %c0_110 = arith.constant 0 : index
    %c0_111 = arith.constant 0 : index
    %188 = vector.load %arg21[%c0_110, %c0_111] : memref<16x128xf32, #tpu.memory_space<vmem>>, vector<16x128xf32>
    %189 = arith.mulf %187, %188 : vector<16x128xf32>
    %190 = arith.truncf %189 : vector<16x128xf32> to vector<16x128xbf16>
    %c0_112 = arith.constant 0 : index
    %c0_113 = arith.constant 0 : index
    %191 = vector.load %arg22[%c0_112, %c0_113] : memref<2x16xbf16, #tpu.memory_space<vmem>>, vector<2x16xbf16>
    %cst_114 = arith.constant dense<0.000000e+00> : vector<2x128xf32>
    %192 = tpu.matmul %191, %190, %cst_114 {dimension_numbers = #tpu.dot_dimension_numbers<[1], [0], [0], [1], [0, 0, 1, 1], [], []>} : vector<2x16xbf16>, vector<16x128xbf16>, vector<2x128xf32> -> vector<2x128xf32>
    %193 = arith.truncf %192 : vector<2x128xf32> to vector<2x128xbf16>
    %c0_115 = arith.constant 0 : index
    %c0_116 = arith.constant 0 : index
    %194 = vector.load %arg23[%c0_115, %c0_116] : memref<128x16xbf16, #tpu.memory_space<vmem>>, vector<128x16xbf16>
    %cst_117 = arith.constant dense<0.000000e+00> : vector<2x16xf32>
    %195 = tpu.matmul %193, %194, %cst_117 {dimension_numbers = #tpu.dot_dimension_numbers<[1], [0], [0], [1], [0, 0, 1, 1], [], []>} : vector<2x128xbf16>, vector<128x16xbf16>, vector<2x16xf32> -> vector<2x16xf32>
    %c0_118 = arith.constant 0 : index
    %c0_119 = arith.constant 0 : index
    %196 = vector.load %arg24[%c0_118, %c0_119] : memref<1x16xf32, #tpu.memory_space<vmem>>, vector<1x16xf32>
    %197 = vector.broadcast %196 : vector<1x16xf32> to vector<2x16xf32>
    %198 = arith.addf %195, %197 : vector<2x16xf32>
    %cst_120 = arith.constant 0.000000e+00 : f32
    %199 = vector.broadcast %cst_120 : f32 to vector<2x16xf32>
    %200 = arith.maximumf %198, %199 : vector<2x16xf32>
    %201 = arith.truncf %200 : vector<2x16xf32> to vector<2x16xbf16>
    %c0_121 = arith.constant 0 : index
    %c0_122 = arith.constant 0 : index
    %202 = vector.load %arg25[%c0_121, %c0_122] : memref<16x6xbf16, #tpu.memory_space<vmem>>, vector<16x6xbf16>
    %cst_123 = arith.constant dense<0.000000e+00> : vector<2x6xf32>
    %203 = tpu.matmul %201, %202, %cst_123 {dimension_numbers = #tpu.dot_dimension_numbers<[1], [0], [0], [1], [0, 0, 1, 1], [], []>} : vector<2x16xbf16>, vector<16x6xbf16>, vector<2x6xf32> -> vector<2x6xf32>
    %c0_124 = arith.constant 0 : index
    %c0_125 = arith.constant 0 : index
    %204 = vector.load %arg26[%c0_124, %c0_125] : memref<1x6xf32, #tpu.memory_space<vmem>>, vector<1x6xf32>
    %205 = vector.broadcast %204 : vector<1x6xf32> to vector<2x6xf32>
    %206 = arith.addf %203, %205 : vector<2x6xf32>
    %c0_126 = arith.constant 0 : index
    %c0_127 = arith.constant 0 : index
    %207 = vector.load %arg27[%c0_126, %c0_127] : memref<2x6xf32, #tpu.memory_space<vmem>>, vector<2x6xf32>
    tpu.vector_store %arg27[%c0_126, %c0_127], %206 {strides = array<i32>} : memref<2x6xf32, #tpu.memory_space<vmem>>, vector<2x6xf32>,
    return
  }
  func.func @transform_0(%arg0: i32) -> (i32, i32) {
    %c0_i32 = arith.constant 0 : i32
    %c0_i32_0 = arith.constant 0 : i32
    %c0_i32_1 = arith.constant 0 : i32
    return %c0_i32, %c0_i32_0 : i32, i32
  }
  func.func @transform_1(%arg0: i32) -> (i32, i32) {
    %c0_i32 = arith.constant 0 : i32
    %c0_i32_0 = arith.constant 0 : i32
    %c0_i32_1 = arith.constant 0 : i32
    return %c0_i32, %c0_i32_0 : i32, i32
  }
  func.func @transform_2(%arg0: i32) -> (i32, i32, i32) {
    %c0_i32 = arith.constant 0 : i32
    %c0_i32_0 = arith.constant 0 : i32
    %c0_i32_1 = arith.constant 0 : i32
    %c0_i32_2 = arith.constant 0 : i32
    return %c0_i32, %c0_i32_0, %c0_i32_1 : i32, i32, i32
  }
  func.func @transform_3(%arg0: i32) -> (i32, i32) {
    %c0_i32 = arith.constant 0 : i32
    %c0_i32_0 = arith.constant 0 : i32
    %c0_i32_1 = arith.constant 0 : i32
    return %c0_i32, %c0_i32_0 : i32, i32
  }
  func.func @transform_4(%arg0: i32) -> (i32, i32) {
    %c0_i32 = arith.constant 0 : i32
    %c0_i32_0 = arith.constant 0 : i32
    %c0_i32_1 = arith.constant 0 : i32
    return %c0_i32, %c0_i32_0 : i32, i32
  }
  func.func @transform_5(%arg0: i32) -> (i32, i32) {
    %c0_i32 = arith.constant 0 : i32
    %c0_i32_0 = arith.constant 0 : i32
    %c0_i32_1 = arith.constant 0 : i32
    return %c0_i32, %c0_i32_0 : i32, i32
  }
  func.func @transform_6(%arg0: i32) -> (i32, i32) {
    %c0_i32 = arith.constant 0 : i32
    %c0_i32_0 = arith.constant 0 : i32
    %c0_i32_1 = arith.constant 0 : i32
    return %c0_i32, %c0_i32_0 : i32, i32
  }
  func.func @transform_7(%arg0: i32) -> (i32, i32) {
    %c0_i32 = arith.constant 0 : i32
    %c0_i32_0 = arith.constant 0 : i32
    %c0_i32_1 = arith.constant 0 : i32
    return %c0_i32, %c0_i32_0 : i32, i32
  }
  func.func @transform_9(%arg0: i32) -> (i32, i32) {
    %c0_i32 = arith.constant 0 : i32
    %c0_i32_0 = arith.constant 0 : i32
    %c0_i32_1 = arith.constant 0 : i32
    return %c0_i32, %c0_i32_0 : i32, i32
  }
  func.func @transform_10(%arg0: i32) -> (i32, i32) {
    %c0_i32 = arith.constant 0 : i32
    %c0_i32_0 = arith.constant 0 : i32
    %c0_i32_1 = arith.constant 0 : i32
    return %c0_i32, %c0_i32_0 : i32, i32
  }
  func.func @transform_11(%arg0: i32) -> (i32, i32) {
    %c0_i32 = arith.constant 0 : i32
    %c0_i32_0 = arith.constant 0 : i32
    %c0_i32_1 = arith.constant 0 : i32
    return %c0_i32, %c0_i32_0 : i32, i32
  }
  func.func @transform_12(%arg0: i32) -> (i32, i32) {
    %c0_i32 = arith.constant 0 : i32
    %c0_i32_0 = arith.constant 0 : i32
    %c0_i32_1 = arith.constant 0 : i32
    return %c0_i32, %c0_i32_0 : i32, i32
  }
  func.func @transform_13(%arg0: i32) -> (i32, i32) {
    %c0_i32 = arith.constant 0 : i32
    %c0_i32_0 = arith.constant 0 : i32
    %c0_i32_1 = arith.constant 0 : i32
    return %c0_i32, %c0_i32_0 : i32, i32
  }
  func.func @transform_15(%arg0: i32) -> (i32, i32) {
    %c0_i32 = arith.constant 0 : i32
    %c0_i32_0 = arith.constant 0 : i32
    %c0_i32_1 = arith.constant 0 : i32
    return %c0_i32, %c0_i32_0 : i32, i32
  }
  func.func @transform_16(%arg0: i32) -> (i32, i32) {
    %c0_i32 = arith.constant 0 : i32
    %c0_i32_0 = arith.constant 0 : i32
    %c0_i32_1 = arith.constant 0 : i32
    return %c0_i32, %c0_i32_0 : i32, i32
  }
  func.func @transform_17(%arg0: i32) -> (i32, i32) {
    %c0_i32 = arith.constant 0 : i32
    %c0_i32_0 = arith.constant 0 : i32
    %c0_i32_1 = arith.constant 0 : i32
    return %c0_i32, %c0_i32_0 : i32, i32
  }
  func.func @transform_18(%arg0: i32) -> (i32, i32) {
    %c0_i32 = arith.constant 0 : i32
    %c0_i32_0 = arith.constant 0 : i32
    %c0_i32_1 = arith.constant 0 : i32
    return %c0_i32, %c0_i32_0 : i32, i32
  }
  func.func @transform_19(%arg0: i32) -> (i32, i32) {
    %c0_i32 = arith.constant 0 : i32
    %c0_i32_0 = arith.constant 0 : i32
    %c0_i32_1 = arith.constant 0 : i32
    return %c0_i32, %c0_i32_0 : i32, i32
  }
  func.func @transform_20(%arg0: i32) -> (i32, i32) {
    %c0_i32 = arith.constant 0 : i32
    %c0_i32_0 = arith.constant 0 : i32
    %c0_i32_1 = arith.constant 0 : i32
    return %c0_i32, %c0_i32_0 : i32, i32
  }
  func.func @transform_21(%arg0: i32) -> (i32, i32) {
    %c0_i32 = arith.constant 0 : i32
    %c0_i32_0 = arith.constant 0 : i32
    %c0_i32_1 = arith.constant 0 : i32
    return %c0_i32, %c0_i32_0 : i32, i32
  }
  func.func @transform_22(%arg0: i32) -> (i32, i32) {
    %c0_i32 = arith.constant 0 : i32
    %c0_i32_0 = arith.constant 0 : i32
    %c0_i32_1 = arith.constant 0 : i32
    return %c0_i32, %c0_i32_0 : i32, i32
  }
  func.func @transform_23(%arg0: i32) -> (i32, i32) {
    %c0_i32 = arith.constant 0 : i32
    %c0_i32_0 = arith.constant 0 : i32
    %c0_i32_1 = arith.constant 0 : i32
    return %c0_i32, %c0_i32_0 : i32, i32
  }
  func.func @transform_24(%arg0: i32) -> (i32, i32) {
    %c0_i32 = arith.constant 0 : i32
    %c0_i32_0 = arith.constant 0 : i32
    %c0_i32_1 = arith.constant 0 : i32
    return %c0_i32, %c0_i32_0 : i32, i32
  }
  func.func @transform_25(%arg0: i32) -> (i32, i32) {
    %c0_i32 = arith.constant 0 : i32
    %c0_i32_0 = arith.constant 0 : i32
    %c0_i32_1 = arith.constant 0 : i32
    return %c0_i32, %c0_i32_0 : i32, i32
  }
  func.func @transform_26(%arg0: i32) -> (i32, i32) {
    %c0_i32 = arith.constant 0 : i32
    %c0_i32_0 = arith.constant 0 : i32
    %c0_i32_1 = arith.constant 0 : i32
    return %c0_i32, %c0_i32_0 : i32, i32
  }
}

</mosaic_0001>

<bundles_post_ra>
// kernel: classifier_forward.1
= control target key start
LH: loop header
LB: loop body
LE: loop exit
PB: predicated region body
PF: predicated region fallthrough
CT: control target
= control target key end

     0   :  { %s10069_s0 = inlined_call_operand.vmem [shape: bf16[128,192], index: 0, kind: input, shape index: {}]   ;;  %s10070_s1 = inlined_call_operand.vmem [shape: bf16[256,128], index: 1, kind: input, shape index: {}]   ;;  %s10071_s2 = inlined_call_operand.hbm [shape: bf16[4,192,256], index: 2, kind: input, shape index: {}]   ;;  %s10072_s3 = inlined_call_operand.vmem [shape: f32[256,8], index: 3, kind: input, shape index: {}]   ;;  %s10073_s4 = inlined_call_operand.vmem [shape: f32[8,256], index: 4, kind: input, shape index: {}]   ;;  %s10074_s5 = inlined_call_operand.hbm [shape: f32[1,256], index: 5, kind: input, shape index: {}]   ;;  %s10075_s6 = inlined_call_operand.hbm [shape: f32[1,256], index: 6, kind: input, shape index: {}]   ;;  %s10076_s7 = inlined_call_operand.vmem [shape: bf16[128,64], index: 7, kind: input, shape index: {}]   ;;  %s10077_s8 = inlined_call_operand.vmem [shape: bf16[4,256,256], index: 8, kind: input, shape index: {}]   ;;  %s10078_s9 = inlined_call_operand.vmem [shape: f32[256,16], index: 9, kind: input, shape index: {}]   ;;  %s10079_s10 = inlined_call_operand.vmem [shape: f32[16,256], index: 10, kind: input, shape index: {}]   ;;  %s10080_s11 = inlined_call_operand.hbm [shape: f32[1,256], index: 11, kind: input, shape index: {}]   ;;  %s10081_s12 = inlined_call_operand.hbm [shape: f32[1,256], index: 12, kind: input, shape index: {}]   ;;  %s10082_s13 = inlined_call_operand.vmem [shape: bf16[64,32], index: 13, kind: input, shape index: {}]   ;;  %s10083_s14 = inlined_call_operand.vmem [shape: bf16[4,256,256], index: 14, kind: input, shape index: {}]   ;;  %s10084_s15 = inlined_call_operand.vmem [shape: f32[256,32], index: 15, kind: input, shape index: {}]   ;;  %s10085_s16 = inlined_call_operand.vmem [shape: f32[32,256], index: 16, kind: input, shape index: {}]   ;;  %s10086_s17 = inlined_call_operand.hbm [shape: f32[1,256], index: 17, kind: input, shape index: {}]   ;;  %s10087_s18 = inlined_call_operand.hbm [shape: f32[1,256], index: 18, kind: input, shape index: {}]   ;;  %s10088_s19 = inlined_call_operand.vmem [shape: bf16[256,128], index: 19, kind: input, shape index: {}]   ;;  %s10089_s20 = inlined_call_operand.vmem [shape: f32[16,128], index: 20, kind: input, shape index: {}]   ;;  %s10090_s21 = inlined_call_operand.hbm [shape: bf16[2,16], index: 21, kind: input, shape index: {}]   ;;  %s10091_s22 = inlined_call_operand.vmem [shape: bf16[128,16], index: 22, kind: input, shape index: {}]   ;;  %s10092_s23 = inlined_call_operand.hbm [shape: f32[1,16], index: 23, kind: input, shape index: {}]   ;;  %s10093_s24 = inlined_call_operand.vmem [shape: bf16[16,6], index: 24, kind: input, shape index: {}]   ;;  %s10094_s25 = inlined_call_operand.hbm [shape: f32[1,6], index: 25, kind: input, shape index: {}]   ;;  %s10095_s26 = inlined_call_operand.hbm [shape: f32[2,6], index: 26, kind: output, shape index: {}]  }
   0x1   :  { %10107 = sst [smem:[#allocation34_spill]] %s10069_s0 }
   0x2   :  { %10108 = sst [smem:[#allocation35_spill]] %s10070_s1 }
   0x3   :  { %10109 = sst [smem:[#allocation36_spill]] %s10071_s2 }
   0x4   :  { %10110 = sst [smem:[#allocation37_spill]] %s10072_s3 }
   0x5   :  { %10111 = sst [smem:[#allocation38_spill]] %s10073_s4 }
   0x6   :  { %10112 = sst [smem:[#allocation39_spill]] %s10074_s5 }
   0x7   :  { %10113 = sst [smem:[#allocation40_spill]] %s10075_s6 }
   0x8   :  { %10114 = sst [smem:[#allocation41_spill]] %s10076_s7 }
   0x9   :  { %10115 = sst [smem:[#allocation42_spill]] %s10077_s8 }
   0xa   :  { %10116 = sst [smem:[#allocation43_spill]] %s10078_s9 }
   0xb   :  { %10117 = sst [smem:[#allocation44_spill]] %s10079_s10 }
   0xc   :  { %31 = vsyncpa [#allocation6], 0 }
   0xd   :  { %32 = vsyncpa [#allocation9], 0 }
   0xe   :  { %33 = vsyncpa [#allocation12], 0 }
   0xf   :  { %34 = vsyncpa [#allocation15], 0 }
  0x10   :  { %35 = vsyncpa [#allocation18], 0 }
  0x11   :  { %36 = vsyncpa [#allocation21], 0 }
  0x12   :  { %37 = vsyncpa [#allocation7], 0  ;;  %s7357_s27 = smov [#allocation8]   ;;  %s7358_s7 = smov [#allocation11]  }
  0x13   :  { %s64_s3 = sshll.u32 %s7357_s27, 4  ;;  %s90_s28 = sshll.u32 %s7358_s7, 4  ;;  %s65_s3 = int_to_ptr.vmem [resolvable:$true] %s64_s3  ;;  %s91_s28 = int_to_ptr.vmem [resolvable:$true] %s90_s28 }
  0x14   :  { %s10118_s29 = sld [smem:[#allocation39_spill]] }
  0x1a   :  { %s7097_s0 = scalar_lea.hbm %s10118_s29, 32 }
  0x1b   :  { %p7098_p0 = scmp.ne.s32.totalorder %s10118_s29, %s7097_s0  ;;  %p7101_p1 = scmp.lt.u32.totalorder %s7097_s0, %s10118_s29 }
  0x1d   :  { %p7103_p2 = pnand %p7101_p1, %p7098_p0 }
  0x1f   :  { %7106 = shalt.err (!%p7103_p2)
}
  0x20   :  { %s7107_s10 = scalar_lea.vmem %s65_s3, 32  ;;  %p7112_p4 = scmp.lt.s32.totalorder %s65_s3, %s65_s3 }
  0x21   :  { %p7108_p3 = scmp.ne.s32.totalorder %s65_s3, %s7107_s10  ;;  %p7113_p5 = scmp.lt.s32.totalorder %s7107_s10, %s7107_s10 }
  0x23   :  { %p7114_p6 = por %p7113_p5, %p7112_p4 }
  0x25   :  { %p7115_p7 = pnand %p7114_p6, %p7108_p3 }
  0x27   :  { %7118 = shalt.err (!%p7115_p7)
}
  0x28   :  { %67 = dma.hbm_to_vmem [thread:$0]  %s10118_s29, 32, %s65_s3, [#allocation9]  }
  0x29   :  { %s7119_s8 = scalar_lea.hbm %s10080_s11, 32 }
  0x2a   :  { %p7120_p8 = scmp.ne.s32.totalorder %s10080_s11, %s7119_s8  ;;  %p7123_p9 = scmp.lt.u32.totalorder %s7119_s8, %s10080_s11 }
  0x2c   :  { %p7125_p10 = pnand %p7123_p9, %p7120_p8 }
  0x2e   :  { %7128 = shalt.err (!%p7125_p10)
}
  0x2f   :  { %s7129_s2 = scalar_lea.vmem %s91_s28, 32  ;;  %p7134_p12 = scmp.lt.s32.totalorder %s91_s28, %s91_s28 }
  0x30   :  { %p7130_p11 = scmp.ne.s32.totalorder %s91_s28, %s7129_s2  ;;  %p7135_p13 = scmp.lt.s32.totalorder %s7129_s2, %s7129_s2 }
  0x32   :  { %p7136_p0 = por %p7135_p13, %p7134_p12 }
  0x34   :  { %p7137_p1 = pnand %p7136_p0, %p7130_p11 }
  0x36   :  { %7140 = shalt.err (!%p7137_p1)
}
  0x37   :  { %93 = dma.hbm_to_vmem [thread:$0]  %s10080_s11, 32, %s91_s28, [#allocation12]  }
  0x38   :  { %s7359_s5 = smov [#allocation14]   ;;  %s7360_s6 = smov [#allocation17]  }
  0x39   :  { %s116_s10 = sshll.u32 %s7359_s5, 4  ;;  %s140_s1 = sshll.u32 %s7360_s6, 4  ;;  %s117_s10 = int_to_ptr.vmem [resolvable:$true] %s116_s10  ;;  %s141_s1 = int_to_ptr.vmem [resolvable:$true] %s140_s1 }
  0x3a   :  { %s7141_s8 = scalar_lea.hbm %s10086_s17, 32 }
  0x3b   :  { %p7142_p2 = scmp.ne.s32.totalorder %s10086_s17, %s7141_s8  ;;  %p7145_p3 = scmp.lt.u32.totalorder %s7141_s8, %s10086_s17 }
  0x3d   :  { %p7147_p4 = pnand %p7145_p3, %p7142_p2 }
  0x3f   :  { %7150 = shalt.err (!%p7147_p4)
}
  0x40   :  { %s7151_s11 = scalar_lea.vmem %s117_s10, 32  ;;  %p7156_p6 = scmp.lt.s32.totalorder %s117_s10, %s117_s10 }
  0x41   :  { %p7152_p5 = scmp.ne.s32.totalorder %s117_s10, %s7151_s11  ;;  %p7157_p7 = scmp.lt.s32.totalorder %s7151_s11, %s7151_s11 }
  0x43   :  { %p7158_p8 = por %p7157_p7, %p7156_p6 }
  0x45   :  { %p7159_p9 = pnand %p7158_p8, %p7152_p5 }
  0x47   :  { %7162 = shalt.err (!%p7159_p9)
}
  0x48   :  { %119 = dma.hbm_to_vmem [thread:$0]  %s10086_s17, 32, %s117_s10, [#allocation15]  }
  0x49   :  { %s7163_s5 = scalar_lea.hbm %s10090_s21, 16 }
  0x4a   :  { %p7164_p10 = scmp.ne.s32.totalorder %s10090_s21, %s7163_s5  ;;  %p7167_p11 = scmp.lt.u32.totalorder %s7163_s5, %s10090_s21 }
  0x4c   :  { %p7169_p12 = pnand %p7167_p11, %p7164_p10 }
  0x4e   :  { %7172 = shalt.err (!%p7169_p12)
}
  0x4f   :  { %s7173_s4 = scalar_lea.vmem %s141_s1, 16  ;;  %s7177_s9 = scalar_lea.vmem %s141_s1, 32 }
  0x50   :  { %p7174_p13 = scmp.ne.s32.totalorder %s141_s1, %s7173_s4  ;;  %p7178_p0 = scmp.lt.s32.totalorder %s141_s1, %s141_s1 }
  0x51   :  { %p7179_p1 = scmp.lt.s32.totalorder %s7177_s9, %s7173_s4 }
  0x53   :  { %p7180_p2 = por %p7179_p1, %p7178_p0 }
  0x55   :  { %p7181_p3 = pnand %p7180_p2, %p7174_p13 }
  0x57   :  { %7184 = shalt.err (!%p7181_p3)
}
  0x58   :  { %143 = dma.hbm_to_vmem [thread:$0]  %s10090_s21, 16, %s141_s1, [#allocation18]  }
  0x59   :  { %s7361_s0 = smov [#allocation5]   ;;  %s10119_s2 = sld [smem:[#allocation36_spill]] }
  0x5a   :  { %s47_s30 = sshll.u32 %s7361_s0, 4  ;;  %s48_s30 = int_to_ptr.vmem [resolvable:$true] %s47_s30 }
  0x5f   :  { %s7185_s3 = scalar_lea.hbm %s10119_s2, 12288 }
  0x60   :  { %p7186_p4 = scmp.ne.s32.totalorder %s10119_s2, %s7185_s3  ;;  %p7189_p5 = scmp.lt.u32.totalorder %s7185_s3, %s10119_s2 }
  0x62   :  { %p7191_p6 = pnand %p7189_p5, %p7186_p4 }
  0x64   :  { %7194 = shalt.err (!%p7191_p6)
}
  0x65   :  { %s7195_s7 = scalar_lea.vmem %s48_s30, 12288  ;;  %p7200_p8 = scmp.lt.s32.totalorder %s48_s30, %s48_s30 }
  0x66   :  { %p7196_p7 = scmp.ne.s32.totalorder %s48_s30, %s7195_s7  ;;  %p7201_p9 = scmp.lt.s32.totalorder %s7195_s7, %s7195_s7 }
  0x68   :  { %p7202_p10 = por %p7201_p9, %p7200_p8 }
  0x6a   :  { %p7203_p11 = pnand %p7202_p10, %p7196_p7 }
  0x6c   :  { %7206 = shalt.err (!%p7203_p11)
}
  0x6d   :  { %s7362_s21 = smov 128   ;;  %s7363_s1 = smov 8  }
  0x6e   :  { %53 = dma.hbm_to_vmem [thread:$0]  %s10119_s2, 12288, %s48_s30, [#allocation6], %s7362_s21, %s7362_s21, %s7363_s1  }
  0x6f   :  { %s7364_s9 = smov [#allocation10]   ;;  %s7365_s10 = smov [#allocation13]  }
  0x70   :  { %s74_s17 = sshll.u32 %s7364_s9, 4  ;;  %s100_s0 = sshll.u32 %s7365_s10, 4  ;;  %s75_s17 = int_to_ptr.vmem [resolvable:$true] %s74_s17  ;;  %s101_s0 = int_to_ptr.vmem [resolvable:$true] %s100_s0 }
  0x71   :  { %s10120_s3 = sld [smem:[#allocation40_spill]] }
  0x77   :  { %s7207_s29 = scalar_lea.hbm %s10120_s3, 32 }
  0x78   :  { %p7208_p12 = scmp.ne.s32.totalorder %s10120_s3, %s7207_s29  ;;  %p7211_p13 = scmp.lt.u32.totalorder %s7207_s29, %s10120_s3 }
  0x7a   :  { %p7213_p0 = pnand %p7211_p13, %p7208_p12 }
  0x7c   :  { %7216 = shalt.err (!%p7213_p0)
}
  0x7d   :  { %s7217_s30 = scalar_lea.vmem %s75_s17, 32  ;;  %p7222_p2 = scmp.lt.s32.totalorder %s75_s17, %s75_s17 }
  0x7e   :  { %p7218_p1 = scmp.ne.s32.totalorder %s75_s17, %s7217_s30  ;;  %p7223_p3 = scmp.lt.s32.totalorder %s7217_s30, %s7217_s30 }
  0x80   :  { %p7224_p4 = por %p7223_p3, %p7222_p2 }
  0x82   :  { %p7225_p5 = pnand %p7224_p4, %p7218_p1 }
  0x84   :  { %7228 = shalt.err (!%p7225_p5)
}
  0x85   :  { %77 = dma.hbm_to_vmem [thread:$0]  %s10120_s3, 32, %s75_s17, [#allocation9]  }
  0x86   :  { %s7229_s4 = scalar_lea.hbm %s10081_s12, 32 }
  0x87   :  { %p7230_p6 = scmp.ne.s32.totalorder %s10081_s12, %s7229_s4  ;;  %p7233_p7 = scmp.lt.u32.totalorder %s7229_s4, %s10081_s12 }
  0x89   :  { %p7235_p8 = pnand %p7233_p7, %p7230_p6 }
  0x8b   :  { %7238 = shalt.err (!%p7235_p8)
}
  0x8c   :  { %s7239_s29 = scalar_lea.vmem %s101_s0, 32  ;;  %p7244_p10 = scmp.lt.s32.totalorder %s101_s0, %s101_s0 }
  0x8d   :  { %p7240_p9 = scmp.ne.s32.totalorder %s101_s0, %s7239_s29  ;;  %p7245_p11 = scmp.lt.s32.totalorder %s7239_s29, %s7239_s29 }
  0x8f   :  { %p7246_p12 = por %p7245_p11, %p7244_p10 }
  0x91   :  { %p7247_p13 = pnand %p7246_p12, %p7240_p9 }
  0x93   :  { %7250 = shalt.err (!%p7247_p13)
}
  0x94   :  { %103 = dma.hbm_to_vmem [thread:$0]  %s10081_s12, 32, %s101_s0, [#allocation12]  }
  0x95   :  { %s7366_s5 = smov [#allocation16]   ;;  %s7367_s27 = smov [#allocation19]  }
  0x96   :  { %s126_s6 = sshll.u32 %s7366_s5, 4  ;;  %s152_s7 = sshll.u32 %s7367_s27, 4  ;;  %s127_s6 = int_to_ptr.vmem [resolvable:$true] %s126_s6  ;;  %s153_s7 = int_to_ptr.vmem [resolvable:$true] %s152_s7 }
  0x97   :  { %s7251_s21 = scalar_lea.hbm %s10087_s18, 32 }
  0x98   :  { %p7252_p0 = scmp.ne.s32.totalorder %s10087_s18, %s7251_s21  ;;  %p7255_p1 = scmp.lt.u32.totalorder %s7251_s21, %s10087_s18 }
  0x9a   :  { %p7257_p2 = pnand %p7255_p1, %p7252_p0 }
  0x9c   :  { %7260 = shalt.err (!%p7257_p2)
}
  0x9d   :  { %s7261_s12 = scalar_lea.vmem %s127_s6, 32  ;;  %p7266_p4 = scmp.lt.s32.totalorder %s127_s6, %s127_s6 }
  0x9e   :  { %p7262_p3 = scmp.ne.s32.totalorder %s127_s6, %s7261_s12  ;;  %p7267_p5 = scmp.lt.s32.totalorder %s7261_s12, %s7261_s12 }
  0xa0   :  { %p7268_p6 = por %p7267_p5, %p7266_p4 }
  0xa2   :  { %p7269_p7 = pnand %p7268_p6, %p7262_p3 }
  0xa4   :  { %7272 = shalt.err (!%p7269_p7)
}
  0xa5   :  { %129 = dma.hbm_to_vmem [thread:$0]  %s10087_s18, 32, %s127_s6, [#allocation15]  }
  0xa6   :  { %s7273_s29 = scalar_lea.hbm %s10092_s23, 16 }
  0xa7   :  { %p7274_p8 = scmp.ne.s32.totalorder %s10092_s23, %s7273_s29  ;;  %p7277_p9 = scmp.lt.u32.totalorder %s7273_s29, %s10092_s23 }
  0xa9   :  { %p7279_p10 = pnand %p7277_p9, %p7274_p8 }
  0xab   :  { %7282 = shalt.err (!%p7279_p10)
}
  0xac   :  { %s7283_s30 = scalar_lea.vmem %s153_s7, 16  ;;  %s7287_s2 = scalar_lea.vmem %s153_s7, 32 }
  0xad   :  { %p7284_p11 = scmp.ne.s32.totalorder %s153_s7, %s7283_s30  ;;  %p7288_p12 = scmp.lt.s32.totalorder %s153_s7, %s153_s7 }
  0xae   :  { %p7289_p13 = scmp.lt.s32.totalorder %s7287_s2, %s7283_s30 }
  0xb0   :  { %p7290_p0 = por %p7289_p13, %p7288_p12 }
  0xb2   :  { %p7291_p1 = pnand %p7290_p0, %p7284_p11 }
  0xb4   :  { %7294 = shalt.err (!%p7291_p1)
}
  0xb5   :  { %155 = dma.hbm_to_vmem [thread:$0]  %s10092_s23, 16, %s153_s7, [#allocation18]  }
  0xb6   :  { %s7368_s21 = smov [#allocation20]   ;;  %s7295_s9 = scalar_lea.hbm %s10094_s25, 16 }
  0xb7   :  { %s164_s1 = sshll.u32 %s7368_s21, 4  ;;  %p7296_p2 = scmp.ne.s32.totalorder %s10094_s25, %s7295_s9  ;;  %s165_s1 = int_to_ptr.vmem [resolvable:$true] %s164_s1 }
  0xb8   :  { %p7299_p3 = scmp.lt.u32.totalorder %s7295_s9, %s10094_s25 }
  0xba   :  { %p7301_p4 = pnand %p7299_p3, %p7296_p2 }
  0xbc   :  { %7304 = shalt.err (!%p7301_p4)
}
  0xbd   :  { %s7305_s28 = scalar_lea.vmem %s165_s1, 16  ;;  %s7309_s23 = scalar_lea.vmem %s165_s1, 32 }
  0xbe   :  { %p7306_p5 = scmp.ne.s32.totalorder %s165_s1, %s7305_s28  ;;  %p7310_p6 = scmp.lt.s32.totalorder %s165_s1, %s165_s1 }
  0xbf   :  { %p7311_p7 = scmp.lt.s32.totalorder %s7309_s23, %s7305_s28 }
  0xc1   :  { %p7312_p8 = por %p7311_p7, %p7310_p6 }
  0xc3   :  { %p7313_p9 = pnand %p7312_p8, %p7306_p5 }
  0xc5   :  { %7316 = shalt.err (!%p7313_p9)
}
  0xc6   :  { %167 = dma.hbm_to_vmem [thread:$0]  %s10094_s25, 16, %s165_s1, [#allocation21]  }
  0xc7   :  { %7339 = dma.done.wait [#allocation6], 12288  }
  0xc8   :  { %7340 = vsyncadd [#allocation6], 4294955008 }
  0xc9   :  { %7341 = dma.done.wait [#allocation9], 64  }
  0xca   :  { %7342 = vsyncadd [#allocation9], 4294967232 }
  0xcb   :  { %7343 = dma.done.wait [#allocation12], 64  }
  0xcc   :  { %7344 = vsyncadd [#allocation12], 4294967232 }
  0xcd   :  { %7345 = dma.done.wait [#allocation15], 64  }
  0xce   :  { %7346 = vsyncadd [#allocation15], 4294967232 }
  0xcf   :  { %7347 = dma.done.wait [#allocation18], 32  }
  0xd0   :  { %7348 = vsyncadd [#allocation18], 4294967264 }
  0xd1   :  { %7349 = dma.done.wait [#allocation21], 16  }
  0xd2   :  { %7350 = vsyncadd [#allocation21], 4294967280  ;;  %s10121_s5 = sld [smem:[#allocation42_spill]] }
  0xd8   :  { %v216_v0 = vld [vmem:[%s10121_s5] sm:$0xf]  ;;  %v218_v1 = vld [vmem:[%s10121_s5 + $0x8] sm:$0xf]  ;;  %v220_v2 = vld [vmem:[%s10121_s5 + $0x4] sm:$0xf] }
  0xd9   :  { %217 = vst [vmem:[#allocation2] sm:$0xf] %v216_v0  ;;  %219 = vst [vmem:[#allocation2 + $0x4] sm:$0xf] %v218_v1  ;;  %v222_v3 = vld [vmem:[%s10121_s5 + $0xc] sm:$0xff]   ;;  %v230_v6 = vld [vmem:[%s10121_s5 + $0x1c] sm:$0xff]  }
  0xda   :  { %221 = vst [vmem:[#allocation2 + $0x8] sm:$0xf] %v220_v2  ;;  %v226_v4 = vld [vmem:[%s10121_s5 + $0x18] sm:$0xf]  ;;  %v228_v5 = vld [vmem:[%s10121_s5 + $0x14] sm:$0xf] }
  0xdb   :  { %223 = vst [vmem:[#allocation2 + $0xc] sm:$0xff] %v222_v3   ;;  %227 = vst [vmem:[#allocation2 + $0x14] sm:$0xf] %v226_v4  ;;  %v234_v7 = vld [vmem:[%s10121_s5 + $0x28] sm:$0xf]  ;;  %v238_v9 = vld [vmem:[%s10121_s5 + $0x2c] sm:$0xff]  }
  0xdc   :  { %229 = vst [vmem:[#allocation2 + $0x18] sm:$0xf] %v228_v5  ;;  %v236_v8 = vld [vmem:[%s10121_s5 + $0x24] sm:$0xf]  ;;  %231 = vst [vmem:[#allocation2 + $0x1c] sm:$0xff] %v230_v6   ;;  %v246_v12 = vld [vmem:[%s10121_s5 + $0x3c] sm:$0xff]  }
  0xdd   :  { %235 = vst [vmem:[#allocation2 + $0x24] sm:$0xf] %v234_v7  ;;  %237 = vst [vmem:[#allocation2 + $0x28] sm:$0xf] %v236_v8  ;;  %v242_v10 = vld [vmem:[%s10121_s5 + $0x38] sm:$0xf] }
  0xde   :  { %v244_v11 = vld [vmem:[%s10121_s5 + $0x34] sm:$0xf]  ;;  %239 = vst [vmem:[#allocation2 + $0x2c] sm:$0xff] %v238_v9   ;;  %243 = vst [vmem:[#allocation2 + $0x34] sm:$0xf] %v242_v10  ;;  %v254_v15 = vld [vmem:[%s10121_s5 + $0x4c] sm:$0xff]  }
  0xdf   :  { %245 = vst [vmem:[#allocation2 + $0x38] sm:$0xf] %v244_v11  ;;  %v250_v13 = vld [vmem:[%s10121_s5 + $0x48] sm:$0xf]  ;;  %v252_v14 = vld [vmem:[%s10121_s5 + $0x44] sm:$0xf] }
  0xe0   :  { %247 = vst [vmem:[#allocation2 + $0x3c] sm:$0xff] %v246_v12   ;;  %251 = vst [vmem:[#allocation2 + $0x44] sm:$0xf] %v250_v13  ;;  %v258_v16 = vld [vmem:[%s10121_s5 + $0x58] sm:$0xf]  ;;  %v262_v18 = vld [vmem:[%s10121_s5 + $0x5c] sm:$0xff]  }
  0xe1   :  { %253 = vst [vmem:[#allocation2 + $0x48] sm:$0xf] %v252_v14  ;;  %v260_v17 = vld [vmem:[%s10121_s5 + $0x54] sm:$0xf]  ;;  %255 = vst [vmem:[#allocation2 + $0x4c] sm:$0xff] %v254_v15   ;;  %v270_v21 = vld [vmem:[%s10121_s5 + $0x6c] sm:$0xff]  }
  0xe2   :  { %259 = vst [vmem:[#allocation2 + $0x54] sm:$0xf] %v258_v16  ;;  %261 = vst [vmem:[#allocation2 + $0x58] sm:$0xf] %v260_v17  ;;  %v266_v19 = vld [vmem:[%s10121_s5 + $0x68] sm:$0xf] }
  0xe3   :  { %v268_v20 = vld [vmem:[%s10121_s5 + $0x64] sm:$0xf]  ;;  %263 = vst [vmem:[#allocation2 + $0x5c] sm:$0xff] %v262_v18   ;;  %267 = vst [vmem:[#allocation2 + $0x64] sm:$0xf] %v266_v19  ;;  %v278_v24 = vld [vmem:[%s10121_s5 + $0x7c] sm:$0xff]  }
  0xe4   :  { %269 = vst [vmem:[#allocation2 + $0x68] sm:$0xf] %v268_v20  ;;  %v274_v22 = vld [vmem:[%s10121_s5 + $0x78] sm:$0xf]  ;;  %v276_v23 = vld [vmem:[%s10121_s5 + $0x74] sm:$0xf] }
  0xe5   :  { %271 = vst [vmem:[#allocation2 + $0x6c] sm:$0xff] %v270_v21   ;;  %275 = vst [vmem:[#allocation2 + $0x74] sm:$0xf] %v274_v22  ;;  %v282_v25 = vld [vmem:[%s10121_s5 + $0x88] sm:$0xf]  ;;  %v286_v27 = vld [vmem:[%s10121_s5 + $0x8c] sm:$0xff]  }
  0xe6   :  { %277 = vst [vmem:[#allocation2 + $0x78] sm:$0xf] %v276_v23  ;;  %v284_v26 = vld [vmem:[%s10121_s5 + $0x84] sm:$0xf]  ;;  %279 = vst [vmem:[#allocation2 + $0x7c] sm:$0xff] %v278_v24   ;;  %v294_v30 = vld [vmem:[%s10121_s5 + $0x9c] sm:$0xff]  }
  0xe7   :  { %283 = vst [vmem:[#allocation2 + $0x84] sm:$0xf] %v282_v25  ;;  %285 = vst [vmem:[#allocation2 + $0x88] sm:$0xf] %v284_v26  ;;  %v290_v28 = vld [vmem:[%s10121_s5 + $0x98] sm:$0xf] }
  0xe8   :  { %v292_v29 = vld [vmem:[%s10121_s5 + $0x94] sm:$0xf]  ;;  %287 = vst [vmem:[#allocation2 + $0x8c] sm:$0xff] %v286_v27   ;;  %291 = vst [vmem:[#allocation2 + $0x94] sm:$0xf] %v290_v28  ;;  %v302_v33 = vld [vmem:[%s10121_s5 + $0xac] sm:$0xff]  }
  0xe9   :  { %293 = vst [vmem:[#allocation2 + $0x98] sm:$0xf] %v292_v29  ;;  %v298_v31 = vld [vmem:[%s10121_s5 + $0xa8] sm:$0xf]  ;;  %v300_v32 = vld [vmem:[%s10121_s5 + $0xa4] sm:$0xf] }
  0xea   :  { %295 = vst [vmem:[#allocation2 + $0x9c] sm:$0xff] %v294_v30   ;;  %299 = vst [vmem:[#allocation2 + $0xa4] sm:$0xf] %v298_v31  ;;  %v306_v34 = vld [vmem:[%s10121_s5 + $0xb8] sm:$0xf]  ;;  %v310_v36 = vld [vmem:[%s10121_s5 + $0xbc] sm:$0xff]  }
  0xeb   :  { %301 = vst [vmem:[#allocation2 + $0xa8] sm:$0xf] %v300_v32  ;;  %v308_v35 = vld [vmem:[%s10121_s5 + $0xb4] sm:$0xf]  ;;  %303 = vst [vmem:[#allocation2 + $0xac] sm:$0xff] %v302_v33   ;;  %v318_v39 = vld [vmem:[%s10121_s5 + $0xcc] sm:$0xff]  }
  0xec   :  { %307 = vst [vmem:[#allocation2 + $0xb4] sm:$0xf] %v306_v34  ;;  %309 = vst [vmem:[#allocation2 + $0xb8] sm:$0xf] %v308_v35  ;;  %v314_v37 = vld [vmem:[%s10121_s5 + $0xc8] sm:$0xf] }
  0xed   :  { %v316_v38 = vld [vmem:[%s10121_s5 + $0xc4] sm:$0xf]  ;;  %311 = vst [vmem:[#allocation2 + $0xbc] sm:$0xff] %v310_v36   ;;  %315 = vst [vmem:[#allocation2 + $0xc4] sm:$0xf] %v314_v37  ;;  %v326_v42 = vld [vmem:[%s10121_s5 + $0xdc] sm:$0xff]  }
  0xee   :  { %317 = vst [vmem:[#allocation2 + $0xc8] sm:$0xf] %v316_v38  ;;  %v322_v40 = vld [vmem:[%s10121_s5 + $0xd8] sm:$0xf]  ;;  %v324_v41 = vld [vmem:[%s10121_s5 + $0xd4] sm:$0xf] }
  0xef   :  { %319 = vst [vmem:[#allocation2 + $0xcc] sm:$0xff] %v318_v39   ;;  %323 = vst [vmem:[#allocation2 + $0xd4] sm:$0xf] %v322_v40  ;;  %v330_v43 = vld [vmem:[%s10121_s5 + $0xe8] sm:$0xf]  ;;  %v334_v45 = vld [vmem:[%s10121_s5 + $0xec] sm:$0xff]  }
  0xf0   :  { %325 = vst [vmem:[#allocation2 + $0xd8] sm:$0xf] %v324_v41  ;;  %v332_v44 = vld [vmem:[%s10121_s5 + $0xe4] sm:$0xf]  ;;  %327 = vst [vmem:[#allocation2 + $0xdc] sm:$0xff] %v326_v42   ;;  %v342_v48 = vld [vmem:[%s10121_s5 + $0xfc] sm:$0xff]  }
  0xf1   :  { %331 = vst [vmem:[#allocation2 + $0xe4] sm:$0xf] %v330_v43  ;;  %333 = vst [vmem:[#allocation2 + $0xe8] sm:$0xf] %v332_v44  ;;  %v338_v46 = vld [vmem:[%s10121_s5 + $0xf8] sm:$0xf] }
  0xf2   :  { %v340_v47 = vld [vmem:[%s10121_s5 + $0xf4] sm:$0xf]  ;;  %335 = vst [vmem:[#allocation2 + $0xec] sm:$0xff] %v334_v45   ;;  %339 = vst [vmem:[#allocation2 + $0xf4] sm:$0xf] %v338_v46  ;;  %v350_v51 = vld [vmem:[%s10121_s5 + $0x10c] sm:$0xff]  }
  0xf3   :  { %341 = vst [vmem:[#allocation2 + $0xf8] sm:$0xf] %v340_v47  ;;  %v346_v49 = vld [vmem:[%s10121_s5 + $0x108] sm:$0xf]  ;;  %v348_v50 = vld [vmem:[%s10121_s5 + $0x104] sm:$0xf] }
  0xf4   :  { %343 = vst [vmem:[#allocation2 + $0xfc] sm:$0xff] %v342_v48   ;;  %347 = vst [vmem:[#allocation2 + $0x104] sm:$0xf] %v346_v49  ;;  %v354_v52 = vld [vmem:[%s10121_s5 + $0x118] sm:$0xf]  ;;  %v358_v54 = vld [vmem:[%s10121_s5 + $0x11c] sm:$0xff]  }
  0xf5   :  { %349 = vst [vmem:[#allocation2 + $0x108] sm:$0xf] %v348_v50  ;;  %v356_v53 = vld [vmem:[%s10121_s5 + $0x114] sm:$0xf]  ;;  %351 = vst [vmem:[#allocation2 + $0x10c] sm:$0xff] %v350_v51   ;;  %v366_v57 = vld [vmem:[%s10121_s5 + $0x12c] sm:$0xff]  }
  0xf6   :  { %355 = vst [vmem:[#allocation2 + $0x114] sm:$0xf] %v354_v52  ;;  %357 = vst [vmem:[#allocation2 + $0x118] sm:$0xf] %v356_v53  ;;  %v362_v55 = vld [vmem:[%s10121_s5 + $0x128] sm:$0xf] }
  0xf7   :  { %v364_v56 = vld [vmem:[%s10121_s5 + $0x124] sm:$0xf]  ;;  %359 = vst [vmem:[#allocation2 + $0x11c] sm:$0xff] %v358_v54   ;;  %363 = vst [vmem:[#allocation2 + $0x124] sm:$0xf] %v362_v55  ;;  %v374_v60 = vld [vmem:[%s10121_s5 + $0x13c] sm:$0xff]  }
  0xf8   :  { %365 = vst [vmem:[#allocation2 + $0x128] sm:$0xf] %v364_v56  ;;  %v370_v58 = vld [vmem:[%s10121_s5 + $0x138] sm:$0xf]  ;;  %v372_v59 = vld [vmem:[%s10121_s5 + $0x134] sm:$0xf] }
  0xf9   :  { %367 = vst [vmem:[#allocation2 + $0x12c] sm:$0xff] %v366_v57   ;;  %371 = vst [vmem:[#allocation2 + $0x134] sm:$0xf] %v370_v58  ;;  %v378_v61 = vld [vmem:[%s10121_s5 + $0x148] sm:$0xf]  ;;  %v382_v63 = vld [vmem:[%s10121_s5 + $0x14c] sm:$0xff]  }
  0xfa   :  { %373 = vst [vmem:[#allocation2 + $0x138] sm:$0xf] %v372_v59  ;;  %v380_v62 = vld [vmem:[%s10121_s5 + $0x144] sm:$0xf]  ;;  %375 = vst [vmem:[#allocation2 + $0x13c] sm:$0xff] %v374_v60   ;;  %v390_v2 = vld [vmem:[%s10121_s5 + $0x15c] sm:$0xff]  }
  0xfb   :  { %379 = vst [vmem:[#allocation2 + $0x144] sm:$0xf] %v378_v61  ;;  %381 = vst [vmem:[#allocation2 + $0x148] sm:$0xf] %v380_v62  ;;  %v386_v0 = vld [vmem:[%s10121_s5 + $0x158] sm:$0xf] }
  0xfc   :  { %v388_v1 = vld [vmem:[%s10121_s5 + $0x154] sm:$0xf]  ;;  %383 = vst [vmem:[#allocation2 + $0x14c] sm:$0xff] %v382_v63   ;;  %387 = vst [vmem:[#allocation2 + $0x154] sm:$0xf] %v386_v0  ;;  %v398_v5 = vld [vmem:[%s10121_s5 + $0x16c] sm:$0xff]  }
  0xfd   :  { %389 = vst [vmem:[#allocation2 + $0x158] sm:$0xf] %v388_v1  ;;  %v394_v3 = vld [vmem:[%s10121_s5 + $0x168] sm:$0xf]  ;;  %v396_v4 = vld [vmem:[%s10121_s5 + $0x164] sm:$0xf] }
  0xfe   :  { %391 = vst [vmem:[#allocation2 + $0x15c] sm:$0xff] %v390_v2   ;;  %395 = vst [vmem:[#allocation2 + $0x164] sm:$0xf] %v394_v3  ;;  %v402_v6 = vld [vmem:[%s10121_s5 + $0x178] sm:$0xf]  ;;  %v406_v8 = vld [vmem:[%s10121_s5 + $0x17c] sm:$0xff]  }
  0xff   :  { %397 = vst [vmem:[#allocation2 + $0x168] sm:$0xf] %v396_v4  ;;  %v404_v7 = vld [vmem:[%s10121_s5 + $0x174] sm:$0xf]  ;;  %399 = vst [vmem:[#allocation2 + $0x16c] sm:$0xff] %v398_v5   ;;  %v414_v11 = vld [vmem:[%s10121_s5 + $0x18c] sm:$0xff]  }
 0x100   :  { %403 = vst [vmem:[#allocation2 + $0x174] sm:$0xf] %v402_v6  ;;  %405 = vst [vmem:[#allocation2 + $0x178] sm:$0xf] %v404_v7  ;;  %v410_v9 = vld [vmem:[%s10121_s5 + $0x188] sm:$0xf] }
 0x101   :  { %v412_v10 = vld [vmem:[%s10121_s5 + $0x184] sm:$0xf]  ;;  %407 = vst [vmem:[#allocation2 + $0x17c] sm:$0xff] %v406_v8   ;;  %411 = vst [vmem:[#allocation2 + $0x184] sm:$0xf] %v410_v9  ;;  %v422_v14 = vld [vmem:[%s10121_s5 + $0x19c] sm:$0xff]  }
 0x102   :  { %413 = vst [vmem:[#allocation2 + $0x188] sm:$0xf] %v412_v10  ;;  %v418_v12 = vld [vmem:[%s10121_s5 + $0x198] sm:$0xf]  ;;  %v420_v13 = vld [vmem:[%s10121_s5 + $0x194] sm:$0xf] }
 0x103   :  { %415 = vst [vmem:[#allocation2 + $0x18c] sm:$0xff] %v414_v11   ;;  %419 = vst [vmem:[#allocation2 + $0x194] sm:$0xf] %v418_v12  ;;  %v426_v15 = vld [vmem:[%s10121_s5 + $0x1a8] sm:$0xf]  ;;  %v430_v17 = vld [vmem:[%s10121_s5 + $0x1ac] sm:$0xff]  }
 0x104   :  { %421 = vst [vmem:[#allocation2 + $0x198] sm:$0xf] %v420_v13  ;;  %v428_v16 = vld [vmem:[%s10121_s5 + $0x1a4] sm:$0xf]  ;;  %423 = vst [vmem:[#allocation2 + $0x19c] sm:$0xff] %v422_v14   ;;  %v438_v20 = vld [vmem:[%s10121_s5 + $0x1bc] sm:$0xff]  }
 0x105   :  { %427 = vst [vmem:[#allocation2 + $0x1a4] sm:$0xf] %v426_v15  ;;  %429 = vst [vmem:[#allocation2 + $0x1a8] sm:$0xf] %v428_v16  ;;  %v434_v18 = vld [vmem:[%s10121_s5 + $0x1b8] sm:$0xf] }
 0x106   :  { %v436_v19 = vld [vmem:[%s10121_s5 + $0x1b4] sm:$0xf]  ;;  %431 = vst [vmem:[#allocation2 + $0x1ac] sm:$0xff] %v430_v17   ;;  %435 = vst [vmem:[#allocation2 + $0x1b4] sm:$0xf] %v434_v18  ;;  %v446_v23 = vld [vmem:[%s10121_s5 + $0x1cc] sm:$0xff]  }
 0x107   :  { %437 = vst [vmem:[#allocation2 + $0x1b8] sm:$0xf] %v436_v19  ;;  %v442_v21 = vld [vmem:[%s10121_s5 + $0x1c8] sm:$0xf]  ;;  %v444_v22 = vld [vmem:[%s10121_s5 + $0x1c4] sm:$0xf] }
 0x108   :  { %439 = vst [vmem:[#allocation2 + $0x1bc] sm:$0xff] %v438_v20   ;;  %443 = vst [vmem:[#allocation2 + $0x1c4] sm:$0xf] %v442_v21  ;;  %v450_v24 = vld [vmem:[%s10121_s5 + $0x1d8] sm:$0xf]  ;;  %v454_v26 = vld [vmem:[%s10121_s5 + $0x1dc] sm:$0xff]  }
 0x109   :  { %445 = vst [vmem:[#allocation2 + $0x1c8] sm:$0xf] %v444_v22  ;;  %v452_v25 = vld [vmem:[%s10121_s5 + $0x1d4] sm:$0xf]  ;;  %447 = vst [vmem:[#allocation2 + $0x1cc] sm:$0xff] %v446_v23   ;;  %v462_v29 = vld [vmem:[%s10121_s5 + $0x1ec] sm:$0xff]  }
 0x10a   :  { %451 = vst [vmem:[#allocation2 + $0x1d4] sm:$0xf] %v450_v24  ;;  %453 = vst [vmem:[#allocation2 + $0x1d8] sm:$0xf] %v452_v25  ;;  %v458_v27 = vld [vmem:[%s10121_s5 + $0x1e8] sm:$0xf] }
 0x10b   :  { %v460_v28 = vld [vmem:[%s10121_s5 + $0x1e4] sm:$0xf]  ;;  %455 = vst [vmem:[#allocation2 + $0x1dc] sm:$0xff] %v454_v26   ;;  %459 = vst [vmem:[#allocation2 + $0x1e4] sm:$0xf] %v458_v27  ;;  %v470_v32 = vld [vmem:[%s10121_s5 + $0x1fc] sm:$0xff]  }
 0x10c   :  { %461 = vst [vmem:[#allocation2 + $0x1e8] sm:$0xf] %v460_v28  ;;  %v466_v30 = vld [vmem:[%s10121_s5 + $0x1f8] sm:$0xf]  ;;  %v468_v31 = vld [vmem:[%s10121_s5 + $0x1f4] sm:$0xf] }
 0x10d   :  { %463 = vst [vmem:[#allocation2 + $0x1ec] sm:$0xff] %v462_v29   ;;  %467 = vst [vmem:[#allocation2 + $0x1f4] sm:$0xf] %v466_v30  ;;  %v474_v33 = vld [vmem:[%s10121_s5 + $0x208] sm:$0xf]  ;;  %v478_v35 = vld [vmem:[%s10121_s5 + $0x20c] sm:$0xff]  }
 0x10e   :  { %469 = vst [vmem:[#allocation2 + $0x1f8] sm:$0xf] %v468_v31  ;;  %v476_v34 = vld [vmem:[%s10121_s5 + $0x204] sm:$0xf]  ;;  %471 = vst [vmem:[#allocation2 + $0x1fc] sm:$0xff] %v470_v32   ;;  %v486_v38 = vld [vmem:[%s10121_s5 + $0x21c] sm:$0xff]  }
 0x10f   :  { %475 = vst [vmem:[#allocation2 + $0x204] sm:$0xf] %v474_v33  ;;  %477 = vst [vmem:[#allocation2 + $0x208] sm:$0xf] %v476_v34  ;;  %v482_v36 = vld [vmem:[%s10121_s5 + $0x218] sm:$0xf] }
 0x110   :  { %v484_v37 = vld [vmem:[%s10121_s5 + $0x214] sm:$0xf]  ;;  %479 = vst [vmem:[#allocation2 + $0x20c] sm:$0xff] %v478_v35   ;;  %483 = vst [vmem:[#allocation2 + $0x214] sm:$0xf] %v482_v36  ;;  %v494_v41 = vld [vmem:[%s10121_s5 + $0x22c] sm:$0xff]  }
 0x111   :  { %485 = vst [vmem:[#allocation2 + $0x218] sm:$0xf] %v484_v37  ;;  %v490_v39 = vld [vmem:[%s10121_s5 + $0x228] sm:$0xf]  ;;  %v492_v40 = vld [vmem:[%s10121_s5 + $0x224] sm:$0xf] }
 0x112   :  { %487 = vst [vmem:[#allocation2 + $0x21c] sm:$0xff] %v486_v38   ;;  %491 = vst [vmem:[#allocation2 + $0x224] sm:$0xf] %v490_v39  ;;  %v498_v42 = vld [vmem:[%s10121_s5 + $0x238] sm:$0xf]  ;;  %v502_v44 = vld [vmem:[%s10121_s5 + $0x23c] sm:$0xff]  }
 0x113   :  { %493 = vst [vmem:[#allocation2 + $0x228] sm:$0xf] %v492_v40  ;;  %v500_v43 = vld [vmem:[%s10121_s5 + $0x234] sm:$0xf]  ;;  %495 = vst [vmem:[#allocation2 + $0x22c] sm:$0xff] %v494_v41   ;;  %v510_v47 = vld [vmem:[%s10121_s5 + $0x24c] sm:$0xff]  }
 0x114   :  { %499 = vst [vmem:[#allocation2 + $0x234] sm:$0xf] %v498_v42  ;;  %501 = vst [vmem:[#allocation2 + $0x238] sm:$0xf] %v500_v43  ;;  %v506_v45 = vld [vmem:[%s10121_s5 + $0x248] sm:$0xf] }
 0x115   :  { %v508_v46 = vld [vmem:[%s10121_s5 + $0x244] sm:$0xf]  ;;  %503 = vst [vmem:[#allocation2 + $0x23c] sm:$0xff] %v502_v44   ;;  %507 = vst [vmem:[#allocation2 + $0x244] sm:$0xf] %v506_v45  ;;  %v518_v50 = vld [vmem:[%s10121_s5 + $0x25c] sm:$0xff]  }
 0x116   :  { %509 = vst [vmem:[#allocation2 + $0x248] sm:$0xf] %v508_v46  ;;  %v514_v48 = vld [vmem:[%s10121_s5 + $0x258] sm:$0xf]  ;;  %v516_v49 = vld [vmem:[%s10121_s5 + $0x254] sm:$0xf] }
 0x117   :  { %511 = vst [vmem:[#allocation2 + $0x24c] sm:$0xff] %v510_v47   ;;  %515 = vst [vmem:[#allocation2 + $0x254] sm:$0xf] %v514_v48  ;;  %v522_v51 = vld [vmem:[%s10121_s5 + $0x268] sm:$0xf]  ;;  %v526_v53 = vld [vmem:[%s10121_s5 + $0x26c] sm:$0xff]  }
 0x118   :  { %517 = vst [vmem:[#allocation2 + $0x258] sm:$0xf] %v516_v49  ;;  %v524_v52 = vld [vmem:[%s10121_s5 + $0x264] sm:$0xf]  ;;  %519 = vst [vmem:[#allocation2 + $0x25c] sm:$0xff] %v518_v50   ;;  %v534_v56 = vld [vmem:[%s10121_s5 + $0x27c] sm:$0xff]  }
 0x119   :  { %523 = vst [vmem:[#allocation2 + $0x264] sm:$0xf] %v522_v51  ;;  %525 = vst [vmem:[#allocation2 + $0x268] sm:$0xf] %v524_v52  ;;  %v530_v54 = vld [vmem:[%s10121_s5 + $0x278] sm:$0xf] }
 0x11a   :  { %v532_v55 = vld [vmem:[%s10121_s5 + $0x274] sm:$0xf]  ;;  %527 = vst [vmem:[#allocation2 + $0x26c] sm:$0xff] %v526_v53   ;;  %531 = vst [vmem:[#allocation2 + $0x274] sm:$0xf] %v530_v54  ;;  %v542_v59 = vld [vmem:[%s10121_s5 + $0x28c] sm:$0xff]  }
 0x11b   :  { %533 = vst [vmem:[#allocation2 + $0x278] sm:$0xf] %v532_v55  ;;  %v538_v57 = vld [vmem:[%s10121_s5 + $0x288] sm:$0xf]  ;;  %v540_v58 = vld [vmem:[%s10121_s5 + $0x284] sm:$0xf] }
 0x11c   :  { %535 = vst [vmem:[#allocation2 + $0x27c] sm:$0xff] %v534_v56   ;;  %539 = vst [vmem:[#allocation2 + $0x284] sm:$0xf] %v538_v57  ;;  %v546_v60 = vld [vmem:[%s10121_s5 + $0x298] sm:$0xf]  ;;  %v550_v62 = vld [vmem:[%s10121_s5 + $0x29c] sm:$0xff]  }
 0x11d   :  { %541 = vst [vmem:[#allocation2 + $0x288] sm:$0xf] %v540_v58  ;;  %v548_v61 = vld [vmem:[%s10121_s5 + $0x294] sm:$0xf]  ;;  %543 = vst [vmem:[#allocation2 + $0x28c] sm:$0xff] %v542_v59   ;;  %v558_v1 = vld [vmem:[%s10121_s5 + $0x2ac] sm:$0xff]  }
 0x11e   :  { %547 = vst [vmem:[#allocation2 + $0x294] sm:$0xf] %v546_v60  ;;  %549 = vst [vmem:[#allocation2 + $0x298] sm:$0xf] %v548_v61  ;;  %v554_v63 = vld [vmem:[%s10121_s5 + $0x2a8] sm:$0xf] }
 0x11f   :  { %v556_v0 = vld [vmem:[%s10121_s5 + $0x2a4] sm:$0xf]  ;;  %551 = vst [vmem:[#allocation2 + $0x29c] sm:$0xff] %v550_v62   ;;  %555 = vst [vmem:[#allocation2 + $0x2a4] sm:$0xf] %v554_v63  ;;  %v566_v4 = vld [vmem:[%s10121_s5 + $0x2bc] sm:$0xff]  }
 0x120   :  { %557 = vst [vmem:[#allocation2 + $0x2a8] sm:$0xf] %v556_v0  ;;  %v562_v2 = vld [vmem:[%s10121_s5 + $0x2b8] sm:$0xf]  ;;  %v564_v3 = vld [vmem:[%s10121_s5 + $0x2b4] sm:$0xf] }
 0x121   :  { %559 = vst [vmem:[#allocation2 + $0x2ac] sm:$0xff] %v558_v1   ;;  %563 = vst [vmem:[#allocation2 + $0x2b4] sm:$0xf] %v562_v2  ;;  %v570_v5 = vld [vmem:[%s10121_s5 + $0x2c8] sm:$0xf]  ;;  %v574_v7 = vld [vmem:[%s10121_s5 + $0x2cc] sm:$0xff]  }
 0x122   :  { %565 = vst [vmem:[#allocation2 + $0x2b8] sm:$0xf] %v564_v3  ;;  %v572_v6 = vld [vmem:[%s10121_s5 + $0x2c4] sm:$0xf]  ;;  %567 = vst [vmem:[#allocation2 + $0x2bc] sm:$0xff] %v566_v4   ;;  %v582_v10 = vld [vmem:[%s10121_s5 + $0x2dc] sm:$0xff]  }
 0x123   :  { %571 = vst [vmem:[#allocation2 + $0x2c4] sm:$0xf] %v570_v5  ;;  %573 = vst [vmem:[#allocation2 + $0x2c8] sm:$0xf] %v572_v6  ;;  %v578_v8 = vld [vmem:[%s10121_s5 + $0x2d8] sm:$0xf] }
 0x124   :  { %v580_v9 = vld [vmem:[%s10121_s5 + $0x2d4] sm:$0xf]  ;;  %575 = vst [vmem:[#allocation2 + $0x2cc] sm:$0xff] %v574_v7   ;;  %579 = vst [vmem:[#allocation2 + $0x2d4] sm:$0xf] %v578_v8  ;;  %v590_v13 = vld [vmem:[%s10121_s5 + $0x2ec] sm:$0xff]  }
 0x125   :  { %581 = vst [vmem:[#allocation2 + $0x2d8] sm:$0xf] %v580_v9  ;;  %v586_v11 = vld [vmem:[%s10121_s5 + $0x2e8] sm:$0xf]  ;;  %v588_v12 = vld [vmem:[%s10121_s5 + $0x2e4] sm:$0xf] }
 0x126   :  { %583 = vst [vmem:[#allocation2 + $0x2dc] sm:$0xff] %v582_v10   ;;  %587 = vst [vmem:[#allocation2 + $0x2e4] sm:$0xf] %v586_v11  ;;  %v594_v14 = vld [vmem:[%s10121_s5 + $0x2f8] sm:$0xf]  ;;  %v598_v16 = vld [vmem:[%s10121_s5 + $0x2fc] sm:$0xff]  }
 0x127   :  { %589 = vst [vmem:[#allocation2 + $0x2e8] sm:$0xf] %v588_v12  ;;  %v596_v15 = vld [vmem:[%s10121_s5 + $0x2f4] sm:$0xf]  ;;  %591 = vst [vmem:[#allocation2 + $0x2ec] sm:$0xff] %v590_v13   ;;  %v606_v19 = vld [vmem:[%s10121_s5 + $0x30c] sm:$0xff]  }
 0x128   :  { %595 = vst [vmem:[#allocation2 + $0x2f4] sm:$0xf] %v594_v14  ;;  %597 = vst [vmem:[#allocation2 + $0x2f8] sm:$0xf] %v596_v15  ;;  %v602_v17 = vld [vmem:[%s10121_s5 + $0x308] sm:$0xf] }
 0x129   :  { %v604_v18 = vld [vmem:[%s10121_s5 + $0x304] sm:$0xf]  ;;  %599 = vst [vmem:[#allocation2 + $0x2fc] sm:$0xff] %v598_v16   ;;  %603 = vst [vmem:[#allocation2 + $0x304] sm:$0xf] %v602_v17  ;;  %v614_v22 = vld [vmem:[%s10121_s5 + $0x31c] sm:$0xff]  }
 0x12a   :  { %605 = vst [vmem:[#allocation2 + $0x308] sm:$0xf] %v604_v18  ;;  %v610_v20 = vld [vmem:[%s10121_s5 + $0x318] sm:$0xf]  ;;  %v612_v21 = vld [vmem:[%s10121_s5 + $0x314] sm:$0xf] }
 0x12b   :  { %607 = vst [vmem:[#allocation2 + $0x30c] sm:$0xff] %v606_v19   ;;  %611 = vst [vmem:[#allocation2 + $0x314] sm:$0xf] %v610_v20  ;;  %v618_v23 = vld [vmem:[%s10121_s5 + $0x328] sm:$0xf]  ;;  %v622_v25 = vld [vmem:[%s10121_s5 + $0x32c] sm:$0xff]  }
 0x12c   :  { %613 = vst [vmem:[#allocation2 + $0x318] sm:$0xf] %v612_v21  ;;  %v620_v24 = vld [vmem:[%s10121_s5 + $0x324] sm:$0xf]  ;;  %615 = vst [vmem:[#allocation2 + $0x31c] sm:$0xff] %v614_v22   ;;  %v630_v28 = vld [vmem:[%s10121_s5 + $0x33c] sm:$0xff]  }
 0x12d   :  { %619 = vst [vmem:[#allocation2 + $0x324] sm:$0xf] %v618_v23  ;;  %621 = vst [vmem:[#allocation2 + $0x328] sm:$0xf] %v620_v24  ;;  %v626_v26 = vld [vmem:[%s10121_s5 + $0x338] sm:$0xf] }
 0x12e   :  { %v628_v27 = vld [vmem:[%s10121_s5 + $0x334] sm:$0xf]  ;;  %623 = vst [vmem:[#allocation2 + $0x32c] sm:$0xff] %v622_v25   ;;  %627 = vst [vmem:[#allocation2 + $0x334] sm:$0xf] %v626_v26  ;;  %v638_v31 = vld [vmem:[%s10121_s5 + $0x34c] sm:$0xff]  }
 0x12f   :  { %629 = vst [vmem:[#allocation2 + $0x338] sm:$0xf] %v628_v27  ;;  %v634_v29 = vld [vmem:[%s10121_s5 + $0x348] sm:$0xf]  ;;  %v636_v30 = vld [vmem:[%s10121_s5 + $0x344] sm:$0xf] }
 0x130   :  { %631 = vst [vmem:[#allocation2 + $0x33c] sm:$0xff] %v630_v28   ;;  %635 = vst [vmem:[#allocation2 + $0x344] sm:$0xf] %v634_v29  ;;  %v642_v32 = vld [vmem:[%s10121_s5 + $0x358] sm:$0xf]  ;;  %v646_v34 = vld [vmem:[%s10121_s5 + $0x35c] sm:$0xff]  }
 0x131   :  { %637 = vst [vmem:[#allocation2 + $0x348] sm:$0xf] %v636_v30  ;;  %v644_v33 = vld [vmem:[%s10121_s5 + $0x354] sm:$0xf]  ;;  %639 = vst [vmem:[#allocation2 + $0x34c] sm:$0xff] %v638_v31   ;;  %v654_v37 = vld [vmem:[%s10121_s5 + $0x36c] sm:$0xff]  }
 0x132   :  { %643 = vst [vmem:[#allocation2 + $0x354] sm:$0xf] %v642_v32  ;;  %645 = vst [vmem:[#allocation2 + $0x358] sm:$0xf] %v644_v33  ;;  %v650_v35 = vld [vmem:[%s10121_s5 + $0x368] sm:$0xf] }
 0x133   :  { %v652_v36 = vld [vmem:[%s10121_s5 + $0x364] sm:$0xf]  ;;  %647 = vst [vmem:[#allocation2 + $0x35c] sm:$0xff] %v646_v34   ;;  %651 = vst [vmem:[#allocation2 + $0x364] sm:$0xf] %v650_v35  ;;  %v662_v40 = vld [vmem:[%s10121_s5 + $0x37c] sm:$0xff]  }
 0x134   :  { %653 = vst [vmem:[#allocation2 + $0x368] sm:$0xf] %v652_v36  ;;  %v658_v38 = vld [vmem:[%s10121_s5 + $0x378] sm:$0xf]  ;;  %v660_v39 = vld [vmem:[%s10121_s5 + $0x374] sm:$0xf] }
 0x135   :  { %655 = vst [vmem:[#allocation2 + $0x36c] sm:$0xff] %v654_v37   ;;  %659 = vst [vmem:[#allocation2 + $0x374] sm:$0xf] %v658_v38  ;;  %v666_v41 = vld [vmem:[%s10121_s5 + $0x388] sm:$0xf]  ;;  %v670_v43 = vld [vmem:[%s10121_s5 + $0x38c] sm:$0xff]  }
 0x136   :  { %661 = vst [vmem:[#allocation2 + $0x378] sm:$0xf] %v660_v39  ;;  %v668_v42 = vld [vmem:[%s10121_s5 + $0x384] sm:$0xf]  ;;  %663 = vst [vmem:[#allocation2 + $0x37c] sm:$0xff] %v662_v40   ;;  %v678_v46 = vld [vmem:[%s10121_s5 + $0x39c] sm:$0xff]  }
 0x137   :  { %667 = vst [vmem:[#allocation2 + $0x384] sm:$0xf] %v666_v41  ;;  %669 = vst [vmem:[#allocation2 + $0x388] sm:$0xf] %v668_v42  ;;  %v674_v44 = vld [vmem:[%s10121_s5 + $0x398] sm:$0xf] }
 0x138   :  { %v676_v45 = vld [vmem:[%s10121_s5 + $0x394] sm:$0xf]  ;;  %671 = vst [vmem:[#allocation2 + $0x38c] sm:$0xff] %v670_v43   ;;  %675 = vst [vmem:[#allocation2 + $0x394] sm:$0xf] %v674_v44  ;;  %v686_v49 = vld [vmem:[%s10121_s5 + $0x3ac] sm:$0xff]  }
 0x139   :  { %677 = vst [vmem:[#allocation2 + $0x398] sm:$0xf] %v676_v45  ;;  %v682_v47 = vld [vmem:[%s10121_s5 + $0x3a8] sm:$0xf]  ;;  %v684_v48 = vld [vmem:[%s10121_s5 + $0x3a4] sm:$0xf] }
 0x13a   :  { %679 = vst [vmem:[#allocation2 + $0x39c] sm:$0xff] %v678_v46   ;;  %683 = vst [vmem:[#allocation2 + $0x3a4] sm:$0xf] %v682_v47  ;;  %v690_v50 = vld [vmem:[%s10121_s5 + $0x3b8] sm:$0xf]  ;;  %v694_v52 = vld [vmem:[%s10121_s5 + $0x3bc] sm:$0xff]  }
 0x13b   :  { %685 = vst [vmem:[#allocation2 + $0x3a8] sm:$0xf] %v684_v48  ;;  %v692_v51 = vld [vmem:[%s10121_s5 + $0x3b4] sm:$0xf]  ;;  %687 = vst [vmem:[#allocation2 + $0x3ac] sm:$0xff] %v686_v49   ;;  %v702_v55 = vld [vmem:[%s10121_s5 + $0x3cc] sm:$0xff]  }
 0x13c   :  { %691 = vst [vmem:[#allocation2 + $0x3b4] sm:$0xf] %v690_v50  ;;  %693 = vst [vmem:[#allocation2 + $0x3b8] sm:$0xf] %v692_v51  ;;  %v698_v53 = vld [vmem:[%s10121_s5 + $0x3c8] sm:$0xf] }
 0x13d   :  { %v700_v54 = vld [vmem:[%s10121_s5 + $0x3c4] sm:$0xf]  ;;  %695 = vst [vmem:[#allocation2 + $0x3bc] sm:$0xff] %v694_v52   ;;  %699 = vst [vmem:[#allocation2 + $0x3c4] sm:$0xf] %v698_v53  ;;  %v710_v58 = vld [vmem:[%s10121_s5 + $0x3dc] sm:$0xff]  }
 0x13e   :  { %701 = vst [vmem:[#allocation2 + $0x3c8] sm:$0xf] %v700_v54  ;;  %v706_v56 = vld [vmem:[%s10121_s5 + $0x3d8] sm:$0xf]  ;;  %v708_v57 = vld [vmem:[%s10121_s5 + $0x3d4] sm:$0xf] }
 0x13f   :  { %703 = vst [vmem:[#allocation2 + $0x3cc] sm:$0xff] %v702_v55   ;;  %707 = vst [vmem:[#allocation2 + $0x3d4] sm:$0xf] %v706_v56  ;;  %v714_v59 = vld [vmem:[%s10121_s5 + $0x3e8] sm:$0xf]  ;;  %v718_v61 = vld [vmem:[%s10121_s5 + $0x3ec] sm:$0xff]  }
 0x140   :  { %709 = vst [vmem:[#allocation2 + $0x3d8] sm:$0xf] %v708_v57  ;;  %v716_v60 = vld [vmem:[%s10121_s5 + $0x3e4] sm:$0xf]  ;;  %711 = vst [vmem:[#allocation2 + $0x3dc] sm:$0xff] %v710_v58  }
 0x141   :  { %715 = vst [vmem:[#allocation2 + $0x3e4] sm:$0xf] %v714_v59  ;;  %717 = vst [vmem:[#allocation2 + $0x3e8] sm:$0xf] %v716_v60  ;;  %v722_v62 = vld [vmem:[%s10121_s5 + $0x3f8] sm:$0xf] }
 0x142   :  { %v724_v63 = vld [vmem:[%s10121_s5 + $0x3f4] sm:$0xf]  ;;  %719 = vst [vmem:[#allocation2 + $0x3ec] sm:$0xff] %v718_v61   ;;  %723 = vst [vmem:[#allocation2 + $0x3f4] sm:$0xf] %v722_v62 }
 0x143   :  { %725 = vst [vmem:[#allocation2 + $0x3f8] sm:$0xf] %v724_v63  ;;  %v726_v0 = vld [vmem:[%s10121_s5 + $0x3fc] sm:$0xf] }
 0x144   :  { %727 = vst [vmem:[#allocation2 + $0x3fc] sm:$0xf] %v726_v0 }
 0x145   :  { %1270 = vsyncadd [#allocation4], 16384  ;;  %v1289_v1 = vld [vmem:[%s10083_s14] sm:$0xf]  ;;  %v1291_v2 = vld [vmem:[%s10083_s14 + $0x8] sm:$0xf] }
 0x146   :  { %1290 = vst [vmem:[#allocation3] sm:$0xf] %v1289_v1  ;;  %1292 = vst [vmem:[#allocation3 + $0x4] sm:$0xf] %v1291_v2  ;;  %v1293_v3 = vld [vmem:[%s10083_s14 + $0x4] sm:$0xf] }
 0x147   :  { %v1295_v4 = vld [vmem:[%s10083_s14 + $0xc] sm:$0xff]   ;;  %v1299_v5 = vld [vmem:[%s10083_s14 + $0x18] sm:$0xf]  ;;  %1294 = vst [vmem:[#allocation3 + $0x8] sm:$0xf] %v1293_v3  ;;  %v1303_v7 = vld [vmem:[%s10083_s14 + $0x1c] sm:$0xff]  }
 0x148   :  { %1296 = vst [vmem:[#allocation3 + $0xc] sm:$0xff] %v1295_v4   ;;  %1300 = vst [vmem:[#allocation3 + $0x14] sm:$0xf] %v1299_v5  ;;  %v1301_v6 = vld [vmem:[%s10083_s14 + $0x14] sm:$0xf]  ;;  %v1311_v10 = vld [vmem:[%s10083_s14 + $0x2c] sm:$0xff]  }
 0x149   :  { %v1307_v8 = vld [vmem:[%s10083_s14 + $0x28] sm:$0xf]  ;;  %1302 = vst [vmem:[#allocation3 + $0x18] sm:$0xf] %v1301_v6  ;;  %1304 = vst [vmem:[#allocation3 + $0x1c] sm:$0xff] %v1303_v7   ;;  %v1319_v13 = vld [vmem:[%s10083_s14 + $0x3c] sm:$0xff]  }
 0x14a   :  { %1308 = vst [vmem:[#allocation3 + $0x24] sm:$0xf] %v1307_v8  ;;  %v1309_v9 = vld [vmem:[%s10083_s14 + $0x24] sm:$0xf]  ;;  %v1315_v11 = vld [vmem:[%s10083_s14 + $0x38] sm:$0xf] }
 0x14b   :  { %1310 = vst [vmem:[#allocation3 + $0x28] sm:$0xf] %v1309_v9  ;;  %1312 = vst [vmem:[#allocation3 + $0x2c] sm:$0xff] %v1311_v10   ;;  %v1317_v12 = vld [vmem:[%s10083_s14 + $0x34] sm:$0xf]  ;;  %v1327_v16 = vld [vmem:[%s10083_s14 + $0x4c] sm:$0xff]  }
 0x14c   :  { %1316 = vst [vmem:[#allocation3 + $0x34] sm:$0xf] %v1315_v11  ;;  %v1323_v14 = vld [vmem:[%s10083_s14 + $0x48] sm:$0xf]  ;;  %1318 = vst [vmem:[#allocation3 + $0x38] sm:$0xf] %v1317_v12 }
 0x14d   :  { %1320 = vst [vmem:[#allocation3 + $0x3c] sm:$0xff] %v1319_v13   ;;  %1324 = vst [vmem:[#allocation3 + $0x44] sm:$0xf] %v1323_v14  ;;  %v1325_v15 = vld [vmem:[%s10083_s14 + $0x44] sm:$0xf]  ;;  %v1335_v19 = vld [vmem:[%s10083_s14 + $0x5c] sm:$0xff]  }
 0x14e   :  { %v1331_v17 = vld [vmem:[%s10083_s14 + $0x58] sm:$0xf]  ;;  %1326 = vst [vmem:[#allocation3 + $0x48] sm:$0xf] %v1325_v15  ;;  %1328 = vst [vmem:[#allocation3 + $0x4c] sm:$0xff] %v1327_v16   ;;  %v1343_v22 = vld [vmem:[%s10083_s14 + $0x6c] sm:$0xff]  }
 0x14f   :  { %1332 = vst [vmem:[#allocation3 + $0x54] sm:$0xf] %v1331_v17  ;;  %v1333_v18 = vld [vmem:[%s10083_s14 + $0x54] sm:$0xf]  ;;  %v1339_v20 = vld [vmem:[%s10083_s14 + $0x68] sm:$0xf] }
 0x150   :  { %1334 = vst [vmem:[#allocation3 + $0x58] sm:$0xf] %v1333_v18  ;;  %1336 = vst [vmem:[#allocation3 + $0x5c] sm:$0xff] %v1335_v19   ;;  %v1341_v21 = vld [vmem:[%s10083_s14 + $0x64] sm:$0xf]  ;;  %v1351_v25 = vld [vmem:[%s10083_s14 + $0x7c] sm:$0xff]  }
 0x151   :  { %1340 = vst [vmem:[#allocation3 + $0x64] sm:$0xf] %v1339_v20  ;;  %v1347_v23 = vld [vmem:[%s10083_s14 + $0x78] sm:$0xf]  ;;  %1342 = vst [vmem:[#allocation3 + $0x68] sm:$0xf] %v1341_v21 }
 0x152   :  { %1344 = vst [vmem:[#allocation3 + $0x6c] sm:$0xff] %v1343_v22   ;;  %1348 = vst [vmem:[#allocation3 + $0x74] sm:$0xf] %v1347_v23  ;;  %v1349_v24 = vld [vmem:[%s10083_s14 + $0x74] sm:$0xf]  ;;  %v1359_v28 = vld [vmem:[%s10083_s14 + $0x8c] sm:$0xff]  }
 0x153   :  { %v1355_v26 = vld [vmem:[%s10083_s14 + $0x88] sm:$0xf]  ;;  %1350 = vst [vmem:[#allocation3 + $0x78] sm:$0xf] %v1349_v24  ;;  %1352 = vst [vmem:[#allocation3 + $0x7c] sm:$0xff] %v1351_v25   ;;  %v1367_v31 = vld [vmem:[%s10083_s14 + $0x9c] sm:$0xff]  }
 0x154   :  { %1356 = vst [vmem:[#allocation3 + $0x84] sm:$0xf] %v1355_v26  ;;  %v1357_v27 = vld [vmem:[%s10083_s14 + $0x84] sm:$0xf]  ;;  %v1363_v29 = vld [vmem:[%s10083_s14 + $0x98] sm:$0xf] }
 0x155   :  { %1358 = vst [vmem:[#allocation3 + $0x88] sm:$0xf] %v1357_v27  ;;  %1360 = vst [vmem:[#allocation3 + $0x8c] sm:$0xff] %v1359_v28   ;;  %v1365_v30 = vld [vmem:[%s10083_s14 + $0x94] sm:$0xf]  ;;  %v1375_v34 = vld [vmem:[%s10083_s14 + $0xac] sm:$0xff]  }
 0x156   :  { %1364 = vst [vmem:[#allocation3 + $0x94] sm:$0xf] %v1363_v29  ;;  %v1371_v32 = vld [vmem:[%s10083_s14 + $0xa8] sm:$0xf]  ;;  %1366 = vst [vmem:[#allocation3 + $0x98] sm:$0xf] %v1365_v30 }
 0x157   :  { %1368 = vst [vmem:[#allocation3 + $0x9c] sm:$0xff] %v1367_v31   ;;  %1372 = vst [vmem:[#allocation3 + $0xa4] sm:$0xf] %v1371_v32  ;;  %v1373_v33 = vld [vmem:[%s10083_s14 + $0xa4] sm:$0xf]  ;;  %v1383_v37 = vld [vmem:[%s10083_s14 + $0xbc] sm:$0xff]  }
 0x158   :  { %v1379_v35 = vld [vmem:[%s10083_s14 + $0xb8] sm:$0xf]  ;;  %1374 = vst [vmem:[#allocation3 + $0xa8] sm:$0xf] %v1373_v33  ;;  %1376 = vst [vmem:[#allocation3 + $0xac] sm:$0xff] %v1375_v34   ;;  %v1391_v40 = vld [vmem:[%s10083_s14 + $0xcc] sm:$0xff]  }
 0x159   :  { %1380 = vst [vmem:[#allocation3 + $0xb4] sm:$0xf] %v1379_v35  ;;  %v1381_v36 = vld [vmem:[%s10083_s14 + $0xb4] sm:$0xf]  ;;  %v1387_v38 = vld [vmem:[%s10083_s14 + $0xc8] sm:$0xf] }
 0x15a   :  { %1382 = vst [vmem:[#allocation3 + $0xb8] sm:$0xf] %v1381_v36  ;;  %1384 = vst [vmem:[#allocation3 + $0xbc] sm:$0xff] %v1383_v37   ;;  %v1389_v39 = vld [vmem:[%s10083_s14 + $0xc4] sm:$0xf]  ;;  %v1399_v43 = vld [vmem:[%s10083_s14 + $0xdc] sm:$0xff]  }
 0x15b   :  { %1388 = vst [vmem:[#allocation3 + $0xc4] sm:$0xf] %v1387_v38  ;;  %v1395_v41 = vld [vmem:[%s10083_s14 + $0xd8] sm:$0xf]  ;;  %1390 = vst [vmem:[#allocation3 + $0xc8] sm:$0xf] %v1389_v39 }
 0x15c   :  { %1392 = vst [vmem:[#allocation3 + $0xcc] sm:$0xff] %v1391_v40   ;;  %1396 = vst [vmem:[#allocation3 + $0xd4] sm:$0xf] %v1395_v41  ;;  %v1397_v42 = vld [vmem:[%s10083_s14 + $0xd4] sm:$0xf]  ;;  %v1407_v46 = vld [vmem:[%s10083_s14 + $0xec] sm:$0xff]  }
 0x15d   :  { %v1403_v44 = vld [vmem:[%s10083_s14 + $0xe8] sm:$0xf]  ;;  %1398 = vst [vmem:[#allocation3 + $0xd8] sm:$0xf] %v1397_v42  ;;  %1400 = vst [vmem:[#allocation3 + $0xdc] sm:$0xff] %v1399_v43   ;;  %v1415_v49 = vld [vmem:[%s10083_s14 + $0xfc] sm:$0xff]  }
 0x15e   :  { %1404 = vst [vmem:[#allocation3 + $0xe4] sm:$0xf] %v1403_v44  ;;  %v1405_v45 = vld [vmem:[%s10083_s14 + $0xe4] sm:$0xf]  ;;  %v1411_v47 = vld [vmem:[%s10083_s14 + $0xf8] sm:$0xf] }
 0x15f   :  { %1406 = vst [vmem:[#allocation3 + $0xe8] sm:$0xf] %v1405_v45  ;;  %1408 = vst [vmem:[#allocation3 + $0xec] sm:$0xff] %v1407_v46   ;;  %v1413_v48 = vld [vmem:[%s10083_s14 + $0xf4] sm:$0xf]  ;;  %v1423_v52 = vld [vmem:[%s10083_s14 + $0x10c] sm:$0xff]  }
 0x160   :  { %1412 = vst [vmem:[#allocation3 + $0xf4] sm:$0xf] %v1411_v47  ;;  %v1419_v50 = vld [vmem:[%s10083_s14 + $0x108] sm:$0xf]  ;;  %1414 = vst [vmem:[#allocation3 + $0xf8] sm:$0xf] %v1413_v48 }
 0x161   :  { %1416 = vst [vmem:[#allocation3 + $0xfc] sm:$0xff] %v1415_v49   ;;  %1420 = vst [vmem:[#allocation3 + $0x104] sm:$0xf] %v1419_v50  ;;  %v1421_v51 = vld [vmem:[%s10083_s14 + $0x104] sm:$0xf]  ;;  %v1431_v55 = vld [vmem:[%s10083_s14 + $0x11c] sm:$0xff]  }
 0x162   :  { %v1427_v53 = vld [vmem:[%s10083_s14 + $0x118] sm:$0xf]  ;;  %1422 = vst [vmem:[#allocation3 + $0x108] sm:$0xf] %v1421_v51  ;;  %1424 = vst [vmem:[#allocation3 + $0x10c] sm:$0xff] %v1423_v52   ;;  %v1439_v58 = vld [vmem:[%s10083_s14 + $0x12c] sm:$0xff]  }
 0x163   :  { %1428 = vst [vmem:[#allocation3 + $0x114] sm:$0xf] %v1427_v53  ;;  %v1429_v54 = vld [vmem:[%s10083_s14 + $0x114] sm:$0xf]  ;;  %v1435_v56 = vld [vmem:[%s10083_s14 + $0x128] sm:$0xf] }
 0x164   :  { %1430 = vst [vmem:[#allocation3 + $0x118] sm:$0xf] %v1429_v54  ;;  %1432 = vst [vmem:[#allocation3 + $0x11c] sm:$0xff] %v1431_v55   ;;  %v1437_v57 = vld [vmem:[%s10083_s14 + $0x124] sm:$0xf]  ;;  %v1447_v61 = vld [vmem:[%s10083_s14 + $0x13c] sm:$0xff]  }
 0x165   :  { %1436 = vst [vmem:[#allocation3 + $0x124] sm:$0xf] %v1435_v56  ;;  %v1443_v59 = vld [vmem:[%s10083_s14 + $0x138] sm:$0xf]  ;;  %1438 = vst [vmem:[#allocation3 + $0x128] sm:$0xf] %v1437_v57 }
 0x166   :  { %1440 = vst [vmem:[#allocation3 + $0x12c] sm:$0xff] %v1439_v58   ;;  %1444 = vst [vmem:[#allocation3 + $0x134] sm:$0xf] %v1443_v59  ;;  %v1445_v60 = vld [vmem:[%s10083_s14 + $0x134] sm:$0xf]  ;;  %v1455_v0 = vld [vmem:[%s10083_s14 + $0x14c] sm:$0xff]  }
 0x167   :  { %v1451_v62 = vld [vmem:[%s10083_s14 + $0x148] sm:$0xf]  ;;  %1446 = vst [vmem:[#allocation3 + $0x138] sm:$0xf] %v1445_v60  ;;  %1448 = vst [vmem:[#allocation3 + $0x13c] sm:$0xff] %v1447_v61   ;;  %v1463_v3 = vld [vmem:[%s10083_s14 + $0x15c] sm:$0xff]  }
 0x168   :  { %1452 = vst [vmem:[#allocation3 + $0x144] sm:$0xf] %v1451_v62  ;;  %v1453_v63 = vld [vmem:[%s10083_s14 + $0x144] sm:$0xf]  ;;  %v1459_v1 = vld [vmem:[%s10083_s14 + $0x158] sm:$0xf] }
 0x169   :  { %1454 = vst [vmem:[#allocation3 + $0x148] sm:$0xf] %v1453_v63  ;;  %1456 = vst [vmem:[#allocation3 + $0x14c] sm:$0xff] %v1455_v0   ;;  %v1461_v2 = vld [vmem:[%s10083_s14 + $0x154] sm:$0xf]  ;;  %v1471_v6 = vld [vmem:[%s10083_s14 + $0x16c] sm:$0xff]  }
 0x16a   :  { %1460 = vst [vmem:[#allocation3 + $0x154] sm:$0xf] %v1459_v1  ;;  %v1467_v4 = vld [vmem:[%s10083_s14 + $0x168] sm:$0xf]  ;;  %1462 = vst [vmem:[#allocation3 + $0x158] sm:$0xf] %v1461_v2 }
 0x16b   :  { %1464 = vst [vmem:[#allocation3 + $0x15c] sm:$0xff] %v1463_v3   ;;  %1468 = vst [vmem:[#allocation3 + $0x164] sm:$0xf] %v1467_v4  ;;  %v1469_v5 = vld [vmem:[%s10083_s14 + $0x164] sm:$0xf]  ;;  %v1479_v9 = vld [vmem:[%s10083_s14 + $0x17c] sm:$0xff]  }
 0x16c   :  { %v1475_v7 = vld [vmem:[%s10083_s14 + $0x178] sm:$0xf]  ;;  %1470 = vst [vmem:[#allocation3 + $0x168] sm:$0xf] %v1469_v5  ;;  %1472 = vst [vmem:[#allocation3 + $0x16c] sm:$0xff] %v1471_v6   ;;  %v1487_v12 = vld [vmem:[%s10083_s14 + $0x18c] sm:$0xff]  }
 0x16d   :  { %1476 = vst [vmem:[#allocation3 + $0x174] sm:$0xf] %v1475_v7  ;;  %v1477_v8 = vld [vmem:[%s10083_s14 + $0x174] sm:$0xf]  ;;  %v1483_v10 = vld [vmem:[%s10083_s14 + $0x188] sm:$0xf] }
 0x16e   :  { %1478 = vst [vmem:[#allocation3 + $0x178] sm:$0xf] %v1477_v8  ;;  %1480 = vst [vmem:[#allocation3 + $0x17c] sm:$0xff] %v1479_v9   ;;  %v1485_v11 = vld [vmem:[%s10083_s14 + $0x184] sm:$0xf]  ;;  %v1495_v15 = vld [vmem:[%s10083_s14 + $0x19c] sm:$0xff]  }
 0x16f   :  { %1484 = vst [vmem:[#allocation3 + $0x184] sm:$0xf] %v1483_v10  ;;  %v1491_v13 = vld [vmem:[%s10083_s14 + $0x198] sm:$0xf]  ;;  %1486 = vst [vmem:[#allocation3 + $0x188] sm:$0xf] %v1485_v11 }
 0x170   :  { %1488 = vst [vmem:[#allocation3 + $0x18c] sm:$0xff] %v1487_v12   ;;  %1492 = vst [vmem:[#allocation3 + $0x194] sm:$0xf] %v1491_v13  ;;  %v1493_v14 = vld [vmem:[%s10083_s14 + $0x194] sm:$0xf]  ;;  %v1503_v18 = vld [vmem:[%s10083_s14 + $0x1ac] sm:$0xff]  }
 0x171   :  { %v1499_v16 = vld [vmem:[%s10083_s14 + $0x1a8] sm:$0xf]  ;;  %1494 = vst [vmem:[#allocation3 + $0x198] sm:$0xf] %v1493_v14  ;;  %1496 = vst [vmem:[#allocation3 + $0x19c] sm:$0xff] %v1495_v15   ;;  %v1511_v21 = vld [vmem:[%s10083_s14 + $0x1bc] sm:$0xff]  }
 0x172   :  { %1500 = vst [vmem:[#allocation3 + $0x1a4] sm:$0xf] %v1499_v16  ;;  %v1501_v17 = vld [vmem:[%s10083_s14 + $0x1a4] sm:$0xf]  ;;  %v1507_v19 = vld [vmem:[%s10083_s14 + $0x1b8] sm:$0xf] }
 0x173   :  { %1502 = vst [vmem:[#allocation3 + $0x1a8] sm:$0xf] %v1501_v17  ;;  %1504 = vst [vmem:[#allocation3 + $0x1ac] sm:$0xff] %v1503_v18   ;;  %v1509_v20 = vld [vmem:[%s10083_s14 + $0x1b4] sm:$0xf]  ;;  %v1519_v24 = vld [vmem:[%s10083_s14 + $0x1cc] sm:$0xff]  }
 0x174   :  { %1508 = vst [vmem:[#allocation3 + $0x1b4] sm:$0xf] %v1507_v19  ;;  %v1515_v22 = vld [vmem:[%s10083_s14 + $0x1c8] sm:$0xf]  ;;  %1510 = vst [vmem:[#allocation3 + $0x1b8] sm:$0xf] %v1509_v20 }
 0x175   :  { %1512 = vst [vmem:[#allocation3 + $0x1bc] sm:$0xff] %v1511_v21   ;;  %1516 = vst [vmem:[#allocation3 + $0x1c4] sm:$0xf] %v1515_v22  ;;  %v1517_v23 = vld [vmem:[%s10083_s14 + $0x1c4] sm:$0xf]  ;;  %v1527_v27 = vld [vmem:[%s10083_s14 + $0x1dc] sm:$0xff]  }
 0x176   :  { %v1523_v25 = vld [vmem:[%s10083_s14 + $0x1d8] sm:$0xf]  ;;  %1518 = vst [vmem:[#allocation3 + $0x1c8] sm:$0xf] %v1517_v23  ;;  %1520 = vst [vmem:[#allocation3 + $0x1cc] sm:$0xff] %v1519_v24   ;;  %v1535_v30 = vld [vmem:[%s10083_s14 + $0x1ec] sm:$0xff]  }
 0x177   :  { %1524 = vst [vmem:[#allocation3 + $0x1d4] sm:$0xf] %v1523_v25  ;;  %v1525_v26 = vld [vmem:[%s10083_s14 + $0x1d4] sm:$0xf]  ;;  %v1531_v28 = vld [vmem:[%s10083_s14 + $0x1e8] sm:$0xf] }
 0x178   :  { %1526 = vst [vmem:[#allocation3 + $0x1d8] sm:$0xf] %v1525_v26  ;;  %1528 = vst [vmem:[#allocation3 + $0x1dc] sm:$0xff] %v1527_v27   ;;  %v1533_v29 = vld [vmem:[%s10083_s14 + $0x1e4] sm:$0xf]  ;;  %v1543_v33 = vld [vmem:[%s10083_s14 + $0x1fc] sm:$0xff]  }
 0x179   :  { %1532 = vst [vmem:[#allocation3 + $0x1e4] sm:$0xf] %v1531_v28  ;;  %v1539_v31 = vld [vmem:[%s10083_s14 + $0x1f8] sm:$0xf]  ;;  %1534 = vst [vmem:[#allocation3 + $0x1e8] sm:$0xf] %v1533_v29 }
 0x17a   :  { %1536 = vst [vmem:[#allocation3 + $0x1ec] sm:$0xff] %v1535_v30   ;;  %1540 = vst [vmem:[#allocation3 + $0x1f4] sm:$0xf] %v1539_v31  ;;  %v1541_v32 = vld [vmem:[%s10083_s14 + $0x1f4] sm:$0xf]  ;;  %v1551_v36 = vld [vmem:[%s10083_s14 + $0x20c] sm:$0xff]  }
 0x17b   :  { %v1547_v34 = vld [vmem:[%s10083_s14 + $0x208] sm:$0xf]  ;;  %1542 = vst [vmem:[#allocation3 + $0x1f8] sm:$0xf] %v1541_v32  ;;  %1544 = vst [vmem:[#allocation3 + $0x1fc] sm:$0xff] %v1543_v33   ;;  %v1559_v39 = vld [vmem:[%s10083_s14 + $0x21c] sm:$0xff]  }
 0x17c   :  { %1548 = vst [vmem:[#allocation3 + $0x204] sm:$0xf] %v1547_v34  ;;  %v1549_v35 = vld [vmem:[%s10083_s14 + $0x204] sm:$0xf]  ;;  %v1555_v37 = vld [vmem:[%s10083_s14 + $0x218] sm:$0xf] }
 0x17d   :  { %1550 = vst [vmem:[#allocation3 + $0x208] sm:$0xf] %v1549_v35  ;;  %1552 = vst [vmem:[#allocation3 + $0x20c] sm:$0xff] %v1551_v36   ;;  %v1557_v38 = vld [vmem:[%s10083_s14 + $0x214] sm:$0xf]  ;;  %v1567_v42 = vld [vmem:[%s10083_s14 + $0x22c] sm:$0xff]  }
 0x17e   :  { %1556 = vst [vmem:[#allocation3 + $0x214] sm:$0xf] %v1555_v37  ;;  %v1563_v40 = vld [vmem:[%s10083_s14 + $0x228] sm:$0xf]  ;;  %1558 = vst [vmem:[#allocation3 + $0x218] sm:$0xf] %v1557_v38 }
 0x17f   :  { %1560 = vst [vmem:[#allocation3 + $0x21c] sm:$0xff] %v1559_v39   ;;  %1564 = vst [vmem:[#allocation3 + $0x224] sm:$0xf] %v1563_v40  ;;  %v1565_v41 = vld [vmem:[%s10083_s14 + $0x224] sm:$0xf]  ;;  %v1575_v45 = vld [vmem:[%s10083_s14 + $0x23c] sm:$0xff]  }
 0x180   :  { %v1571_v43 = vld [vmem:[%s10083_s14 + $0x238] sm:$0xf]  ;;  %1566 = vst [vmem:[#allocation3 + $0x228] sm:$0xf] %v1565_v41  ;;  %1568 = vst [vmem:[#allocation3 + $0x22c] sm:$0xff] %v1567_v42   ;;  %v1583_v48 = vld [vmem:[%s10083_s14 + $0x24c] sm:$0xff]  }
 0x181   :  { %1572 = vst [vmem:[#allocation3 + $0x234] sm:$0xf] %v1571_v43  ;;  %v1573_v44 = vld [vmem:[%s10083_s14 + $0x234] sm:$0xf]  ;;  %v1579_v46 = vld [vmem:[%s10083_s14 + $0x248] sm:$0xf] }
 0x182   :  { %1574 = vst [vmem:[#allocation3 + $0x238] sm:$0xf] %v1573_v44  ;;  %1576 = vst [vmem:[#allocation3 + $0x23c] sm:$0xff] %v1575_v45   ;;  %v1581_v47 = vld [vmem:[%s10083_s14 + $0x244] sm:$0xf]  ;;  %v1591_v51 = vld [vmem:[%s10083_s14 + $0x25c] sm:$0xff]  }
 0x183   :  { %1580 = vst [vmem:[#allocation3 + $0x244] sm:$0xf] %v1579_v46  ;;  %v1587_v49 = vld [vmem:[%s10083_s14 + $0x258] sm:$0xf]  ;;  %1582 = vst [vmem:[#allocation3 + $0x248] sm:$0xf] %v1581_v47 }
 0x184   :  { %1584 = vst [vmem:[#allocation3 + $0x24c] sm:$0xff] %v1583_v48   ;;  %1588 = vst [vmem:[#allocation3 + $0x254] sm:$0xf] %v1587_v49  ;;  %v1589_v50 = vld [vmem:[%s10083_s14 + $0x254] sm:$0xf]  ;;  %v1599_v54 = vld [vmem:[%s10083_s14 + $0x26c] sm:$0xff]  }
 0x185   :  { %v1595_v52 = vld [vmem:[%s10083_s14 + $0x268] sm:$0xf]  ;;  %1590 = vst [vmem:[#allocation3 + $0x258] sm:$0xf] %v1589_v50  ;;  %1592 = vst [vmem:[#allocation3 + $0x25c] sm:$0xff] %v1591_v51   ;;  %v1607_v57 = vld [vmem:[%s10083_s14 + $0x27c] sm:$0xff]  }
 0x186   :  { %1596 = vst [vmem:[#allocation3 + $0x264] sm:$0xf] %v1595_v52  ;;  %v1597_v53 = vld [vmem:[%s10083_s14 + $0x264] sm:$0xf]  ;;  %v1603_v55 = vld [vmem:[%s10083_s14 + $0x278] sm:$0xf] }
 0x187   :  { %1598 = vst [vmem:[#allocation3 + $0x268] sm:$0xf] %v1597_v53  ;;  %1600 = vst [vmem:[#allocation3 + $0x26c] sm:$0xff] %v1599_v54   ;;  %v1605_v56 = vld [vmem:[%s10083_s14 + $0x274] sm:$0xf]  ;;  %v1615_v60 = vld [vmem:[%s10083_s14 + $0x28c] sm:$0xff]  }
 0x188   :  { %1604 = vst [vmem:[#allocation3 + $0x274] sm:$0xf] %v1603_v55  ;;  %v1611_v58 = vld [vmem:[%s10083_s14 + $0x288] sm:$0xf]  ;;  %1606 = vst [vmem:[#allocation3 + $0x278] sm:$0xf] %v1605_v56 }
 0x189   :  { %1608 = vst [vmem:[#allocation3 + $0x27c] sm:$0xff] %v1607_v57   ;;  %1612 = vst [vmem:[#allocation3 + $0x284] sm:$0xf] %v1611_v58  ;;  %v1613_v59 = vld [vmem:[%s10083_s14 + $0x284] sm:$0xf]  ;;  %v1623_v63 = vld [vmem:[%s10083_s14 + $0x29c] sm:$0xff]  }
 0x18a   :  { %v1619_v61 = vld [vmem:[%s10083_s14 + $0x298] sm:$0xf]  ;;  %1614 = vst [vmem:[#allocation3 + $0x288] sm:$0xf] %v1613_v59  ;;  %1616 = vst [vmem:[#allocation3 + $0x28c] sm:$0xff] %v1615_v60   ;;  %v1631_v2 = vld [vmem:[%s10083_s14 + $0x2ac] sm:$0xff]  }
 0x18b   :  { %1620 = vst [vmem:[#allocation3 + $0x294] sm:$0xf] %v1619_v61  ;;  %v1621_v62 = vld [vmem:[%s10083_s14 + $0x294] sm:$0xf]  ;;  %v1627_v0 = vld [vmem:[%s10083_s14 + $0x2a8] sm:$0xf] }
 0x18c   :  { %1622 = vst [vmem:[#allocation3 + $0x298] sm:$0xf] %v1621_v62  ;;  %1624 = vst [vmem:[#allocation3 + $0x29c] sm:$0xff] %v1623_v63   ;;  %v1629_v1 = vld [vmem:[%s10083_s14 + $0x2a4] sm:$0xf]  ;;  %v1639_v5 = vld [vmem:[%s10083_s14 + $0x2bc] sm:$0xff]  }
 0x18d   :  { %1628 = vst [vmem:[#allocation3 + $0x2a4] sm:$0xf] %v1627_v0  ;;  %v1635_v3 = vld [vmem:[%s10083_s14 + $0x2b8] sm:$0xf]  ;;  %1630 = vst [vmem:[#allocation3 + $0x2a8] sm:$0xf] %v1629_v1 }
 0x18e   :  { %1632 = vst [vmem:[#allocation3 + $0x2ac] sm:$0xff] %v1631_v2   ;;  %1636 = vst [vmem:[#allocation3 + $0x2b4] sm:$0xf] %v1635_v3  ;;  %v1637_v4 = vld [vmem:[%s10083_s14 + $0x2b4] sm:$0xf]  ;;  %v1647_v8 = vld [vmem:[%s10083_s14 + $0x2cc] sm:$0xff]  }
 0x18f   :  { %v1643_v6 = vld [vmem:[%s10083_s14 + $0x2c8] sm:$0xf]  ;;  %1638 = vst [vmem:[#allocation3 + $0x2b8] sm:$0xf] %v1637_v4  ;;  %1640 = vst [vmem:[#allocation3 + $0x2bc] sm:$0xff] %v1639_v5   ;;  %v1655_v11 = vld [vmem:[%s10083_s14 + $0x2dc] sm:$0xff]  }
 0x190   :  { %1644 = vst [vmem:[#allocation3 + $0x2c4] sm:$0xf] %v1643_v6  ;;  %v1645_v7 = vld [vmem:[%s10083_s14 + $0x2c4] sm:$0xf]  ;;  %v1651_v9 = vld [vmem:[%s10083_s14 + $0x2d8] sm:$0xf] }
 0x191   :  { %1646 = vst [vmem:[#allocation3 + $0x2c8] sm:$0xf] %v1645_v7  ;;  %1648 = vst [vmem:[#allocation3 + $0x2cc] sm:$0xff] %v1647_v8   ;;  %v1653_v10 = vld [vmem:[%s10083_s14 + $0x2d4] sm:$0xf]  ;;  %v1663_v14 = vld [vmem:[%s10083_s14 + $0x2ec] sm:$0xff]  }
 0x192   :  { %1652 = vst [vmem:[#allocation3 + $0x2d4] sm:$0xf] %v1651_v9  ;;  %v1659_v12 = vld [vmem:[%s10083_s14 + $0x2e8] sm:$0xf]  ;;  %1654 = vst [vmem:[#allocation3 + $0x2d8] sm:$0xf] %v1653_v10 }
 0x193   :  { %1656 = vst [vmem:[#allocation3 + $0x2dc] sm:$0xff] %v1655_v11   ;;  %1660 = vst [vmem:[#allocation3 + $0x2e4] sm:$0xf] %v1659_v12  ;;  %v1661_v13 = vld [vmem:[%s10083_s14 + $0x2e4] sm:$0xf]  ;;  %v1671_v17 = vld [vmem:[%s10083_s14 + $0x2fc] sm:$0xff]  }
 0x194   :  { %v1667_v15 = vld [vmem:[%s10083_s14 + $0x2f8] sm:$0xf]  ;;  %1662 = vst [vmem:[#allocation3 + $0x2e8] sm:$0xf] %v1661_v13  ;;  %1664 = vst [vmem:[#allocation3 + $0x2ec] sm:$0xff] %v1663_v14   ;;  %v1679_v20 = vld [vmem:[%s10083_s14 + $0x30c] sm:$0xff]  }
 0x195   :  { %1668 = vst [vmem:[#allocation3 + $0x2f4] sm:$0xf] %v1667_v15  ;;  %v1669_v16 = vld [vmem:[%s10083_s14 + $0x2f4] sm:$0xf]  ;;  %v1675_v18 = vld [vmem:[%s10083_s14 + $0x308] sm:$0xf] }
 0x196   :  { %1670 = vst [vmem:[#allocation3 + $0x2f8] sm:$0xf] %v1669_v16  ;;  %1672 = vst [vmem:[#allocation3 + $0x2fc] sm:$0xff] %v1671_v17   ;;  %v1677_v19 = vld [vmem:[%s10083_s14 + $0x304] sm:$0xf]  ;;  %v1687_v23 = vld [vmem:[%s10083_s14 + $0x31c] sm:$0xff]  }
 0x197   :  { %1676 = vst [vmem:[#allocation3 + $0x304] sm:$0xf] %v1675_v18  ;;  %v1683_v21 = vld [vmem:[%s10083_s14 + $0x318] sm:$0xf]  ;;  %1678 = vst [vmem:[#allocation3 + $0x308] sm:$0xf] %v1677_v19 }
 0x198   :  { %1680 = vst [vmem:[#allocation3 + $0x30c] sm:$0xff] %v1679_v20   ;;  %1684 = vst [vmem:[#allocation3 + $0x314] sm:$0xf] %v1683_v21  ;;  %v1685_v22 = vld [vmem:[%s10083_s14 + $0x314] sm:$0xf]  ;;  %v1695_v26 = vld [vmem:[%s10083_s14 + $0x32c] sm:$0xff]  }
 0x199   :  { %v1691_v24 = vld [vmem:[%s10083_s14 + $0x328] sm:$0xf]  ;;  %1686 = vst [vmem:[#allocation3 + $0x318] sm:$0xf] %v1685_v22  ;;  %1688 = vst [vmem:[#allocation3 + $0x31c] sm:$0xff] %v1687_v23   ;;  %v1703_v29 = vld [vmem:[%s10083_s14 + $0x33c] sm:$0xff]  }
 0x19a   :  { %1692 = vst [vmem:[#allocation3 + $0x324] sm:$0xf] %v1691_v24  ;;  %v1693_v25 = vld [vmem:[%s10083_s14 + $0x324] sm:$0xf]  ;;  %v1699_v27 = vld [vmem:[%s10083_s14 + $0x338] sm:$0xf] }
 0x19b   :  { %1694 = vst [vmem:[#allocation3 + $0x328] sm:$0xf] %v1693_v25  ;;  %1696 = vst [vmem:[#allocation3 + $0x32c] sm:$0xff] %v1695_v26   ;;  %v1701_v28 = vld [vmem:[%s10083_s14 + $0x334] sm:$0xf]  ;;  %v1711_v32 = vld [vmem:[%s10083_s14 + $0x34c] sm:$0xff]  }
 0x19c   :  { %1700 = vst [vmem:[#allocation3 + $0x334] sm:$0xf] %v1699_v27  ;;  %v1707_v30 = vld [vmem:[%s10083_s14 + $0x348] sm:$0xf]  ;;  %1702 = vst [vmem:[#allocation3 + $0x338] sm:$0xf] %v1701_v28 }
 0x19d   :  { %1704 = vst [vmem:[#allocation3 + $0x33c] sm:$0xff] %v1703_v29   ;;  %1708 = vst [vmem:[#allocation3 + $0x344] sm:$0xf] %v1707_v30  ;;  %v1709_v31 = vld [vmem:[%s10083_s14 + $0x344] sm:$0xf]  ;;  %v1719_v35 = vld [vmem:[%s10083_s14 + $0x35c] sm:$0xff]  }
 0x19e   :  { %v1715_v33 = vld [vmem:[%s10083_s14 + $0x358] sm:$0xf]  ;;  %1710 = vst [vmem:[#allocation3 + $0x348] sm:$0xf] %v1709_v31  ;;  %1712 = vst [vmem:[#allocation3 + $0x34c] sm:$0xff] %v1711_v32   ;;  %v1727_v38 = vld [vmem:[%s10083_s14 + $0x36c] sm:$0xff]  }
 0x19f   :  { %1716 = vst [vmem:[#allocation3 + $0x354] sm:$0xf] %v1715_v33  ;;  %v1717_v34 = vld [vmem:[%s10083_s14 + $0x354] sm:$0xf]  ;;  %v1723_v36 = vld [vmem:[%s10083_s14 + $0x368] sm:$0xf] }
 0x1a0   :  { %1718 = vst [vmem:[#allocation3 + $0x358] sm:$0xf] %v1717_v34  ;;  %1720 = vst [vmem:[#allocation3 + $0x35c] sm:$0xff] %v1719_v35   ;;  %v1725_v37 = vld [vmem:[%s10083_s14 + $0x364] sm:$0xf]  ;;  %v1735_v41 = vld [vmem:[%s10083_s14 + $0x37c] sm:$0xff]  }
 0x1a1   :  { %1724 = vst [vmem:[#allocation3 + $0x364] sm:$0xf] %v1723_v36  ;;  %v1731_v39 = vld [vmem:[%s10083_s14 + $0x378] sm:$0xf]  ;;  %1726 = vst [vmem:[#allocation3 + $0x368] sm:$0xf] %v1725_v37 }
 0x1a2   :  { %1728 = vst [vmem:[#allocation3 + $0x36c] sm:$0xff] %v1727_v38   ;;  %1732 = vst [vmem:[#allocation3 + $0x374] sm:$0xf] %v1731_v39  ;;  %v1733_v40 = vld [vmem:[%s10083_s14 + $0x374] sm:$0xf]  ;;  %v1743_v44 = vld [vmem:[%s10083_s14 + $0x38c] sm:$0xff]  }
 0x1a3   :  { %v1739_v42 = vld [vmem:[%s10083_s14 + $0x388] sm:$0xf]  ;;  %1734 = vst [vmem:[#allocation3 + $0x378] sm:$0xf] %v1733_v40  ;;  %1736 = vst [vmem:[#allocation3 + $0x37c] sm:$0xff] %v1735_v41   ;;  %v1751_v47 = vld [vmem:[%s10083_s14 + $0x39c] sm:$0xff]  }
 0x1a4   :  { %1740 = vst [vmem:[#allocation3 + $0x384] sm:$0xf] %v1739_v42  ;;  %v1741_v43 = vld [vmem:[%s10083_s14 + $0x384] sm:$0xf]  ;;  %v1747_v45 = vld [vmem:[%s10083_s14 + $0x398] sm:$0xf] }
 0x1a5   :  { %1742 = vst [vmem:[#allocation3 + $0x388] sm:$0xf] %v1741_v43  ;;  %1744 = vst [vmem:[#allocation3 + $0x38c] sm:$0xff] %v1743_v44   ;;  %v1749_v46 = vld [vmem:[%s10083_s14 + $0x394] sm:$0xf]  ;;  %v1759_v50 = vld [vmem:[%s10083_s14 + $0x3ac] sm:$0xff]  }
 0x1a6   :  { %1748 = vst [vmem:[#allocation3 + $0x394] sm:$0xf] %v1747_v45  ;;  %v1755_v48 = vld [vmem:[%s10083_s14 + $0x3a8] sm:$0xf]  ;;  %1750 = vst [vmem:[#allocation3 + $0x398] sm:$0xf] %v1749_v46 }
 0x1a7   :  { %1752 = vst [vmem:[#allocation3 + $0x39c] sm:$0xff] %v1751_v47   ;;  %1756 = vst [vmem:[#allocation3 + $0x3a4] sm:$0xf] %v1755_v48  ;;  %v1757_v49 = vld [vmem:[%s10083_s14 + $0x3a4] sm:$0xf]  ;;  %v1767_v53 = vld [vmem:[%s10083_s14 + $0x3bc] sm:$0xff]  }
 0x1a8   :  { %v1763_v51 = vld [vmem:[%s10083_s14 + $0x3b8] sm:$0xf]  ;;  %1758 = vst [vmem:[#allocation3 + $0x3a8] sm:$0xf] %v1757_v49  ;;  %1760 = vst [vmem:[#allocation3 + $0x3ac] sm:$0xff] %v1759_v50   ;;  %v1775_v56 = vld [vmem:[%s10083_s14 + $0x3cc] sm:$0xff]  }
 0x1a9   :  { %1764 = vst [vmem:[#allocation3 + $0x3b4] sm:$0xf] %v1763_v51  ;;  %v1765_v52 = vld [vmem:[%s10083_s14 + $0x3b4] sm:$0xf]  ;;  %v1771_v54 = vld [vmem:[%s10083_s14 + $0x3c8] sm:$0xf] }
 0x1aa   :  { %1766 = vst [vmem:[#allocation3 + $0x3b8] sm:$0xf] %v1765_v52  ;;  %1768 = vst [vmem:[#allocation3 + $0x3bc] sm:$0xff] %v1767_v53   ;;  %v1773_v55 = vld [vmem:[%s10083_s14 + $0x3c4] sm:$0xf]  ;;  %v1783_v59 = vld [vmem:[%s10083_s14 + $0x3dc] sm:$0xff]  }
 0x1ab   :  { %1772 = vst [vmem:[#allocation3 + $0x3c4] sm:$0xf] %v1771_v54  ;;  %v1779_v57 = vld [vmem:[%s10083_s14 + $0x3d8] sm:$0xf]  ;;  %1774 = vst [vmem:[#allocation3 + $0x3c8] sm:$0xf] %v1773_v55 }
 0x1ac   :  { %1776 = vst [vmem:[#allocation3 + $0x3cc] sm:$0xff] %v1775_v56   ;;  %1780 = vst [vmem:[#allocation3 + $0x3d4] sm:$0xf] %v1779_v57  ;;  %v1781_v58 = vld [vmem:[%s10083_s14 + $0x3d4] sm:$0xf]  ;;  %v1791_v62 = vld [vmem:[%s10083_s14 + $0x3ec] sm:$0xff]  }
 0x1ad   :  { %v1787_v60 = vld [vmem:[%s10083_s14 + $0x3e8] sm:$0xf]  ;;  %1782 = vst [vmem:[#allocation3 + $0x3d8] sm:$0xf] %v1781_v58  ;;  %1784 = vst [vmem:[#allocation3 + $0x3dc] sm:$0xff] %v1783_v59  }
 0x1ae   :  { %1788 = vst [vmem:[#allocation3 + $0x3e4] sm:$0xf] %v1787_v60  ;;  %v1789_v61 = vld [vmem:[%s10083_s14 + $0x3e4] sm:$0xf]  ;;  %v1795_v63 = vld [vmem:[%s10083_s14 + $0x3f8] sm:$0xf] }
 0x1af   :  { %1790 = vst [vmem:[#allocation3 + $0x3e8] sm:$0xf] %v1789_v61  ;;  %1792 = vst [vmem:[#allocation3 + $0x3ec] sm:$0xff] %v1791_v62   ;;  %v1797_v0 = vld [vmem:[%s10083_s14 + $0x3f4] sm:$0xf] }
 0x1b0   :  { %1796 = vst [vmem:[#allocation3 + $0x3f4] sm:$0xf] %v1795_v63  ;;  %v1799_v1 = vld [vmem:[%s10083_s14 + $0x3fc] sm:$0xf]  ;;  %1798 = vst [vmem:[#allocation3 + $0x3f8] sm:$0xf] %v1797_v0 }
 0x1b1   :  { %1800 = vst [vmem:[#allocation3 + $0x3fc] sm:$0xf] %v1799_v1 }
 0x1b2   :  { %2343 = vsyncadd [#allocation4 + $0x1], 16384  ;;  %s10122_s17 = sld [smem:[#allocation34_spill]]  ;;  %v7369_v4 = vmov 0   ;;  %v6904_v19 = vld [vmem:[#allocation5 + $0xc4] ss:$8 sps:$4 sm:$0xff]  }
 0x1b3   :  { %2600 = vmatprep.mubr.bf16.mxu0 %v7369_v4  ;;  %v6906_v20 = vld [vmem:[#allocation5 + $0xc0] ss:$8 sps:$4 sm:$0xff]   ;;  %s10123_s8 = sld [smem:[#allocation35_spill]]  ;;  %2975 = vmatprep.subr.bf16.mxu1 %v6904_v19  ;;  %v6907_v22 = vld [vmem:[#allocation5 + $0xd4] ss:$8 sps:$4 sm:$0xff]   ;;  %vm2962_vm0 = vcmask 523264  }
 0x1b4   :  { %2976 = vmatpush1.bf16.msra.mxu1 %v6906_v20  ;;  %v6909_v23 = vld [vmem:[#allocation5 + $0xd0] ss:$8 sps:$4 sm:$0xff]   ;;  %v6910_v24 = vld [vmem:[#allocation5 + $0xe4] ss:$8 sps:$4 sm:$0xff]   ;;  %v6912_v25 = vld [vmem:[#allocation5 + $0xe0] ss:$8 sps:$4 sm:$0xff]  }
 0x1b5   :  { %2977 = vmatprep.subr.bf16.mxu1 %v6907_v22  ;;  %v6913_v36 = vld [vmem:[#allocation5 + $0xf4] ss:$8 sps:$4 sm:$0xff]   ;;  %v6915_v38 = vld [vmem:[#allocation5 + $0xf0] ss:$8 sps:$4 sm:$0xff]   ;;  %v6916_v39 = vld [vmem:[#allocation5 + $0x104] ss:$8 sps:$4 sm:$0xff]  }
 0x1b6   :  { %v6918_v40 = vld [vmem:[#allocation5 + $0x100] ss:$8 sps:$4 sm:$0xff]   ;;  %v6919_v41 = vld [vmem:[#allocation5 + $0x114] ss:$8 sps:$4 sm:$0xff]   ;;  %v6921_v43 = vld [vmem:[#allocation5 + $0x110] ss:$8 sps:$4 sm:$0xff]  }
 0x1b7   :  { %v6922_v44 = vld [vmem:[#allocation5 + $0x124] ss:$8 sps:$4 sm:$0xff]   ;;  %v6924_v45 = vld [vmem:[#allocation5 + $0x120] ss:$8 sps:$4 sm:$0xff]   ;;  %v6925_v46 = vld [vmem:[#allocation5 + $0x134] ss:$8 sps:$4 sm:$0xff]  }
 0x1b8   :  { %v6864_v2 = vld [vmem:[%s10122_s17 + $0x4] ss:$8 sps:$4 sm:$0xff]   ;;  %v6866_v3 = vld [vmem:[%s10122_s17] ss:$8 sps:$4 sm:$0xff]   ;;  %v6867_v5 = vld [vmem:[%s10122_s17 + $0x14] ss:$8 sps:$4 sm:$0xff]   ;;  %2978 = vmatpush1.bf16.msra.mxu1 %v6909_v23 }
 0x1b9   :  { %2568 = vmatprep.subr.bf16.mxu0 %v6864_v2  ;;  %v6869_v6 = vld [vmem:[%s10122_s17 + $0x10] ss:$8 sps:$4 sm:$0xff]   ;;  %v6870_v7 = vld [vmem:[%s10122_s17 + $0x24] ss:$8 sps:$4 sm:$0xff]   ;;  %v6872_v8 = vld [vmem:[%s10122_s17 + $0x20] ss:$8 sps:$4 sm:$0xff]   ;;  %2979 = vmatprep.subr.bf16.mxu1 %v6910_v24 }
 0x1ba   :  { %2569 = vmatpush1.bf16.msra.mxu0 %v6866_v3  ;;  %v6873_v9 = vld [vmem:[%s10122_s17 + $0x34] ss:$8 sps:$4 sm:$0xff]   ;;  %v6875_v10 = vld [vmem:[%s10122_s17 + $0x30] ss:$8 sps:$4 sm:$0xff]   ;;  %v6876_v11 = vld [vmem:[%s10122_s17 + $0x44] ss:$8 sps:$4 sm:$0xff]  }
 0x1bb   :  { %2570 = vmatprep.subr.bf16.mxu0 %v6867_v5  ;;  %v6878_v12 = vld [vmem:[%s10122_s17 + $0x40] ss:$8 sps:$4 sm:$0xff]   ;;  %v6879_v13 = vld [vmem:[%s10122_s17 + $0x54] ss:$8 sps:$4 sm:$0xff]   ;;  %v6881_v14 = vld [vmem:[%s10122_s17 + $0x50] ss:$8 sps:$4 sm:$0xff]  }
 0x1bc   :  { %v6882_v15 = vld [vmem:[%s10122_s17 + $0x64] ss:$8 sps:$4 sm:$0xff]   ;;  %v6884_v16 = vld [vmem:[%s10122_s17 + $0x60] ss:$8 sps:$4 sm:$0xff]   ;;  %v6885_v17 = vld [vmem:[%s10122_s17 + $0x74] ss:$8 sps:$4 sm:$0xff]   ;;  %2980 = vmatpush1.bf16.msra.mxu1 %v6912_v25 }
 0x1bd   :  { %v6887_v18 = vld [vmem:[%s10122_s17 + $0x70] ss:$8 sps:$4 sm:$0xff]   ;;  %v6888_v21 = vld [vmem:[%s10123_s8] sm:$0xff]   ;;  %v6889_v26 = vld [vmem:[%s10123_s8 + $0x8] sm:$0xff]   ;;  %2981 = vmatprep.subr.bf16.mxu1 %v6913_v36  ;;  %s10124_s23 = sld [smem:[#allocation37_spill]]  ;;  %vm3813_vm1 = vcmask 1040384  }
 0x1be   :  { %2571 = vmatpush1.bf16.msra.mxu0 %v6869_v6  ;;  %v6890_v27 = vld [vmem:[%s10123_s8 + $0x10] sm:$0xff]   ;;  %v6891_v28 = vld [vmem:[%s10123_s8 + $0x18] sm:$0xff]   ;;  %v6892_v29 = vld [vmem:[%s10123_s8 + $0x20] sm:$0xff]   ;;  %s10125_s11 = sld [smem:[#allocation38_spill]]  ;;  %vm3921_vm2 = vcmask 64512  }
 0x1bf   :  { %2572 = vmatprep.subr.bf16.mxu0 %v6870_v7  ;;  %v6893_v30 = vld [vmem:[%s10123_s8 + $0x28] sm:$0xff]   ;;  %v6894_v31 = vld [vmem:[%s10123_s8 + $0x30] sm:$0xff]   ;;  %v6895_v32 = vld [vmem:[%s10123_s8 + $0x38] sm:$0xff]  }
 0x1c0   :  { %v6896_v33 = vld [vmem:[%s10123_s8 + $0x40] sm:$0xff]   ;;  %v6897_v34 = vld [vmem:[%s10123_s8 + $0x48] sm:$0xff]   ;;  %v6898_v35 = vld [vmem:[%s10123_s8 + $0x50] sm:$0xff]   ;;  %2982 = vmatpush1.bf16.msra.mxu1 %v6915_v38 }
 0x1c1   :  { %v6899_v37 = vld [vmem:[%s10123_s8 + $0x58] sm:$0xff]   ;;  %2983 = vmatprep.subr.bf16.mxu1 %v6916_v39  ;;  %v6900_v42 = vld [vmem:[%s10123_s8 + $0x60] sm:$0xff]   ;;  %v6901_v47 = vld [vmem:[%s10123_s8 + $0x68] sm:$0xff]  }
 0x1c2   :  { %2573 = vmatpush1.bf16.msra.mxu0 %v6872_v8  ;;  %v6927_v48 = vld [vmem:[#allocation5 + $0x130] ss:$8 sps:$4 sm:$0xff]   ;;  %v6928_v49 = vld [vmem:[#allocation5 + $0x144] ss:$8 sps:$4 sm:$0xff]   ;;  %v6930_v50 = vld [vmem:[#allocation5 + $0x140] ss:$8 sps:$4 sm:$0xff]  }
 0x1c3   :  { %2574 = vmatprep.subr.bf16.mxu0 %v6873_v9  ;;  %v6931_v51 = vld [vmem:[#allocation5 + $0x154] ss:$8 sps:$4 sm:$0xff]   ;;  %v6933_v53 = vld [vmem:[#allocation5 + $0x150] ss:$8 sps:$4 sm:$0xff]   ;;  %v6934_v54 = vld [vmem:[#allocation5 + $0x164] ss:$8 sps:$4 sm:$0xff]  }
 0x1c4   :  { %2984 = vmatpush1.bf16.msra.mxu1 %v6918_v40  ;;  %v6902_v52 = vld [vmem:[%s10123_s8 + $0x70] sm:$0xff]   ;;  %v6936_v55 = vld [vmem:[#allocation5 + $0x160] ss:$8 sps:$4 sm:$0xff]   ;;  %v6903_v57 = vld [vmem:[%s10123_s8 + $0x78] sm:$0xff]  }
 0x1c5   :  { %2985 = vmatprep.subr.bf16.mxu1 %v6919_v41  ;;  %v6937_v56 = vld [vmem:[#allocation5 + $0x174] ss:$8 sps:$4 sm:$0xff]   ;;  %v6939_v58 = vld [vmem:[#allocation5 + $0x170] ss:$8 sps:$4 sm:$0xff]   ;;  %v6942_v59 = vld [vmem:[#allocation5 + $0x4] ss:$8 sps:$4 sm:$0xff]  }
 0x1c6   :  { %2575 = vmatpush1.bf16.msra.mxu0 %v6875_v10  ;;  %v6951_v38 = vld [vmem:[#allocation5 + $0x34] ss:$8 sps:$4 sm:$0xff]   ;;  %v6949_v40 = vld [vmem:[#allocation5 + $0x30] ss:$8 sps:$4 sm:$0xff]  }
 0x1c7   :  { %2576 = vmatprep.subr.bf16.mxu0 %v6876_v11 }
 0x1c8   :  { %2986 = vmatpush1.bf16.msra.mxu1 %v6921_v43 }
 0x1c9   :  { %2987 = vmatprep.subr.bf16.mxu1 %v6922_v44 }
 0x1ca   :  { %2577 = vmatpush1.bf16.msra.mxu0 %v6878_v12 }
 0x1cb   :  { %2578 = vmatprep.subr.bf16.mxu0 %v6879_v13 }
 0x1cc   :  { %2988 = vmatpush1.bf16.msra.mxu1 %v6924_v45 }
 0x1cd   :  { %2989 = vmatprep.subr.bf16.mxu1 %v6925_v46 }
 0x1ce   :  { %2579 = vmatpush1.bf16.msra.mxu0 %v6881_v14 }
 0x1cf   :  { %2580 = vmatprep.subr.bf16.mxu0 %v6882_v15 }
 0x1d0   :  { %2990 = vmatpush1.bf16.msra.mxu1 %v6927_v48  ;;  %v6957_v48 = vld [vmem:[#allocation5 + $0x54] ss:$8 sps:$4 sm:$0xff]  }
 0x1d1   :  { %2991 = vmatprep.subr.bf16.mxu1 %v6928_v49 }
 0x1d2   :  { %2581 = vmatpush1.bf16.msra.mxu0 %v6884_v16 }
 0x1d3   :  { %2582 = vmatprep.subr.bf16.mxu0 %v6885_v17 }
 0x1d4   :  { %2992 = vmatpush1.bf16.msra.mxu1 %v6930_v50  ;;  %v6955_v50 = vld [vmem:[#allocation5 + $0x50] ss:$8 sps:$4 sm:$0xff]  }
 0x1d5   :  { %2993 = vmatprep.subr.bf16.mxu1 %v6931_v51 }
 0x1d6   :  { %2583 = vmatpush1.bf16.msra.mxu0 %v6887_v18 }
 0x1d8   :  { %2994 = vmatpush1.bf16.msra.mxu1 %v6933_v53 }
 0x1d9   :  { %2601 = vmatmul.mubr.bf16.vlgmr.msra.gmra.mrb[0].mxu0 %v6888_v21  ;;  %2995 = vmatprep.subr.bf16.mxu1 %v6934_v54 }
 0x1da   :  { %2610 = vmatprep.mubr.bf16.mxu0 %v7369_v4 }
 0x1dc   :  { %2996 = vmatpush1.bf16.msra.mxu1 %v6936_v55 }
 0x1dd   :  { %2997 = vmatprep.subr.bf16.mxu1 %v6937_v56 }
 0x1e0   :  { %2998 = vmatpush1.bf16.msra.mxu1 %v6939_v58  ;;  %v6963_v58 = vld [vmem:[#allocation5 + $0x74] ss:$8 sps:$4 sm:$0xff]  }
 0x1e1   :  { %2611 = vmatmul.mubr.bf16.gmra.mrb[4].mxu0 %v6889_v26  ;;  %3180 = vmatprep.subr.bf16.mxu1 %v6942_v59  ;;  %v6961_v59 = vld [vmem:[#allocation5 + $0x70] ss:$8 sps:$4 sm:$0xff]  }
 0x1e2   :  { %2620 = vmatprep.mubr.bf16.mxu0 %v7369_v4 }
 0x1e9   :  { %2621 = vmatmul.mubr.bf16.gmra.mrb[8].mxu0 %v6890_v27  ;;  %v6940_v27 = vld [vmem:[#allocation5] ss:$8 sps:$4 sm:$0xff]  }
 0x1ea   :  { %2630 = vmatprep.mubr.bf16.mxu0 %v7369_v4 }
 0x1f1   :  { %2631 = vmatmul.mubr.bf16.gmra.mrb[12].mxu0 %v6891_v28  ;;  %v6945_v28 = vld [vmem:[#allocation5 + $0x14] ss:$8 sps:$4 sm:$0xff]  }
 0x1f2   :  { %2640 = vmatprep.mubr.bf16.mxu0 %v7369_v4 }
 0x1f9   :  { %2641 = vmatmul.mubr.bf16.gmra.mrb[16].mxu0 %v6892_v29 }
 0x1fa   :  { %2650 = vmatprep.mubr.bf16.mxu0 %v7369_v4 }
 0x201   :  { %2651 = vmatmul.mubr.bf16.gmra.mrb[20].mxu0 %v6893_v30  ;;  %v6943_v30 = vld [vmem:[#allocation5 + $0x10] ss:$8 sps:$4 sm:$0xff]  }
 0x202   :  { %2660 = vmatprep.mubr.bf16.mxu0 %v7369_v4 }
 0x209   :  { %2661 = vmatmul.mubr.bf16.gmra.mrb[24].mxu0 %v6894_v31 }
 0x20a   :  { %2670 = vmatprep.mubr.bf16.mxu0 %v7369_v4 }
 0x211   :  { %2671 = vmatmul.mubr.bf16.gmra.mrb[28].mxu0 %v6895_v32  ;;  %v6948_v32 = vld [vmem:[#allocation5 + $0x24] ss:$8 sps:$4 sm:$0xff]  }
 0x212   :  { %2680 = vmatprep.mubr.bf16.mxu0 %v7369_v4 }
 0x219   :  { %2681 = vmatmul.mubr.bf16.gmra.mrb[32].mxu0 %v6896_v33 }
 0x21a   :  { %2690 = vmatprep.mubr.bf16.mxu0 %v7369_v4 }
 0x221   :  { %2691 = vmatmul.mubr.bf16.gmra.mrb[36].mxu0 %v6897_v34 }
 0x222   :  { %2700 = vmatprep.mubr.bf16.mxu0 %v7369_v4 }
 0x229   :  { %2701 = vmatmul.mubr.bf16.gmra.mrb[40].mxu0 %v6898_v35 }
 0x22a   :  { %2710 = vmatprep.mubr.bf16.mxu0 %v7369_v4 }
 0x231   :  { %2711 = vmatmul.mubr.bf16.gmra.mrb[44].mxu0 %v6899_v37  ;;  %v6946_v37 = vld [vmem:[#allocation5 + $0x20] ss:$8 sps:$4 sm:$0xff]  }
 0x232   :  { %2720 = vmatprep.mubr.bf16.mxu0 %v7369_v4 }
 0x239   :  { %2721 = vmatmul.mubr.bf16.gmra.mrb[48].mxu0 %v6900_v42  ;;  %v6954_v42 = vld [vmem:[#allocation5 + $0x44] ss:$8 sps:$4 sm:$0xff]  }
 0x23a   :  { %2730 = vmatprep.mubr.bf16.mxu0 %v7369_v4 }
 0x241   :  { %2731 = vmatmul.mubr.bf16.gmra.mrb[52].mxu0 %v6901_v47  ;;  %v6952_v47 = vld [vmem:[#allocation5 + $0x40] ss:$8 sps:$4 sm:$0xff]  }
 0x242   :  { %2740 = vmatprep.mubr.bf16.mxu0 %v7369_v4 }
 0x249   :  { %2741 = vmatmul.mubr.bf16.gmra.mrb[56].mxu0 %v6902_v52  ;;  %v6960_v52 = vld [vmem:[#allocation5 + $0x64] ss:$8 sps:$4 sm:$0xff]  }
 0x24a   :  { %2750 = vmatprep.mubr.bf16.mxu0 %v7369_v4 }
 0x251   :  { %2751 = vmatmul.mubr.bf16.gmra.mrb[60].mxu0 %v6903_v57  ;;  %v6958_v57 = vld [vmem:[#allocation5 + $0x60] ss:$8 sps:$4 sm:$0xff]  }
 0x2ac   :  { %v8898_v60 = vpop.f32.mrb[0].mxu0 }
 0x2ad   :  { %v8900_v61 = vpop.f32.mrb[1].mxu0 }
 0x2ae   :  { %v8902_v62 = vpop.f32.mrb[2].mxu0 }
 0x2af   :  { %v2761_v63 = vpack.c.bf16 %v8902_v62, %v8898_v60  ;;  %v8906_v0 = vpop.f32.mrb[3].mxu0  ;;  %v3823_v60 = vld [vmem:[%s10124_s23 + $0x38] sm:$0xff]  ;;  %v6984_v62 = vld [vmem:[#allocation5 + $0x1a4] ss:$8 sps:$4 sm:$0xff]  }
 0x2b0   :  { %v2762_v1 = vpack.c.bf16 %v8906_v0, %v8900_v61  ;;  %v6969_v0 = vld [vmem:[#allocation5 + $0x94] ss:$8 sps:$4 sm:$0xff]  }
 0x2b4   :  { %v8910_v2 = vpop.f32.mrb[4].mxu0 }
 0x2b5   :  { %v8912_v3 = vpop.f32.mrb[5].mxu0 }
 0x2b6   :  { %v8914_v5 = vpop.f32.mrb[6].mxu0 }
 0x2b7   :  { %v2763_v6 = vpack.c.bf16 %v8914_v5, %v8910_v2  ;;  %v8918_v7 = vpop.f32.mrb[7].mxu0  ;;  %v3827_v2 = vld [vmem:[%s10124_s23 + $0x58] sm:$0xff]  ;;  %v6990_v5 = vld [vmem:[#allocation5 + $0x1c4] ss:$8 sps:$4 sm:$0xff]  }
 0x2b8   :  { %v2764_v8 = vpack.c.bf16 %v8918_v7, %v8912_v3  ;;  %v3840_v7 = vld [vmem:[%s10124_s23 + $0xc0] sm:$0xff] }
 0x2bc   :  { %v8922_v9 = vpop.f32.mrb[8].mxu0 }
 0x2bd   :  { %v8924_v10 = vpop.f32.mrb[9].mxu0 }
 0x2be   :  { %v8926_v11 = vpop.f32.mrb[10].mxu0 }
 0x2bf   :  { %v2765_v12 = vpack.c.bf16 %v8926_v11, %v8922_v9  ;;  %v8930_v13 = vpop.f32.mrb[11].mxu0 }
 0x2c0   :  { %v2766_v14 = vpack.c.bf16 %v8930_v13, %v8924_v10 }
 0x2c4   :  { %v8934_v15 = vpop.f32.mrb[12].mxu0 }
 0x2c5   :  { %v8936_v16 = vpop.f32.mrb[13].mxu0 }
 0x2c6   :  { %v8938_v17 = vpop.f32.mrb[14].mxu0 }
 0x2c7   :  { %v2767_v18 = vpack.c.bf16 %v8938_v17, %v8934_v15  ;;  %v8942_v19 = vpop.f32.mrb[15].mxu0  ;;  %v7000_v17 = vld [vmem:[#allocation5 + $0x200] ss:$8 sps:$4 sm:$0xff]  }
 0x2c8   :  { %v2768_v20 = vpack.c.bf16 %v8942_v19, %v8936_v16  ;;  %v6999_v19 = vld [vmem:[#allocation5 + $0x1f4] ss:$8 sps:$4 sm:$0xff]  }
 0x2cc   :  { %v2642_v21 = vpop.f32.mrb[16].mxu0 }
 0x2cd   :  { %v2644_v22 = vpop.f32.mrb[17].mxu0 }
 0x2ce   :  { %v2646_v23 = vpop.f32.mrb[18].mxu0 }
 0x2cf   :  { %v2769_v24 = vpack.c.bf16 %v2646_v23, %v2642_v21  ;;  %v2648_v25 = vpop.f32.mrb[19].mxu0 }
 0x2d0   :  { %v2770_v26 = vpack.c.bf16 %v2648_v25, %v2644_v22  ;;  %v6966_v22 = vld [vmem:[#allocation5 + $0x84] ss:$8 sps:$4 sm:$0xff]  }
 0x2d2   :  { %6338 = vmatprep.mubr.msk.bf16.mxu1 %vm2962_vm0, %v2770_v26 }
 0x2d3   :  { %3008 = vmatmul.mubr.bf16.vlgmr.msra.gmra.mrb[0].mxu1 %v2769_v24 }
 0x2d4   :  { %3181 = vmatpush1.bf16.msra.mxu1 %v6940_v27  ;;  %v2652_v29 = vpop.f32.mrb[20].mxu0  ;;  %v6964_v27 = vld [vmem:[#allocation5 + $0x80] ss:$8 sps:$4 sm:$0xff]  }
 0x2d5   :  { %v2654_v31 = vpop.f32.mrb[21].mxu0  ;;  %3182 = vmatprep.subr.bf16.mxu1 %v6945_v28 }
 0x2d6   :  { %v2656_v33 = vpop.f32.mrb[22].mxu0 }
 0x2d7   :  { %v2771_v34 = vpack.c.bf16 %v2656_v33, %v2652_v29  ;;  %v2658_v35 = vpop.f32.mrb[23].mxu0  ;;  %v6972_v29 = vld [vmem:[#allocation5 + $0xa4] ss:$8 sps:$4 sm:$0xff]  }
 0x2d8   :  { %v2772_v36 = vpack.c.bf16 %v2658_v35, %v2654_v31  ;;  %3183 = vmatpush1.bf16.msra.mxu1 %v6943_v30 }
 0x2d9   :  { %3184 = vmatprep.subr.bf16.mxu1 %v6948_v32 }
 0x2da   :  { %6339 = vmatprep.mubr.msk.bf16.mxu1 %vm2962_vm0, %v2772_v36  ;;  %v6975_v36 = vld [vmem:[#allocation5 + $0xb4] ss:$8 sps:$4 sm:$0xff]  }
 0x2db   :  { %3018 = vmatmul.mubr.bf16.gmra.mrb[4].mxu1 %v2771_v34  ;;  %v6970_v34 = vld [vmem:[#allocation5 + $0xa0] ss:$8 sps:$4 sm:$0xff]  }
 0x2dc   :  { %3185 = vmatpush1.bf16.msra.mxu1 %v6946_v37  ;;  %v2662_v39 = vpop.f32.mrb[24].mxu0  ;;  %v6973_v37 = vld [vmem:[#allocation5 + $0xb0] ss:$8 sps:$4 sm:$0xff]  }
 0x2dd   :  { %v2664_v41 = vpop.f32.mrb[25].mxu0  ;;  %3186 = vmatprep.subr.bf16.mxu1 %v6951_v38  ;;  %v3832_v38 = vld [vmem:[%s10124_s23 + $0x80] sm:$0xff] }
 0x2de   :  { %v2666_v43 = vpop.f32.mrb[26].mxu0 }
 0x2df   :  { %v2773_v44 = vpack.c.bf16 %v2666_v43, %v2662_v39  ;;  %v2668_v45 = vpop.f32.mrb[27].mxu0  ;;  %v3833_v39 = vld [vmem:[%s10124_s23 + $0x88] sm:$0xff] }
 0x2e0   :  { %v2774_v46 = vpack.c.bf16 %v2668_v45, %v2664_v41  ;;  %3187 = vmatpush1.bf16.msra.mxu1 %v6949_v40  ;;  %v3816_v40 = vld [vmem:[%s10124_s23] sm:$0xff]  ;;  %v3817_v43 = vld [vmem:[%s10124_s23 + $0x8] sm:$0xff]  ;;  %v3835_v45 = vld [vmem:[%s10124_s23 + $0x98] sm:$0xff] }
 0x2e1   :  { %3188 = vmatprep.subr.bf16.mxu1 %v6954_v42  ;;  %v6656_v42 = vpack.c.bf16 %v3833_v39, %v3832_v38 }
 0x2e2   :  { %6340 = vmatprep.mubr.msk.bf16.mxu1 %vm2962_vm0, %v2774_v46  ;;  %v6978_v46 = vld [vmem:[#allocation5 + $0x184] ss:$8 sps:$4 sm:$0xff]  }
 0x2e3   :  { %3028 = vmatmul.mubr.bf16.gmra.mrb[8].mxu1 %v2773_v44  ;;  %v3834_v44 = vld [vmem:[%s10124_s23 + $0x90] sm:$0xff]  ;;  %6657 = vmatprep.subr.bf16.mxu0 %v6656_v42 }
 0x2e4   :  { %3189 = vmatpush1.bf16.msra.mxu1 %v6952_v47  ;;  %v2672_v49 = vpop.f32.mrb[28].mxu0 }
 0x2e5   :  { %v2674_v51 = vpop.f32.mrb[29].mxu0  ;;  %3190 = vmatprep.subr.bf16.mxu1 %v6957_v48  ;;  %v6658_v48 = vpack.c.bf16 %v3817_v43, %v3816_v40  ;;  %v3822_v40 = vld [vmem:[%s10124_s23 + $0x30] sm:$0xff] }
 0x2e6   :  { %v2676_v53 = vpop.f32.mrb[30].mxu0 }
 0x2e7   :  { %v2775_v54 = vpack.c.bf16 %v2676_v53, %v2672_v49  ;;  %v2678_v55 = vpop.f32.mrb[31].mxu0  ;;  %v6660_v49 = vpack.c.bf16 %v3835_v45, %v3834_v44  ;;  %v3836_v53 = vld [vmem:[%s10124_s23 + $0xa0] sm:$0xff]  ;;  %6659 = vmatpush3.bf16.msra.mxu0 %v6658_v48  ;;  %v6670_v44 = vpack.c.bf16 %v3823_v60, %v3822_v40 }
 0x2e8   :  { %v2776_v56 = vpack.c.bf16 %v2678_v55, %v2674_v51  ;;  %3191 = vmatpush1.bf16.msra.mxu1 %v6955_v50  ;;  %v3818_v50 = vld [vmem:[%s10124_s23 + $0x10] sm:$0xff]  ;;  %v3819_v51 = vld [vmem:[%s10124_s23 + $0x18] sm:$0xff]  ;;  %v6982_v45 = vld [vmem:[#allocation5 + $0x1a0] ss:$8 sps:$4 sm:$0xff]  }
 0x2e9   :  { %3192 = vmatprep.subr.bf16.mxu1 %v6960_v52  ;;  %6661 = vmatprep.subr.bf16.mxu0 %v6660_v49  ;;  %v3824_v48 = vld [vmem:[%s10124_s23 + $0x40] sm:$0xff]  ;;  %v3825_v49 = vld [vmem:[%s10124_s23 + $0x48] sm:$0xff] }
 0x2ea   :  { %6341 = vmatprep.mubr.msk.bf16.mxu1 %vm2962_vm0, %v2776_v56  ;;  %v6996_v40 = vld [vmem:[#allocation5 + $0x1e4] ss:$8 sps:$4 sm:$0xff]  }
 0x2eb   :  { %3038 = vmatmul.mubr.bf16.gmra.mrb[12].mxu1 %v2775_v54  ;;  %v3837_v54 = vld [vmem:[%s10124_s23 + $0xa8] sm:$0xff] }
 0x2ec   :  { %3193 = vmatpush1.bf16.msra.mxu1 %v6958_v57  ;;  %6366 = vmatprep.mubr.msk.bf16.mxu1 %vm2962_vm0, %v2762_v1  ;;  %v8954_v21 = vpop.f32.mrb[32].mxu0  ;;  %v6967_v1 = vld [vmem:[#allocation5 + $0x90] ss:$8 sps:$4 sm:$0xff]   ;;  %v6662_v57 = vpack.c.bf16 %v3819_v51, %v3818_v50  ;;  %v6987_v50 = vld [vmem:[#allocation5 + $0x1b4] ss:$8 sps:$4 sm:$0xff]  }
 0x2ed   :  { %3194 = vmatprep.subr.bf16.mxu1 %v6963_v58  ;;  %v8956_v23 = vpop.f32.mrb[33].mxu0  ;;  %v6976_v58 = vld [vmem:[#allocation5 + $0x180] ss:$8 sps:$4 sm:$0xff]  }
 0x2ee   :  { %v8958_v24 = vpop.f32.mrb[34].mxu0  ;;  %6663 = vmatpush3.bf16.msra.mxu0 %v6662_v57  ;;  %v6674_v57 = vpack.c.bf16 %v3825_v49, %v3824_v48  ;;  %v7008_v49 = vld [vmem:[#allocation5 + $0x224] ss:$8 sps:$4 sm:$0xff]  }
 0x2ef   :  { %v2777_v25 = vpack.c.bf16 %v8958_v24, %v8954_v21  ;;  %v8962_v26 = vpop.f32.mrb[35].mxu0  ;;  %v7021_v21 = vld [vmem:[#allocation5 + $0x270] ss:$8 sps:$4 sm:$0xff]   ;;  %v7026_v24 = vld [vmem:[#allocation5 + $0x284] ss:$8 sps:$4 sm:$0xff]  }
 0x2f0   :  { %3195 = vmatpush1.bf16.msra.mxu1 %v6961_v59  ;;  %v2778_v61 = vpack.c.bf16 %v8962_v26, %v8956_v23  ;;  %v7005_v23 = vld [vmem:[#allocation5 + $0x214] ss:$8 sps:$4 sm:$0xff]   ;;  %v7003_v26 = vld [vmem:[#allocation5 + $0x210] ss:$8 sps:$4 sm:$0xff]  }
 0x2f1   :  { %3196 = vmatprep.subr.bf16.mxu1 %v6966_v22  ;;  %v3820_v22 = vld [vmem:[%s10124_s23 + $0x20] sm:$0xff] }
 0x2f4   :  { %3197 = vmatpush1.bf16.msra.mxu1 %v6964_v27  ;;  %v8966_v28 = vpop.f32.mrb[36].mxu0  ;;  %v3821_v27 = vld [vmem:[%s10124_s23 + $0x28] sm:$0xff] }
 0x2f5   :  { %3198 = vmatprep.subr.bf16.mxu1 %v6969_v0  ;;  %v8968_v30 = vpop.f32.mrb[37].mxu0  ;;  %v6981_v0 = vld [vmem:[#allocation5 + $0x194] ss:$8 sps:$4 sm:$0xff]  }
 0x2f6   :  { %v8970_v31 = vpop.f32.mrb[38].mxu0 }
 0x2f7   :  { %v2779_v32 = vpack.c.bf16 %v8970_v31, %v8966_v28  ;;  %v8974_v33 = vpop.f32.mrb[39].mxu0  ;;  %v7027_v28 = vld [vmem:[#allocation5 + $0x290] ss:$8 sps:$4 sm:$0xff]   ;;  %v7032_v31 = vld [vmem:[#allocation5 + $0x2a4] ss:$8 sps:$4 sm:$0xff]  }
 0x2f8   :  { %3199 = vmatpush1.bf16.msra.mxu1 %v6967_v1  ;;  %v2780_v35 = vpack.c.bf16 %v8974_v33, %v8968_v30  ;;  %v6664_v1 = vpack.c.bf16 %v3837_v54, %v3836_v53  ;;  %v3842_v53 = vld [vmem:[%s10124_s23 + $0xd0] sm:$0xff]  ;;  %v3843_v54 = vld [vmem:[%s10124_s23 + $0xd8] sm:$0xff] }
 0x2f9   :  { %3200 = vmatprep.subr.bf16.mxu1 %v6972_v29  ;;  %v3838_v29 = vld [vmem:[%s10124_s23 + $0xb0] sm:$0xff] }
 0x2fa   :  { %6665 = vmatprep.subr.bf16.mxu0 %v6664_v1  ;;  %v7029_v30 = vld [vmem:[#allocation5 + $0x294] ss:$8 sps:$4 sm:$0xff]  }
 0x2fb   :  { %v7035_v33 = vld [vmem:[#allocation5 + $0x2b4] ss:$8 sps:$4 sm:$0xff]  }
 0x2fc   :  { %3201 = vmatpush1.bf16.msra.mxu1 %v6970_v34  ;;  %v8987_v41 = vpop.f32.mrb[40].mxu0  ;;  %v3839_v34 = vld [vmem:[%s10124_s23 + $0xb8] sm:$0xff] }
 0x2fd   :  { %3202 = vmatprep.subr.bf16.mxu1 %v6975_v36  ;;  %v8998_v47 = vpop.f32.mrb[41].mxu0  ;;  %v6666_v36 = vpack.c.bf16 %v3821_v27, %v3820_v22  ;;  %v6668_v39 = vpack.c.bf16 %v3839_v34, %v3838_v29  ;;  %v6676_v27 = vpack.c.bf16 %v3843_v54, %v3842_v53  ;;  %v6988_v29 = vld [vmem:[#allocation5 + $0x1c0] ss:$8 sps:$4 sm:$0xff]  }
 0x2fe   :  { %v9006_v52 = vpop.f32.mrb[42].mxu0 }
 0x2ff   :  { %v2781_v55 = vpack.c.bf16 %v9006_v52, %v8987_v41  ;;  %v9016_v56 = vpop.f32.mrb[43].mxu0  ;;  %6667 = vmatpush3.bf16.msra.mxu0 %v6666_v36  ;;  %v6993_v36 = vld [vmem:[#allocation5 + $0x1d4] ss:$8 sps:$4 sm:$0xff]   ;;  %v7038_v41 = vld [vmem:[#allocation5 + $0x2c4] ss:$8 sps:$4 sm:$0xff]  }
 0x300   :  { %3203 = vmatpush1.bf16.msra.mxu1 %v6973_v37  ;;  %v2782_v59 = vpack.c.bf16 %v9016_v56, %v8998_v47  ;;  %v6979_v37 = vld [vmem:[#allocation5 + $0x190] ss:$8 sps:$4 sm:$0xff]   ;;  %6669 = vmatprep.subr.bf16.mxu0 %v6668_v39  ;;  %v7036_v47 = vld [vmem:[#allocation5 + $0x2c0] ss:$8 sps:$4 sm:$0xff]   ;;  %v7041_v52 = vld [vmem:[#allocation5 + $0x2d4] ss:$8 sps:$4 sm:$0xff]  }
 0x301   :  { %3410 = vmatprep.subr.bf16.mxu1 %v6978_v46  ;;  %v7044_v56 = vld [vmem:[#allocation5 + $0x2e4] ss:$8 sps:$4 sm:$0xff]  }
 0x303   :  { %3213 = vmatmul.mubr.bf16.vlgmr.msra.gmra.mrb[0].mxu1 %v2761_v63  ;;  %6671 = vmatpush3.bf16.msra.mxu0 %v6670_v44 }
 0x304   :  { %6367 = vmatprep.mubr.msk.bf16.mxu1 %vm2962_vm0, %v2764_v8  ;;  %3411 = vmatpush1.bf16.msra.mxu1 %v6976_v58  ;;  %v9039_v38 = vpop.f32.mrb[44].mxu0  ;;  %v3841_v8 = vld [vmem:[%s10124_s23 + $0xc8] sm:$0xff]  ;;  %v6985_v58 = vld [vmem:[#allocation5 + $0x1b0] ss:$8 sps:$4 sm:$0xff]  }
 0x305   :  { %3412 = vmatprep.subr.bf16.mxu1 %v6981_v0  ;;  %v9047_v63 = vpop.f32.mrb[45].mxu0  ;;  %v6672_v51 = vpack.c.bf16 %v3841_v8, %v3840_v7  ;;  %v3826_v0 = vld [vmem:[%s10124_s23 + $0x50] sm:$0xff]  ;;  %v7002_v8 = vld [vmem:[#allocation5 + $0x204] ss:$8 sps:$4 sm:$0xff]  }
 0x306   :  { %v9049_v3 = vpop.f32.mrb[46].mxu0  ;;  %v6678_v1 = vpack.c.bf16 %v3827_v2, %v3826_v0  ;;  %v7009_v0 = vld [vmem:[#allocation5 + $0x230] ss:$8 sps:$4 sm:$0xff]   ;;  %v7014_v2 = vld [vmem:[#allocation5 + $0x244] ss:$8 sps:$4 sm:$0xff]  }
 0x307   :  { %v2783_v42 = vpack.c.bf16 %v9049_v3, %v9039_v38  ;;  %v9059_v43 = vpop.f32.mrb[47].mxu0  ;;  %6673 = vmatprep.subr.bf16.mxu0 %v6672_v51  ;;  %v7047_v38 = vld [vmem:[#allocation5 + $0x2f4] ss:$8 sps:$4 sm:$0xff]   ;;  %v3844_v3 = vld [vmem:[%s10124_s23 + $0xe0] sm:$0xff] }
 0x308   :  { %3413 = vmatpush1.bf16.msra.mxu1 %v6979_v37  ;;  %v2784_v46 = vpack.c.bf16 %v9059_v43, %v9047_v63  ;;  %6675 = vmatpush3.bf16.msra.mxu0 %v6674_v57  ;;  %v6991_v37 = vld [vmem:[#allocation5 + $0x1d0] ss:$8 sps:$4 sm:$0xff]   ;;  %v7006_v57 = vld [vmem:[#allocation5 + $0x220] ss:$8 sps:$4 sm:$0xff]  }
 0x309   :  { %3414 = vmatprep.subr.bf16.mxu1 %v6984_v62  ;;  %6677 = vmatprep.subr.bf16.mxu0 %v6676_v27  ;;  %v7011_v27 = vld [vmem:[#allocation5 + $0x234] ss:$8 sps:$4 sm:$0xff]   ;;  %v7045_v63 = vld [vmem:[#allocation5 + $0x2f0] ss:$8 sps:$4 sm:$0xff]   ;;  %v3828_v43 = vld [vmem:[%s10124_s23 + $0x60] sm:$0xff] }
 0x30b   :  { %3223 = vmatmul.mubr.bf16.gmra.mrb[4].mxu1 %v2763_v6 }
 0x30c   :  { %6368 = vmatprep.mubr.msk.bf16.mxu1 %vm2962_vm0, %v2766_v14  ;;  %3415 = vmatpush1.bf16.msra.mxu1 %v6982_v45  ;;  %v9082_v22 = vpop.f32.mrb[48].mxu0 }
 0x30d   :  { %3416 = vmatprep.subr.bf16.mxu1 %v6987_v50  ;;  %v9090_v6 = vpop.f32.mrb[49].mxu0  ;;  %6679 = vmatpush3.bf16.msra.mxu0 %v6678_v1  ;;  %v7017_v1 = vld [vmem:[#allocation5 + $0x254] ss:$8 sps:$4 sm:$0xff]  }
 0x30e   :  { %v9092_v10 = vpop.f32.mrb[50].mxu0 }
 0x30f   :  { %v2785_v13 = vpack.c.bf16 %v9092_v10, %v9082_v22  ;;  %v9096_v14 = vpop.f32.mrb[51].mxu0  ;;  %v3829_v22 = vld [vmem:[%s10124_s23 + $0x68] sm:$0xff]  ;;  %v3846_v10 = vld [vmem:[%s10124_s23 + $0xf0] sm:$0xff] }
 0x310   :  { %3417 = vmatpush1.bf16.msra.mxu1 %v6985_v58  ;;  %v2786_v34 = vpack.c.bf16 %v9096_v14, %v9090_v6  ;;  %v6682_v6 = vpack.c.bf16 %v3829_v22, %v3828_v43  ;;  %v3830_v14 = vld [vmem:[%s10124_s23 + $0x70] sm:$0xff] }
 0x311   :  { %3418 = vmatprep.subr.bf16.mxu1 %v6990_v5  ;;  %v7012_v5 = vld [vmem:[#allocation5 + $0x240] ss:$8 sps:$4 sm:$0xff]  }
 0x313   :  { %3233 = vmatmul.mubr.bf16.gmra.mrb[8].mxu1 %v2765_v12  ;;  %v6994_v12 = vld [vmem:[#allocation5 + $0x1e0] ss:$8 sps:$4 sm:$0xff]  }
 0x314   :  { %6369 = vmatprep.mubr.msk.bf16.mxu1 %vm2962_vm0, %v2768_v20  ;;  %3419 = vmatpush1.bf16.msra.mxu1 %v6988_v29  ;;  %v9107_v39 = vpop.f32.mrb[52].mxu0  ;;  %v6997_v20 = vld [vmem:[#allocation5 + $0x1f0] ss:$8 sps:$4 sm:$0xff]  }
 0x315   :  { %3420 = vmatprep.subr.bf16.mxu1 %v6993_v36  ;;  %v9109_v60 = vpop.f32.mrb[53].mxu0  ;;  %v7015_v29 = vld [vmem:[#allocation5 + $0x250] ss:$8 sps:$4 sm:$0xff]   ;;  %v7020_v36 = vld [vmem:[#allocation5 + $0x264] ss:$8 sps:$4 sm:$0xff]  }
 0x316   :  { %v9111_v62 = vpop.f32.mrb[54].mxu0 }
 0x317   :  { %v2787_v9 = vpack.c.bf16 %v9111_v62, %v9107_v39  ;;  %v9115_v11 = vpop.f32.mrb[55].mxu0  ;;  %v3831_v39 = vld [vmem:[%s10124_s23 + $0x78] sm:$0xff] }
 0x318   :  { %3421 = vmatpush1.bf16.msra.mxu1 %v6991_v37  ;;  %v2788_v16 = vpack.c.bf16 %v9115_v11, %v9109_v60  ;;  %v7018_v37 = vld [vmem:[#allocation5 + $0x260] ss:$8 sps:$4 sm:$0xff]   ;;  %v6686_v60 = vpack.c.bf16 %v3831_v39, %v3830_v14 }
 0x319   :  { %3422 = vmatprep.subr.bf16.mxu1 %v6996_v40  ;;  %v7023_v40 = vld [vmem:[#allocation5 + $0x274] ss:$8 sps:$4 sm:$0xff]  }
 0x31b   :  { %3243 = vmatmul.mubr.bf16.gmra.mrb[12].mxu1 %v2767_v18 }
 0x31c   :  { %3423 = vmatpush1.bf16.msra.mxu1 %v6994_v12  ;;  %6394 = vmatprep.mubr.msk.bf16.mxu1 %vm2962_vm0, %v2778_v61  ;;  %v9126_v7 = vpop.f32.mrb[56].mxu0 }
 0x31d   :  { %3424 = vmatprep.subr.bf16.mxu1 %v6999_v19  ;;  %v9128_v44 = vpop.f32.mrb[57].mxu0 }
 0x31e   :  { %v9130_v45 = vpop.f32.mrb[58].mxu0 }
 0x31f   :  { %v2789_v48 = vpack.c.bf16 %v9130_v45, %v9126_v7  ;;  %v9134_v15 = vpop.f32.mrb[59].mxu0 }
 0x320   :  { %3425 = vmatpush1.bf16.msra.mxu1 %v6997_v20  ;;  %v2790_v18 = vpack.c.bf16 %v9134_v15, %v9128_v44 }
 0x321   :  { %3426 = vmatprep.subr.bf16.mxu1 %v7002_v8 }
 0x324   :  { %3427 = vmatpush1.bf16.msra.mxu1 %v7000_v17  ;;  %v9138_v61 = vpop.f32.mrb[60].mxu0 }
 0x325   :  { %3428 = vmatprep.subr.bf16.mxu1 %v7005_v23  ;;  %v9140_v50 = vpop.f32.mrb[61].mxu0 }
 0x326   :  { %v9142_v51 = vpop.f32.mrb[62].mxu0 }
 0x327   :  { %v2791_v53 = vpack.c.bf16 %v9142_v51, %v9138_v61  ;;  %v9146_v54 = vpop.f32.mrb[63].mxu0 }
 0x328   :  { %3429 = vmatpush1.bf16.msra.mxu1 %v7003_v26  ;;  %v2792_v58 = vpack.c.bf16 %v9146_v54, %v9140_v50 }
 0x329   :  { %3430 = vmatprep.subr.bf16.mxu1 %v7008_v49 }
 0x32c   :  { %3431 = vmatpush1.bf16.msra.mxu1 %v7006_v57 }
 0x32d   :  { %3432 = vmatprep.subr.bf16.mxu1 %v7011_v27 }
 0x330   :  { %3433 = vmatpush1.bf16.msra.mxu1 %v7009_v0 }
 0x331   :  { %3656 = vmatprep.subr.bf16.mxu1 %v7014_v2 }
 0x333   :  { %3443 = vmatmul.mubr.bf16.vlgmr.msra.gmra.mrb[0].mxu1 %v2777_v25  ;;  %v7024_v25 = vld [vmem:[#allocation5 + $0x280] ss:$8 sps:$4 sm:$0xff]  }
 0x334   :  { %3657 = vmatpush1.bf16.msra.mxu1 %v7012_v5  ;;  %6395 = vmatprep.mubr.msk.bf16.mxu1 %vm2962_vm0, %v2780_v35  ;;  %v7033_v35 = vld [vmem:[#allocation5 + $0x2b0] ss:$8 sps:$4 sm:$0xff]  }
 0x335   :  { %3658 = vmatprep.subr.bf16.mxu1 %v7017_v1 }
 0x338   :  { %3659 = vmatpush1.bf16.msra.mxu1 %v7015_v29 }
 0x339   :  { %3660 = vmatprep.subr.bf16.mxu1 %v7020_v36 }
 0x33b   :  { %3453 = vmatmul.mubr.bf16.gmra.mrb[4].mxu1 %v2779_v32  ;;  %v7030_v32 = vld [vmem:[#allocation5 + $0x2a0] ss:$8 sps:$4 sm:$0xff]  }
 0x33c   :  { %3661 = vmatpush1.bf16.msra.mxu1 %v7018_v37  ;;  %6396 = vmatprep.mubr.msk.bf16.mxu1 %vm2962_vm0, %v2782_v59  ;;  %v7042_v59 = vld [vmem:[#allocation5 + $0x2e0] ss:$8 sps:$4 sm:$0xff]  }
 0x33d   :  { %3662 = vmatprep.subr.bf16.mxu1 %v7023_v40 }
 0x340   :  { %3663 = vmatpush1.bf16.msra.mxu1 %v7021_v21 }
 0x341   :  { %3664 = vmatprep.subr.bf16.mxu1 %v7026_v24 }
 0x343   :  { %3463 = vmatmul.mubr.bf16.gmra.mrb[8].mxu1 %v2781_v55  ;;  %v7039_v55 = vld [vmem:[#allocation5 + $0x2d0] ss:$8 sps:$4 sm:$0xff]  }
 0x344   :  { %3665 = vmatpush1.bf16.msra.mxu1 %v7024_v25  ;;  %6397 = vmatprep.mubr.msk.bf16.mxu1 %vm2962_vm0, %v2784_v46 }
 0x345   :  { %3666 = vmatprep.subr.bf16.mxu1 %v7029_v30 }
 0x348   :  { %3667 = vmatpush1.bf16.msra.mxu1 %v7027_v28 }
 0x349   :  { %3668 = vmatprep.subr.bf16.mxu1 %v7032_v31 }
 0x34b   :  { %3473 = vmatmul.mubr.bf16.gmra.mrb[12].mxu1 %v2783_v42  ;;  %v3845_v42 = vld [vmem:[%s10124_s23 + $0xe8] sm:$0xff] }
 0x34c   :  { %3669 = vmatpush1.bf16.msra.mxu1 %v7030_v32  ;;  %6422 = vmatprep.mubr.msk.bf16.mxu1 %vm2962_vm0, %v2786_v34  ;;  %v6680_v46 = vpack.c.bf16 %v3845_v42, %v3844_v3 }
 0x34d   :  { %3670 = vmatprep.subr.bf16.mxu1 %v7035_v33 }
 0x34e   :  { %6681 = vmatprep.subr.bf16.mxu0 %v6680_v46 }
 0x34f   :  { %6683 = vmatpush3.bf16.msra.mxu0 %v6682_v6 }
 0x350   :  { %3671 = vmatpush1.bf16.msra.mxu1 %v7033_v35 }
 0x351   :  { %3672 = vmatprep.subr.bf16.mxu1 %v7038_v41 }
 0x354   :  { %3673 = vmatpush1.bf16.msra.mxu1 %v7036_v47 }
 0x355   :  { %3674 = vmatprep.subr.bf16.mxu1 %v7041_v52 }
 0x358   :  { %3675 = vmatpush1.bf16.msra.mxu1 %v7039_v55 }
 0x359   :  { %3676 = vmatprep.subr.bf16.mxu1 %v7044_v56 }
 0x35c   :  { %3677 = vmatpush1.bf16.msra.mxu1 %v7042_v59 }
 0x35d   :  { %3678 = vmatprep.subr.bf16.mxu1 %v7047_v38 }
 0x360   :  { %3679 = vmatpush1.bf16.msra.mxu1 %v7045_v63 }
 0x363   :  { %3689 = vmatmul.mubr.bf16.vlgmr.msra.gmra.mrb[0].mxu1 %v2785_v13  ;;  %v3847_v13 = vld [vmem:[%s10124_s23 + $0xf8] sm:$0xff] }
 0x364   :  { %6423 = vmatprep.mubr.msk.bf16.mxu1 %vm2962_vm0, %v2788_v16  ;;  %v6684_v34 = vpack.c.bf16 %v3847_v13, %v3846_v10 }
 0x366   :  { %6685 = vmatprep.subr.bf16.mxu0 %v6684_v34 }
 0x367   :  { %6687 = vmatpush3.bf16.msra.mxu0 %v6686_v60 }
 0x36b   :  { %3699 = vmatmul.mubr.bf16.gmra.mrb[4].mxu1 %v2787_v9 }
 0x36c   :  { %6424 = vmatprep.mubr.msk.bf16.mxu1 %vm2962_vm0, %v2790_v18 }
 0x373   :  { %3709 = vmatmul.mubr.bf16.gmra.mrb[8].mxu1 %v2789_v48 }
 0x374   :  { %6425 = vmatprep.mubr.msk.bf16.mxu1 %vm2962_vm0, %v2792_v58 }
 0x37b   :  { %3719 = vmatmul.mubr.bf16.gmra.mrb[12].mxu1 %v2791_v53 }
 0x436   :  { %v9226_v62 = vpop.f32.mrb[0].mxu1 }
 0x437   :  { %v9228_v9 = vpop.f32.mrb[1].mxu1  ;;  %v3771_v12 = vmul.f32 %v9226_v62, %v9226_v62 }
 0x438   :  { %v9230_v11 = vpop.f32.mrb[2].mxu1  ;;  %v3772_v7 = vmul.f32 %v9228_v9, %v9228_v9 }
 0x439   :  { %v3745_v16 = vadd.f32 %v9230_v11, %v9226_v62  ;;  %v3773_v19 = vmul.f32 %v9230_v11, %v9230_v11  ;;  %v9238_v20 = vpop.f32.mrb[3].mxu1 }
 0x43a   :  { %v3758_v8 = vadd.f32 %v9238_v20, %v9228_v9  ;;  %v3774_v44 = vmul.f32 %v9238_v20, %v9238_v20 }
 0x43b   :  { %v3787_v45 = vadd.f32 %v3773_v19, %v3771_v12 }
 0x43c   :  { %v3800_v48 = vadd.f32 %v3774_v44, %v3772_v7 }
 0x43e   :  { %v9246_v15 = vpop.f32.mrb[4].mxu1 }
 0x43f   :  { %v3746_v17 = vadd.f32 %v3745_v16, %v9246_v15  ;;  %v3775_v18 = vmul.f32 %v9246_v15, %v9246_v15  ;;  %v9251_v23 = vpop.f32.mrb[5].mxu1 }
 0x440   :  { %v3759_v26 = vadd.f32 %v3758_v8, %v9251_v23  ;;  %v3776_v61 = vmul.f32 %v9251_v23, %v9251_v23  ;;  %v9256_v49 = vpop.f32.mrb[6].mxu1 }
 0x441   :  { %v3788_v50 = vadd.f32 %v3787_v45, %v3775_v18  ;;  %v3747_v51 = vadd.f32 %v3746_v17, %v9256_v49  ;;  %v3777_v53 = vmul.f32 %v9256_v49, %v9256_v49  ;;  %v9261_v54 = vpop.f32.mrb[7].mxu1 }
 0x442   :  { %v3801_v57 = vadd.f32 %v3800_v48, %v3776_v61  ;;  %v3760_v58 = vadd.f32 %v3759_v26, %v9261_v54  ;;  %v3778_v27 = vmul.f32 %v9261_v54, %v9261_v54 }
 0x443   :  { %v3789_v0 = vadd.f32 %v3788_v50, %v3777_v53 }
 0x444   :  { %v3802_v2 = vadd.f32 %v3801_v57, %v3778_v27 }
 0x446   :  { %v9266_v5 = vpop.f32.mrb[8].mxu1 }
 0x447   :  { %v3748_v1 = vadd.f32 %v3747_v51, %v9266_v5  ;;  %v3779_v29 = vmul.f32 %v9266_v5, %v9266_v5  ;;  %v9271_v36 = vpop.f32.mrb[9].mxu1 }
 0x448   :  { %v3761_v37 = vadd.f32 %v3760_v58, %v9271_v36  ;;  %v3780_v40 = vmul.f32 %v9271_v36, %v9271_v36  ;;  %v9276_v21 = vpop.f32.mrb[10].mxu1 }
 0x449   :  { %v3790_v24 = vadd.f32 %v3789_v0, %v3779_v29  ;;  %v3749_v25 = vadd.f32 %v3748_v1, %v9276_v21  ;;  %v3781_v30 = vmul.f32 %v9276_v21, %v9276_v21  ;;  %v9281_v28 = vpop.f32.mrb[11].mxu1 }
 0x44a   :  { %v3803_v31 = vadd.f32 %v3802_v2, %v3780_v40  ;;  %v3762_v32 = vadd.f32 %v3761_v37, %v9281_v28  ;;  %v3782_v33 = vmul.f32 %v9281_v28, %v9281_v28  ;;  %v3920_v40 = vld [vmem:[%s10125_s11 + $0x8] sm:$0xff] }
 0x44b   :  { %v3791_v35 = vadd.f32 %v3790_v24, %v3781_v30  ;;  %3925 = vmatprep.subr.mxu0 %v3920_v40  ;;  %v3919_v24 = vld [vmem:[%s10125_s11] sm:$0xff] }
 0x44c   :  { %v3804_v41 = vadd.f32 %v3803_v31, %v3782_v33 }
 0x44e   :  { %v9286_v47 = vpop.f32.mrb[12].mxu1 }
 0x44f   :  { %v3750_v52 = vadd.f32 %v3749_v25, %v9286_v47  ;;  %v3783_v55 = vmul.f32 %v9286_v47, %v9286_v47  ;;  %v9291_v56 = vpop.f32.mrb[13].mxu1  ;;  %v7370_v25 = vmov 0.0  }
 0x450   :  { %v3763_v59 = vadd.f32 %v3762_v32, %v9291_v56  ;;  %v3784_v38 = vmul.f32 %v9291_v56, %v9291_v56  ;;  %v9296_v63 = vpop.f32.mrb[14].mxu1 }
 0x451   :  { %v3792_v3 = vadd.f32 %v3791_v35, %v3783_v55  ;;  %v3751_v42 = vadd.f32 %v3750_v52, %v9296_v63  ;;  %v3785_v43 = vmul.f32 %v9296_v63, %v9296_v63  ;;  %v9301_v46 = vpop.f32.mrb[15].mxu1  ;;  %v4008_v35 = vlaneseq }
 0x452   :  { %v3805_v22 = vadd.f32 %v3804_v41, %v3784_v38  ;;  %v3764_v6 = vadd.f32 %v3763_v59, %v9301_v46  ;;  %v3786_v10 = vmul.f32 %v9301_v46, %v9301_v46 }
 0x453   :  { %v3752_v13 = vrot.slane %v3751_v42, 4  ;;  %v3793_v14 = vadd.f32 %v3792_v3, %v3785_v43  ;;  %v4009_v41 = vshrl.u32 %v4008_v35, 7 }
 0x454   :  { %v3765_v34 = vrot.slane %v3764_v6, 4  ;;  %v3806_v39 = vadd.f32 %v3805_v22, %v3786_v10 }
 0x455   :  { %v3753_v60 = vadd.f32 %v3752_v13, %v3751_v42  ;;  %v3794_v12 = vrot.slane %v3793_v14, 4  ;;  %v9315_v52 = vsub.s32 0, %v4009_v41 }
 0x456   :  { %v3766_v16 = vadd.f32 %v3765_v34, %v3764_v6  ;;  %v3807_v19 = vrot.slane %v3806_v39, 4 }
 0x457   :  { %v3754_v7 = vrot.slane %v3753_v60, 2  ;;  %v3795_v8 = vadd.f32 %v3794_v12, %v3793_v14 }
 0x458   :  { %v3767_v44 = vrot.slane %v3766_v16, 2  ;;  %v3808_v45 = vadd.f32 %v3807_v19, %v3806_v39 }
 0x459   :  { %v3755_v48 = vadd.f32 %v3754_v7, %v3753_v60  ;;  %v3796_v17 = vrot.slane %v3795_v8, 2 }
 0x45a   :  { %v3768_v18 = vadd.f32 %v3767_v44, %v3766_v16  ;;  %v3809_v26 = vrot.slane %v3808_v45, 2 }
 0x45b   :  { %v3756_v61 = vrot.slane %v3755_v48, 1  ;;  %v3797_v50 = vadd.f32 %v3796_v17, %v3795_v8  ;;  %v9345_v17 = vsub.s32 1, %v4009_v41 }
 0x45c   :  { %v3769_v51 = vrot.slane %v3768_v18, 1  ;;  %v3810_v53 = vadd.f32 %v3809_v26, %v3808_v45  ;;  %v4088_v26 = vld [vmem:[#allocation10] sm:$0x3] }
 0x45d   :  { %v3798_v57 = vrot.slane %v3797_v50, 1  ;;  %v3757_v27 = vadd.f32 %v3756_v61, %v3755_v48 }
 0x45e   :  { %v3811_v58 = vrot.slane %v3810_v53, 1  ;;  %v3770_v2 = vadd.f32 %v3769_v51, %v3768_v18  ;;  %v4060_v18 = vld [vmem:[#allocation8] sm:$0x3] }
 0x45f   :  { %v3799_v0 = vadd.f32 %v3798_v57, %v3797_v50  ;;  %v4065_v51 = vrot.slane %v4060_v18, %v9315_v52  ;;  %v4093_v57 = vrot.slane %v4088_v26, %v9315_v52 }
 0x460   :  { %v3812_v1 = vadd.f32 %v3811_v58, %v3810_v53  ;;  %v9350_v53 = vrot.slane %v4060_v18, %v9345_v17 }
 0x461   :  { %v3814_v29 = vsel %vm3813_vm1, %v3757_v27, %v3799_v0 }
 0x462   :  { %v3815_v37 = vsel %vm3813_vm1, %v3770_v2, %v3812_v1 }
 0x463   :  { %3912 = vmatprep.mubr.f32.mxu0 %v3815_v37 }
 0x464   :  { %3913 = vmatmul.mubr.f32.vlgmr.msra.gmra.mrb[64].mxu0 %v3814_v29 }
 0x465   :  { %3926 = vmatpush1.msra.mxu0 %v3919_v24  ;;  %3989 = vmatprep.mubr.f32.mxu0 %v7370_v25 }
 0x537   :  { %v6516_v30 = vpop.f32.mrb[64].mxu0 }
 0x538   :  { %v6517_v31 = vpop.f32.mrb[65].mxu0 }
 0x539   :  { %v6518_v32 = vadd.f32 %v6517_v31, %v6516_v30 }
 0x53b   :  { %v3918_v33 = vmul.f32 0.00048828125, %v6518_v32 }
 0x53d   :  { %6426 = vmatmul.mubr.msk.f32.vlgmr.msra.gmra.mrb[66].mxu0 %vm3921_vm2, %v3918_v33 }
 0x610   :  { %v3991_v55 = vpop.f32.mrb[66].mxu0 }
 0x611   :  { %v3996_v59 = vmul.f32 %v3991_v55, %v3991_v55  ;;  %v4011_v38 = vrot.slane %v3991_v55, %v9315_v52  ;;  %v3993_v3 = vpop.f32.mrb[67].mxu0 }
 0x612   :  { %v3997_v42 = vmul.f32 %v3993_v3, %v3993_v3  ;;  %v9319_v43 = vrot.slane %v3993_v3, %v9315_v52 }
 0x613   :  { %v4000_v22 = vrot.slane %v3996_v59, 7  ;;  %v4016_v6 = vsub.f32 %v9226_v62, %v4011_v38  ;;  %v4018_v10 = vsub.f32 %v9230_v11, %v4011_v38  ;;  %v4020_v13 = vsub.f32 %v9246_v15, %v4011_v38 }
 0x614   :  { %v4022_v14 = vsub.f32 %v9256_v49, %v4011_v38  ;;  %v4024_v34 = vsub.f32 %v9266_v5, %v4011_v38  ;;  %v4026_v39 = vsub.f32 %v9276_v21, %v4011_v38  ;;  %v4028_v60 = vsub.f32 %v9286_v47, %v4011_v38 }
 0x615   :  { %v4004_v12 = vsub.f32 %v3991_v55, %v4000_v22  ;;  %v4030_v16 = vsub.f32 %v9296_v63, %v4011_v38  ;;  %v4001_v19 = vrot.slane %v3997_v42, 7  ;;  %v4017_v7 = vsub.f32 %v9228_v9, %v9319_v43 }
 0x616   :  { %v4019_v62 = vsub.f32 %v9238_v20, %v9319_v43  ;;  %v4021_v11 = vsub.f32 %v9251_v23, %v9319_v43  ;;  %v4023_v15 = vsub.f32 %v9261_v54, %v9319_v43  ;;  %v4025_v49 = vsub.f32 %v9271_v36, %v9319_v43 }
 0x617   :  { %v4006_v5 = vmax.f32 %v4004_v12, 0.0  ;;  %v4027_v21 = vsub.f32 %v9281_v28, %v9319_v43  ;;  %v4029_v47 = vsub.f32 %v9291_v56, %v9319_v43  ;;  %v4005_v63 = vsub.f32 %v3993_v3, %v4001_v19 }
 0x618   :  { %v4031_v8 = vsub.f32 %v9301_v46, %v9319_v43 }
 0x619   :  { %v4032_v44 = vadd.f32 1e-05, %v4006_v5  ;;  %v4007_v45 = vmax.f32 %v4005_v63, 0.0 }
 0x61b   :  { %7048 = vrsqrt.f32 %v4032_v44  ;;  %v4033_v48 = vadd.f32 1e-05, %v4007_v45 }
 0x61d   :  { %7050 = vrsqrt.f32 %v4033_v48 }
 0x625   :  { %v7049_v61 = vpop.eup %7048 }
 0x626   :  { %v4039_v50 = vrot.slane %v7049_v61, %v9345_v17 }
 0x628   :  { %v4044_v58 = vmul.f32 %v4039_v50, %v4016_v6  ;;  %v4046_v27 = vmul.f32 %v4039_v50, %v4018_v10  ;;  %v4048_v0 = vmul.f32 %v4039_v50, %v4020_v13  ;;  %v4050_v2 = vmul.f32 %v4039_v50, %v4022_v14  ;;  %v7051_v14 = vpop.eup %7050 }
 0x629   :  { %v4052_v1 = vmul.f32 %v4039_v50, %v4024_v34  ;;  %v4054_v29 = vmul.f32 %v4039_v50, %v4026_v39  ;;  %v4056_v37 = vmul.f32 %v4039_v50, %v4028_v60  ;;  %v4058_v40 = vmul.f32 %v4039_v50, %v4030_v16 }
 0x62a   :  { %v4072_v24 = vmul.f32 %v4065_v51, %v4044_v58  ;;  %v4074_v30 = vmul.f32 %v4065_v51, %v4046_v27  ;;  %v4076_v31 = vmul.f32 %v4065_v51, %v4048_v0  ;;  %v4078_v32 = vmul.f32 %v4065_v51, %v4050_v2 }
 0x62b   :  { %v4080_v33 = vmul.f32 %v4065_v51, %v4052_v1  ;;  %v4082_v35 = vmul.f32 %v4065_v51, %v4054_v29  ;;  %v4084_v41 = vmul.f32 %v4065_v51, %v4056_v37  ;;  %v4086_v55 = vmul.f32 %v4065_v51, %v4058_v40 }
 0x62c   :  { %v4100_v59 = vadd.f32 %v4093_v57, %v4072_v24  ;;  %v4102_v38 = vadd.f32 %v4093_v57, %v4074_v30  ;;  %v4104_v3 = vadd.f32 %v4093_v57, %v4076_v31  ;;  %v4106_v42 = vadd.f32 %v4093_v57, %v4078_v32 }
 0x62d   :  { %v4108_v22 = vadd.f32 %v4093_v57, %v4080_v33  ;;  %v4110_v6 = vadd.f32 %v4093_v57, %v4082_v35  ;;  %v4112_v10 = vadd.f32 %v4093_v57, %v4084_v41  ;;  %v4114_v13 = vadd.f32 %v4093_v57, %v4086_v55 }
 0x62e   :  { %vm4116_vm3 = vcmp.gt.f32.partialorder %v4100_v59, 0.0  ;;  %vm4118_vm4 = vcmp.gt.f32.partialorder %v4102_v38, 0.0  ;;  %vm4120_vm5 = vcmp.gt.f32.partialorder %v4104_v3, 0.0  ;;  %vm4122_vm6 = vcmp.gt.f32.partialorder %v4106_v42, 0.0 }
 0x62f   :  { %vm4124_vm7 = vcmp.gt.f32.partialorder %v4108_v22, 0.0  ;;  %vm4126_vm8 = vcmp.gt.f32.partialorder %v4110_v6, 0.0  ;;  %vm4128_vm9 = vcmp.gt.f32.partialorder %v4112_v10, 0.0  ;;  %vm4130_vm10 = vcmp.gt.f32.partialorder %v4114_v13, 0.0 }
 0x630   :  { %v4097_v34 = vrot.slane %v4088_v26, %v9345_v17  ;;  %v4132_v39 = vmul.f32 0.2, %v4100_v59  ;;  %v4134_v60 = vmul.f32 0.2, %v4102_v38  ;;  %v4136_v12 = vmul.f32 0.2, %v4104_v3 }
 0x631   :  { %v4138_v16 = vmul.f32 0.2, %v4106_v42  ;;  %v4140_v19 = vmul.f32 0.2, %v4108_v22  ;;  %v4142_v5 = vmul.f32 0.2, %v4110_v6  ;;  %v4043_v63 = vrot.slane %v7051_v14, %v9345_v17 }
 0x632   :  { %v4144_v44 = vmul.f32 0.2, %v4112_v10  ;;  %v4146_v45 = vmul.f32 0.2, %v4114_v13  ;;  %v9356_v48 = vsel %vm4116_vm3, %v4100_v59, %v4132_v39  ;;  %v9359_v18 = vsel %vm4118_vm4, %v4102_v38, %v4134_v60 }
 0x633   :  { %v9362_v61 = vsel %vm4120_vm5, %v4104_v3, %v4136_v12  ;;  %v9365_v26 = vsel %vm4122_vm6, %v4106_v42, %v4138_v16  ;;  %v9368_v50 = vsel %vm4124_vm7, %v4108_v22, %v4140_v19  ;;  %v9371_v51 = vsel %vm4126_vm8, %v4110_v6, %v4142_v5 }
 0x634   :  { %v9374_v57 = vsel %vm4128_vm9, %v4112_v10, %v4144_v44  ;;  %v9377_v58 = vsel %vm4130_vm10, %v4114_v13, %v4146_v45  ;;  %v4164_v27 = vpack.c.bf16 %v9359_v18, %v9356_v48  ;;  %v4166_v0 = vpack.c.bf16 %v9365_v26, %v9362_v61 }
 0x635   :  { %v4168_v2 = vpack.c.bf16 %v9371_v51, %v9368_v50  ;;  %v4170_v1 = vpack.c.bf16 %v9377_v58, %v9374_v57  ;;  %v4045_v29 = vmul.f32 %v4043_v63, %v4017_v7  ;;  %v4047_v37 = vmul.f32 %v4043_v63, %v4019_v62 }
 0x636   :  { %v4049_v40 = vmul.f32 %v4043_v63, %v4021_v11  ;;  %v4051_v24 = vmul.f32 %v4043_v63, %v4023_v15  ;;  %v4053_v30 = vmul.f32 %v4043_v63, %v4025_v49  ;;  %v4055_v9 = vmul.f32 %v4043_v63, %v4027_v21 }
 0x637   :  { %v4057_v20 = vmul.f32 %v4043_v63, %v4029_v47  ;;  %v4059_v23 = vmul.f32 %v4043_v63, %v4031_v8  ;;  %v4073_v7 = vmul.f32 %v9350_v53, %v4045_v29  ;;  %v4075_v54 = vmul.f32 %v9350_v53, %v4047_v37 }
 0x638   :  { %v4077_v62 = vmul.f32 %v9350_v53, %v4049_v40  ;;  %v4079_v36 = vmul.f32 %v9350_v53, %v4051_v24  ;;  %v4081_v11 = vmul.f32 %v9350_v53, %v4053_v30  ;;  %v4083_v28 = vmul.f32 %v9350_v53, %v4055_v9 }
 0x639   :  { %v4085_v15 = vmul.f32 %v9350_v53, %v4057_v20  ;;  %v4087_v56 = vmul.f32 %v9350_v53, %v4059_v23  ;;  %v4101_v49 = vadd.f32 %v4097_v34, %v4073_v7  ;;  %v4103_v21 = vadd.f32 %v4097_v34, %v4075_v54 }
 0x63a   :  { %v4105_v46 = vadd.f32 %v4097_v34, %v4077_v62  ;;  %v4107_v43 = vadd.f32 %v4097_v34, %v4079_v36  ;;  %v4109_v47 = vadd.f32 %v4097_v34, %v4081_v11  ;;  %v4111_v8 = vadd.f32 %v4097_v34, %v4083_v28 }
 0x63b   :  { %v4113_v31 = vadd.f32 %v4097_v34, %v4085_v15  ;;  %v4115_v32 = vadd.f32 %v4097_v34, %v4087_v56  ;;  %vm4117_vm11 = vcmp.gt.f32.partialorder %v4101_v49, 0.0  ;;  %vm4119_vm12 = vcmp.gt.f32.partialorder %v4103_v21, 0.0 }
 0x63c   :  { %vm4121_vm13 = vcmp.gt.f32.partialorder %v4105_v46, 0.0  ;;  %vm4123_vm14 = vcmp.gt.f32.partialorder %v4107_v43, 0.0  ;;  %vm4125_vm15 = vcmp.gt.f32.partialorder %v4109_v47, 0.0  ;;  %vm4127_vm2 = vcmp.gt.f32.partialorder %v4111_v8, 0.0 }
 0x63d   :  { %vm4129_vm3 = vcmp.gt.f32.partialorder %v4113_v31, 0.0  ;;  %vm4131_vm4 = vcmp.gt.f32.partialorder %v4115_v32, 0.0  ;;  %v4133_v33 = vmul.f32 0.2, %v4101_v49  ;;  %v4135_v35 = vmul.f32 0.2, %v4103_v21 }
 0x63e   :  { %v4137_v41 = vmul.f32 0.2, %v4105_v46  ;;  %v4139_v53 = vmul.f32 0.2, %v4107_v43  ;;  %v4141_v55 = vmul.f32 0.2, %v4109_v47 }
 0x63f   :  { %v4143_v59 = vmul.f32 0.2, %v4111_v8  ;;  %v4145_v38 = vmul.f32 0.2, %v4113_v31  ;;  %v4147_v3 = vmul.f32 0.2, %v4115_v32  ;;  %v4149_v42 = vsel %vm4117_vm11, %v4101_v49, %v4133_v33 }
 0x640   :  { %v4151_v22 = vsel %vm4119_vm12, %v4103_v21, %v4135_v35  ;;  %v4153_v6 = vsel %vm4121_vm13, %v4105_v46, %v4137_v41  ;;  %v4155_v10 = vsel %vm4123_vm14, %v4107_v43, %v4139_v53  ;;  %v4157_v13 = vsel %vm4125_vm15, %v4109_v47, %v4141_v55 }
 0x641   :  { %v4159_v14 = vsel %vm4127_vm2, %v4111_v8, %v4143_v59  ;;  %v4161_v34 = vsel %vm4129_vm3, %v4113_v31, %v4145_v38  ;;  %v4163_v39 = vsel %vm4131_vm4, %v4115_v32, %v4147_v3  ;;  %v4165_v60 = vpack.c.bf16 %v4151_v22, %v4149_v42 }
 0x642   :  { %v4167_v12 = vpack.c.bf16 %v4155_v10, %v4153_v6  ;;  %v4169_v16 = vpack.c.bf16 %v4159_v14, %v4157_v13  ;;  %v4171_v19 = vpack.c.bf16 %v4163_v39, %v4161_v34 }
 0x643   :  { %4257 = vmatprep.subr.bf16.mxu0 %v4165_v60 }
 0x644   :  { %7351 = dma.done.wait [#allocation4], 16384 }
 0x645   :  { %7352 = vsyncadd [#allocation4], 4294950912  ;;  %4289 = vmatprep.mubr.bf16.mxu0 %v7369_v4  ;;  %4258 = vmatpush1.bf16.msra.mxu0 %v4164_v27  ;;  %s10126_s3 = sld [smem:[#allocation41_spill]]  ;;  %v4420_v63 = vld [vmem:[#allocation2 + $0x108] sm:$0xff]  ;;  %v4419_v44 = vld [vmem:[#allocation2 + $0x100] sm:$0xff]  ;;  %s10127_s5 = sld [smem:[#allocation43_spill]] }
 0x646   :  { %4259 = vmatprep.subr.bf16.mxu0 %v4167_v12  ;;  %v4422_v45 = vld [vmem:[#allocation2 + $0x118] sm:$0xff]  ;;  %v4421_v48 = vld [vmem:[#allocation2 + $0x110] sm:$0xff]  ;;  %v4424_v18 = vld [vmem:[#allocation2 + $0x128] sm:$0xff]  ;;  %s10128_s0 = sld [smem:[#allocation44_spill]] }
 0x647   :  { %v4423_v26 = vld [vmem:[#allocation2 + $0x120] sm:$0xff]  ;;  %v4426_v50 = vld [vmem:[#allocation2 + $0x138] sm:$0xff]  ;;  %v4425_v51 = vld [vmem:[#allocation2 + $0x130] sm:$0xff] }
 0x648   :  { %v4428_v57 = vld [vmem:[#allocation2 + $0x148] sm:$0xff]  ;;  %v4427_v27 = vld [vmem:[#allocation2 + $0x140] sm:$0xff]  ;;  %v4434_v40 = vld [vmem:[#allocation2 + $0x178] sm:$0xff] }
 0x649   :  { %4260 = vmatpush1.bf16.msra.mxu0 %v4166_v0  ;;  %v4430_v0 = vld [vmem:[#allocation2 + $0x158] sm:$0xff]  ;;  %v4431_v37 = vld [vmem:[#allocation2 + $0x160] sm:$0xff]  ;;  %v4433_v24 = vld [vmem:[#allocation2 + $0x170] sm:$0xff] }
 0x64a   :  { %4261 = vmatprep.subr.bf16.mxu0 %v4169_v16  ;;  %v4436_v30 = vld [vmem:[#allocation2 + $0x188] sm:$0xff]  ;;  %v4435_v20 = vld [vmem:[#allocation2 + $0x180] sm:$0xff]  ;;  %v4438_v23 = vld [vmem:[#allocation2 + $0x198] sm:$0xff] }
 0x64b   :  { %v7052_v5 = vld [vmem:[%s10126_s3] sm:$0xff]   ;;  %v7053_v61 = vld [vmem:[%s10126_s3 + $0x8] sm:$0xff]   ;;  %v7054_v58 = vld [vmem:[%s10126_s3 + $0x10] sm:$0xff]  }
 0x64c   :  { %v7055_v29 = vld [vmem:[%s10126_s3 + $0x18] sm:$0xff]   ;;  %v7056_v9 = vld [vmem:[%s10126_s3 + $0x20] sm:$0xff]   ;;  %v4437_v7 = vld [vmem:[#allocation2 + $0x190] sm:$0xff] }
 0x64d   :  { %4262 = vmatpush1.bf16.msra.mxu0 %v4168_v2  ;;  %v4429_v2 = vld [vmem:[#allocation2 + $0x150] sm:$0xff]  ;;  %v4440_v54 = vld [vmem:[#allocation2 + $0x1a8] sm:$0xff]  ;;  %v4439_v36 = vld [vmem:[#allocation2 + $0x1a0] sm:$0xff] }
 0x64e   :  { %4263 = vmatprep.subr.bf16.mxu0 %v4171_v19  ;;  %v7057_v62 = vld [vmem:[%s10126_s3 + $0x28] sm:$0xff]   ;;  %v7058_v11 = vld [vmem:[%s10126_s3 + $0x30] sm:$0xff]   ;;  %v7059_v28 = vld [vmem:[%s10126_s3 + $0x38] sm:$0xff]  }
 0x64f   :  { %v4442_v15 = vld [vmem:[#allocation2 + $0x1b8] sm:$0xff]  ;;  %v4441_v56 = vld [vmem:[#allocation2 + $0x1b0] sm:$0xff]  ;;  %v4444_v49 = vld [vmem:[#allocation2 + $0x1c8] sm:$0xff] }
 0x650   :  { %v4443_v21 = vld [vmem:[#allocation2 + $0x1c0] sm:$0xff]  ;;  %v4446_v46 = vld [vmem:[#allocation2 + $0x1d8] sm:$0xff]  ;;  %v4445_v43 = vld [vmem:[#allocation2 + $0x1d0] sm:$0xff] }
 0x651   :  { %4264 = vmatpush1.bf16.msra.mxu0 %v4170_v1  ;;  %v4432_v1 = vld [vmem:[#allocation2 + $0x168] sm:$0xff]  ;;  %v4447_v8 = vld [vmem:[#allocation2 + $0x1e0] sm:$0xff]  ;;  %v4450_v31 = vld [vmem:[#allocation2 + $0x1f8] sm:$0xff] }
 0x652   :  { %4451 = vmatprep.subr.bf16.mxu0 %v4420_v63  ;;  %v4448_v47 = vld [vmem:[#allocation2 + $0x1e8] sm:$0xff]  ;;  %v4449_v32 = vld [vmem:[#allocation2 + $0x1f0] sm:$0xff]  ;;  %v4386_v19 = vld [vmem:[#allocation2] sm:$0xff] }
 0x653   :  { %v4387_v33 = vld [vmem:[#allocation2 + $0x8] sm:$0xff] }
 0x654   :  { %6435 = vmatmul.mubr.msk.bf16.vlgmr.msra.gmra.mrb[68].mxu0 %vm2962_vm0, %v7052_v5  ;;  %v4389_v5 = vld [vmem:[#allocation2 + $0x18] sm:$0xff] }
 0x655   :  { %4299 = vmatprep.mubr.bf16.mxu0 %v7369_v4  ;;  %4452 = vmatpush1.bf16.msra.mxu0 %v4419_v44 }
 0x656   :  { %4453 = vmatprep.subr.bf16.mxu0 %v4422_v45  ;;  %v4388_v45 = vld [vmem:[#allocation2 + $0x10] sm:$0xff] }
 0x659   :  { %4454 = vmatpush1.bf16.msra.mxu0 %v4421_v48 }
 0x65a   :  { %4455 = vmatprep.subr.bf16.mxu0 %v4424_v18  ;;  %v4391_v18 = vld [vmem:[#allocation2 + $0x28] sm:$0xff] }
 0x65c   :  { %6436 = vmatmul.mubr.msk.bf16.gmra.mrb[72].mxu0 %vm2962_vm0, %v7053_v61 }
 0x65d   :  { %4309 = vmatprep.mubr.bf16.mxu0 %v7369_v4  ;;  %4456 = vmatpush1.bf16.msra.mxu0 %v4423_v26 }
 0x65e   :  { %4457 = vmatprep.subr.bf16.mxu0 %v4426_v50 }
 0x661   :  { %4458 = vmatpush1.bf16.msra.mxu0 %v4425_v51  ;;  %v4390_v51 = vld [vmem:[#allocation2 + $0x20] sm:$0xff] }
 0x662   :  { %4459 = vmatprep.subr.bf16.mxu0 %v4428_v57  ;;  %v4393_v57 = vld [vmem:[#allocation2 + $0x38] sm:$0xff] }
 0x664   :  { %6437 = vmatmul.mubr.msk.bf16.gmra.mrb[76].mxu0 %vm2962_vm0, %v7054_v58 }
 0x665   :  { %4319 = vmatprep.mubr.bf16.mxu0 %v7369_v4  ;;  %4460 = vmatpush1.bf16.msra.mxu0 %v4427_v27  ;;  %v4392_v27 = vld [vmem:[#allocation2 + $0x30] sm:$0xff] }
 0x666   :  { %4461 = vmatprep.subr.bf16.mxu0 %v4430_v0 }
 0x669   :  { %4462 = vmatpush1.bf16.msra.mxu0 %v4429_v2  ;;  %v4395_v2 = vld [vmem:[#allocation2 + $0x48] sm:$0xff] }
 0x66a   :  { %4463 = vmatprep.subr.bf16.mxu0 %v4432_v1 }
 0x66c   :  { %6438 = vmatmul.mubr.msk.bf16.gmra.mrb[80].mxu0 %vm2962_vm0, %v7055_v29 }
 0x66d   :  { %4329 = vmatprep.mubr.bf16.mxu0 %v7369_v4  ;;  %4464 = vmatpush1.bf16.msra.mxu0 %v4431_v37 }
 0x66e   :  { %4465 = vmatprep.subr.bf16.mxu0 %v4434_v40 }
 0x671   :  { %4466 = vmatpush1.bf16.msra.mxu0 %v4433_v24  ;;  %v4394_v24 = vld [vmem:[#allocation2 + $0x40] sm:$0xff] }
 0x672   :  { %4467 = vmatprep.subr.bf16.mxu0 %v4436_v30  ;;  %v4397_v30 = vld [vmem:[#allocation2 + $0x58] sm:$0xff] }
 0x674   :  { %6439 = vmatmul.mubr.msk.bf16.gmra.mrb[84].mxu0 %vm2962_vm0, %v7056_v9  ;;  %v4396_v9 = vld [vmem:[#allocation2 + $0x50] sm:$0xff] }
 0x675   :  { %4339 = vmatprep.mubr.bf16.mxu0 %v7369_v4  ;;  %4468 = vmatpush1.bf16.msra.mxu0 %v4435_v20  ;;  %v4399_v20 = vld [vmem:[#allocation2 + $0x68] sm:$0xff] }
 0x676   :  { %4469 = vmatprep.subr.bf16.mxu0 %v4438_v23  ;;  %v4398_v23 = vld [vmem:[#allocation2 + $0x60] sm:$0xff] }
 0x679   :  { %4470 = vmatpush1.bf16.msra.mxu0 %v4437_v7  ;;  %v4401_v7 = vld [vmem:[#allocation2 + $0x78] sm:$0xff] }
 0x67a   :  { %4471 = vmatprep.subr.bf16.mxu0 %v4440_v54  ;;  %v4400_v54 = vld [vmem:[#allocation2 + $0x70] sm:$0xff] }
 0x67c   :  { %6440 = vmatmul.mubr.msk.bf16.gmra.mrb[88].mxu0 %vm2962_vm0, %v7057_v62  ;;  %v4403_v62 = vld [vmem:[#allocation2 + $0x88] sm:$0xff] }
 0x67d   :  { %4349 = vmatprep.mubr.bf16.mxu0 %v7369_v4  ;;  %4472 = vmatpush1.bf16.msra.mxu0 %v4439_v36  ;;  %v4402_v36 = vld [vmem:[#allocation2 + $0x80] sm:$0xff] }
 0x67e   :  { %4473 = vmatprep.subr.bf16.mxu0 %v4442_v15  ;;  %v4407_v15 = vld [vmem:[#allocation2 + $0xa8] sm:$0xff] }
 0x681   :  { %4474 = vmatpush1.bf16.msra.mxu0 %v4441_v56  ;;  %v4406_v56 = vld [vmem:[#allocation2 + $0xa0] sm:$0xff] }
 0x682   :  { %4475 = vmatprep.subr.bf16.mxu0 %v4444_v49  ;;  %v4409_v49 = vld [vmem:[#allocation2 + $0xb8] sm:$0xff] }
 0x684   :  { %6441 = vmatmul.mubr.msk.bf16.gmra.mrb[92].mxu0 %vm2962_vm0, %v7058_v11  ;;  %v4405_v11 = vld [vmem:[#allocation2 + $0x98] sm:$0xff] }
 0x685   :  { %4359 = vmatprep.mubr.bf16.mxu0 %v7369_v4  ;;  %4476 = vmatpush1.bf16.msra.mxu0 %v4443_v21  ;;  %v4408_v21 = vld [vmem:[#allocation2 + $0xb0] sm:$0xff] }
 0x686   :  { %4477 = vmatprep.subr.bf16.mxu0 %v4446_v46 }
 0x689   :  { %4478 = vmatpush1.bf16.msra.mxu0 %v4445_v43  ;;  %v4411_v43 = vld [vmem:[#allocation2 + $0xc8] sm:$0xff] }
 0x68a   :  { %4479 = vmatprep.subr.bf16.mxu0 %v4448_v47 }
 0x68c   :  { %6442 = vmatmul.mubr.msk.bf16.gmra.mrb[96].mxu0 %vm2962_vm0, %v7059_v28  ;;  %v4404_v28 = vld [vmem:[#allocation2 + $0x90] sm:$0xff]  ;;  %vm4898_vm0 = vcmask 130048  }
 0x68d   :  { %4480 = vmatpush1.bf16.msra.mxu0 %v4447_v8  ;;  %v4410_v8 = vld [vmem:[#allocation2 + $0xc0] sm:$0xff] }
 0x68e   :  { %4481 = vmatprep.subr.bf16.mxu0 %v4450_v31 }
 0x691   :  { %4482 = vmatpush1.bf16.msra.mxu0 %v4449_v32  ;;  %v4413_v32 = vld [vmem:[#allocation2 + $0xd8] sm:$0xff] }
 0x692   :  { %4504 = vmatprep.subr.bf16.mxu0 %v4387_v33 }
 0x727   :  { %v9470_v35 = vpop.f32.mrb[68].mxu0 }
 0x728   :  { %v4293_v41 = vpop.f32.mrb[69].mxu0 }
 0x729   :  { %v9472_v53 = vpop.f32.mrb[70].mxu0 }
 0x72a   :  { %v4370_v55 = vpack.c.bf16 %v9472_v53, %v9470_v35  ;;  %v4297_v59 = vpop.f32.mrb[71].mxu0  ;;  %v4562_v35 = vld [vmem:[#allocation2 + $0x220] sm:$0xff]  ;;  %v4565_v53 = vld [vmem:[#allocation2 + $0x238] sm:$0xff] }
 0x72b   :  { %v4371_v38 = vpack.c.bf16 %v4297_v59, %v4293_v41 }
 0x72f   :  { %v9476_v3 = vpop.f32.mrb[72].mxu0 }
 0x730   :  { %v9478_v42 = vpop.f32.mrb[73].mxu0 }
 0x731   :  { %v9480_v22 = vpop.f32.mrb[74].mxu0 }
 0x732   :  { %v4372_v6 = vpack.c.bf16 %v9480_v22, %v9476_v3  ;;  %v9484_v10 = vpop.f32.mrb[75].mxu0  ;;  %v4792_v3 = vld [vmem:[%s10127_s5 + $0x8] sm:$0xff]  ;;  %v4564_v22 = vld [vmem:[#allocation2 + $0x230] sm:$0xff] }
 0x733   :  { %v4373_v13 = vpack.c.bf16 %v9484_v10, %v9478_v42  ;;  %v4808_v42 = vld [vmem:[%s10127_s5 + $0x88] sm:$0xff]  ;;  %v4791_v10 = vld [vmem:[%s10127_s5] sm:$0xff] }
 0x737   :  { %v4311_v14 = vpop.f32.mrb[76].mxu0 }
 0x738   :  { %v4313_v34 = vpop.f32.mrb[77].mxu0 }
 0x739   :  { %v4315_v39 = vpop.f32.mrb[78].mxu0 }
 0x73a   :  { %v4374_v60 = vpack.c.bf16 %v4315_v39, %v4311_v14  ;;  %v4317_v12 = vpop.f32.mrb[79].mxu0  ;;  %v4415_v14 = vld [vmem:[#allocation2 + $0xe8] sm:$0xff]  ;;  %v4414_v39 = vld [vmem:[#allocation2 + $0xe0] sm:$0xff] }
 0x73b   :  { %v4375_v16 = vpack.c.bf16 %v4317_v12, %v4313_v34  ;;  %v4417_v12 = vld [vmem:[#allocation2 + $0xf8] sm:$0xff] }
 0x73d   :  { %4483 = vmatprep.mubr.bf16.mxu0 %v4375_v16 }
 0x73e   :  { %4484 = vmatmul.mubr.bf16.vlgmr.msra.gmra.mrb[100].mxu0 %v4374_v60 }
 0x73f   :  { %4505 = vmatpush1.bf16.msra.mxu0 %v4386_v19  ;;  %v4321_v63 = vpop.f32.mrb[80].mxu0 }
 0x740   :  { %v4323_v44 = vpop.f32.mrb[81].mxu0  ;;  %4506 = vmatprep.subr.bf16.mxu0 %v4389_v5 }
 0x741   :  { %v4325_v48 = vpop.f32.mrb[82].mxu0 }
 0x742   :  { %v4376_v61 = vpack.c.bf16 %v4325_v48, %v4321_v63  ;;  %v4327_v26 = vpop.f32.mrb[83].mxu0 }
 0x743   :  { %v4377_v50 = vpack.c.bf16 %v4327_v26, %v4323_v44  ;;  %4507 = vmatpush1.bf16.msra.mxu0 %v4388_v45  ;;  %v4416_v44 = vld [vmem:[#allocation2 + $0xf0] sm:$0xff]  ;;  %v4559_v45 = vld [vmem:[#allocation2 + $0x208] sm:$0xff]  ;;  %v4561_v26 = vld [vmem:[#allocation2 + $0x218] sm:$0xff] }
 0x744   :  { %4508 = vmatprep.subr.bf16.mxu0 %v4391_v18  ;;  %v4558_v18 = vld [vmem:[#allocation2 + $0x200] sm:$0xff] }
 0x745   :  { %4493 = vmatprep.mubr.bf16.mxu0 %v4377_v50 }
 0x746   :  { %4494 = vmatmul.mubr.bf16.gmra.mrb[104].mxu0 %v4376_v61 }
 0x747   :  { %4509 = vmatpush1.bf16.msra.mxu0 %v4390_v51  ;;  %4536 = vmatprep.mubr.bf16.mxu0 %v4371_v38  ;;  %v9488_v58 = vpop.f32.mrb[84].mxu0  ;;  %v4412_v38 = vld [vmem:[#allocation2 + $0xd0] sm:$0xff] }
 0x748   :  { %4510 = vmatprep.subr.bf16.mxu0 %v4393_v57  ;;  %v9490_v0 = vpop.f32.mrb[85].mxu0 }
 0x749   :  { %v9492_v1 = vpop.f32.mrb[86].mxu0 }
 0x74a   :  { %v4378_v29 = vpack.c.bf16 %v9492_v1, %v9488_v58  ;;  %v9496_v37 = vpop.f32.mrb[87].mxu0  ;;  %v4658_v58 = vld [vmem:[#allocation2 + $0x330] sm:$0xff]  ;;  %v4661_v1 = vld [vmem:[#allocation2 + $0x348] sm:$0xff] }
 0x74b   :  { %4511 = vmatpush1.bf16.msra.mxu0 %v4392_v27  ;;  %v4379_v40 = vpack.c.bf16 %v9496_v37, %v9490_v0  ;;  %v4571_v0 = vld [vmem:[#allocation2 + $0x268] sm:$0xff]  ;;  %v4570_v37 = vld [vmem:[#allocation2 + $0x260] sm:$0xff] }
 0x74c   :  { %4512 = vmatprep.subr.bf16.mxu0 %v4395_v2  ;;  %v4560_v2 = vld [vmem:[#allocation2 + $0x210] sm:$0xff] }
 0x74f   :  { %4513 = vmatpush1.bf16.msra.mxu0 %v4394_v24  ;;  %v9500_v46 = vpop.f32.mrb[88].mxu0  ;;  %v4563_v24 = vld [vmem:[#allocation2 + $0x228] sm:$0xff] }
 0x750   :  { %4514 = vmatprep.subr.bf16.mxu0 %v4397_v30  ;;  %v9502_v47 = vpop.f32.mrb[89].mxu0  ;;  %v4567_v30 = vld [vmem:[#allocation2 + $0x248] sm:$0xff] }
 0x751   :  { %v9504_v31 = vpop.f32.mrb[90].mxu0 }
 0x752   :  { %v4380_v33 = vpack.c.bf16 %v9504_v31, %v9500_v46  ;;  %v9508_v41 = vpop.f32.mrb[91].mxu0  ;;  %v4664_v46 = vld [vmem:[#allocation2 + $0x360] sm:$0xff]  ;;  %v4667_v31 = vld [vmem:[#allocation2 + $0x378] sm:$0xff] }
 0x753   :  { %4515 = vmatpush1.bf16.msra.mxu0 %v4396_v9  ;;  %v4381_v59 = vpack.c.bf16 %v9508_v41, %v9502_v47  ;;  %v4566_v9 = vld [vmem:[#allocation2 + $0x240] sm:$0xff]  ;;  %v4663_v47 = vld [vmem:[#allocation2 + $0x358] sm:$0xff]  ;;  %v4662_v41 = vld [vmem:[#allocation2 + $0x350] sm:$0xff] }
 0x754   :  { %4516 = vmatprep.subr.bf16.mxu0 %v4399_v20  ;;  %v4569_v20 = vld [vmem:[#allocation2 + $0x258] sm:$0xff] }
 0x757   :  { %4517 = vmatpush1.bf16.msra.mxu0 %v4398_v23  ;;  %v9512_v34 = vpop.f32.mrb[92].mxu0  ;;  %v4568_v23 = vld [vmem:[#allocation2 + $0x250] sm:$0xff] }
 0x758   :  { %4518 = vmatprep.subr.bf16.mxu0 %v4401_v7  ;;  %v9514_v60 = vpop.f32.mrb[93].mxu0  ;;  %v4572_v7 = vld [vmem:[#allocation2 + $0x270] sm:$0xff] }
 0x759   :  { %v9516_v16 = vpop.f32.mrb[94].mxu0 }
 0x75a   :  { %v4382_v19 = vpack.c.bf16 %v9516_v16, %v9512_v34  ;;  %v9520_v5 = vpop.f32.mrb[95].mxu0  ;;  %v4793_v34 = vld [vmem:[%s10127_s5 + $0x10] sm:$0xff]  ;;  %v4794_v16 = vld [vmem:[%s10127_s5 + $0x18] sm:$0xff] }
 0x75b   :  { %4519 = vmatpush1.bf16.msra.mxu0 %v4400_v54  ;;  %v4383_v63 = vpack.c.bf16 %v9520_v5, %v9514_v60  ;;  %v4575_v54 = vld [vmem:[#allocation2 + $0x288] sm:$0xff]  ;;  %v4668_v5 = vld [vmem:[#allocation2 + $0x380] sm:$0xff] }
 0x75c   :  { %4520 = vmatprep.subr.bf16.mxu0 %v4403_v62  ;;  %v4574_v62 = vld [vmem:[#allocation2 + $0x280] sm:$0xff]  ;;  %v4669_v60 = vld [vmem:[#allocation2 + $0x388] sm:$0xff] }
 0x75f   :  { %4521 = vmatpush1.bf16.msra.mxu0 %v4402_v36  ;;  %v9524_v48 = vpop.f32.mrb[96].mxu0  ;;  %v4577_v36 = vld [vmem:[#allocation2 + $0x298] sm:$0xff] }
 0x760   :  { %4522 = vmatprep.subr.bf16.mxu0 %v4405_v11  ;;  %v9526_v61 = vpop.f32.mrb[97].mxu0  ;;  %v4576_v11 = vld [vmem:[#allocation2 + $0x290] sm:$0xff] }
 0x761   :  { %v9528_v50 = vpop.f32.mrb[98].mxu0 }
 0x762   :  { %v4384_v51 = vpack.c.bf16 %v9528_v50, %v9524_v48  ;;  %v9535_v57 = vpop.f32.mrb[99].mxu0  ;;  %v4811_v48 = vld [vmem:[%s10127_s5 + $0xa0] sm:$0xff] }
 0x763   :  { %4523 = vmatpush1.bf16.msra.mxu0 %v4404_v28  ;;  %v4385_v27 = vpack.c.bf16 %v9535_v57, %v9526_v61  ;;  %v4579_v28 = vld [vmem:[#allocation2 + $0x2a8] sm:$0xff] }
 0x764   :  { %4524 = vmatprep.subr.bf16.mxu0 %v4407_v15  ;;  %v4578_v15 = vld [vmem:[#allocation2 + $0x2a0] sm:$0xff]  ;;  %v4812_v61 = vld [vmem:[%s10127_s5 + $0xa8] sm:$0xff] }
 0x765   :  { %v6696_v50 = vpack.c.bf16 %v4812_v61, %v4811_v48  ;;  %v4796_v57 = vld [vmem:[%s10127_s5 + $0x28] sm:$0xff] }
 0x767   :  { %4525 = vmatpush1.bf16.msra.mxu0 %v4406_v56  ;;  %v4581_v56 = vld [vmem:[#allocation2 + $0x2b8] sm:$0xff] }
 0x768   :  { %4526 = vmatprep.subr.bf16.mxu0 %v4409_v49  ;;  %v4580_v49 = vld [vmem:[#allocation2 + $0x2b0] sm:$0xff] }
 0x76b   :  { %4527 = vmatpush1.bf16.msra.mxu0 %v4408_v21  ;;  %v4583_v21 = vld [vmem:[#allocation2 + $0x2c8] sm:$0xff] }
 0x76c   :  { %4528 = vmatprep.subr.bf16.mxu0 %v4411_v43  ;;  %v4582_v43 = vld [vmem:[#allocation2 + $0x2c0] sm:$0xff] }
 0x76f   :  { %4529 = vmatpush1.bf16.msra.mxu0 %v4410_v8  ;;  %v4585_v8 = vld [vmem:[#allocation2 + $0x2d8] sm:$0xff] }
 0x770   :  { %4530 = vmatprep.subr.bf16.mxu0 %v4413_v32  ;;  %v4584_v32 = vld [vmem:[#allocation2 + $0x2d0] sm:$0xff] }
 0x773   :  { %4531 = vmatpush1.bf16.msra.mxu0 %v4412_v38  ;;  %v4587_v38 = vld [vmem:[#allocation2 + $0x2e8] sm:$0xff] }
 0x774   :  { %4532 = vmatprep.subr.bf16.mxu0 %v4415_v14  ;;  %v4586_v14 = vld [vmem:[#allocation2 + $0x2e0] sm:$0xff] }
 0x777   :  { %4533 = vmatpush1.bf16.msra.mxu0 %v4414_v39  ;;  %v4589_v39 = vld [vmem:[#allocation2 + $0x2f8] sm:$0xff] }
 0x778   :  { %4534 = vmatprep.subr.bf16.mxu0 %v4417_v12  ;;  %v4588_v12 = vld [vmem:[#allocation2 + $0x2f0] sm:$0xff] }
 0x77b   :  { %4535 = vmatpush1.bf16.msra.mxu0 %v4416_v44  ;;  %v4653_v44 = vld [vmem:[#allocation2 + $0x308] sm:$0xff] }
 0x77c   :  { %4590 = vmatprep.subr.bf16.mxu0 %v4559_v45  ;;  %v4652_v45 = vld [vmem:[#allocation2 + $0x300] sm:$0xff] }
 0x77e   :  { %4537 = vmatmul.mubr.bf16.vlgmr.msra.gmra.mrb[100].mxu0 %v4370_v55  ;;  %v4807_v55 = vld [vmem:[%s10127_s5 + $0x80] sm:$0xff] }
 0x77f   :  { %4546 = vmatprep.mubr.bf16.mxu0 %v4373_v13  ;;  %4591 = vmatpush1.bf16.msra.mxu0 %v4558_v18  ;;  %v6688_v13 = vpack.c.bf16 %v4808_v42, %v4807_v55  ;;  %v4655_v18 = vld [vmem:[#allocation2 + $0x318] sm:$0xff]  ;;  %v4673_v55 = vld [vmem:[#allocation2 + $0x3a8] sm:$0xff]  ;;  %v4672_v42 = vld [vmem:[#allocation2 + $0x3a0] sm:$0xff] }
 0x780   :  { %4592 = vmatprep.subr.bf16.mxu0 %v4561_v26  ;;  %v4654_v26 = vld [vmem:[#allocation2 + $0x310] sm:$0xff] }
 0x781   :  { %6689 = vmatprep.subr.bf16.mxu1 %v6688_v13  ;;  %v4674_v13 = vld [vmem:[#allocation2 + $0x3b0] sm:$0xff] }
 0x783   :  { %4593 = vmatpush1.bf16.msra.mxu0 %v4560_v2  ;;  %v4657_v2 = vld [vmem:[#allocation2 + $0x328] sm:$0xff] }
 0x784   :  { %4594 = vmatprep.subr.bf16.mxu0 %v4563_v24  ;;  %v4656_v24 = vld [vmem:[#allocation2 + $0x320] sm:$0xff] }
 0x786   :  { %4547 = vmatmul.mubr.bf16.gmra.mrb[104].mxu0 %v4372_v6  ;;  %v6690_v6 = vpack.c.bf16 %v4792_v3, %v4791_v10  ;;  %v4675_v10 = vld [vmem:[#allocation2 + $0x3b8] sm:$0xff]  ;;  %v4677_v3 = vld [vmem:[#allocation2 + $0x3c8] sm:$0xff] }
 0x787   :  { %4595 = vmatpush1.bf16.msra.mxu0 %v4562_v35  ;;  %4622 = vmatprep.mubr.bf16.mxu0 %v4379_v40  ;;  %v4573_v40 = vld [vmem:[#allocation2 + $0x278] sm:$0xff] }
 0x788   :  { %4596 = vmatprep.subr.bf16.mxu0 %v4565_v53  ;;  %6691 = vmatpush3.bf16.msra.mxu1 %v6690_v6  ;;  %v4659_v35 = vld [vmem:[#allocation2 + $0x338] sm:$0xff]  ;;  %v4670_v53 = vld [vmem:[#allocation2 + $0x390] sm:$0xff] }
 0x789   :  { %v4679_v6 = vld [vmem:[#allocation2 + $0x3d8] sm:$0xff] }
 0x78b   :  { %4597 = vmatpush1.bf16.msra.mxu0 %v4564_v22  ;;  %v4676_v22 = vld [vmem:[#allocation2 + $0x3c0] sm:$0xff] }
 0x78c   :  { %4598 = vmatprep.subr.bf16.mxu0 %v4567_v30  ;;  %v4678_v30 = vld [vmem:[#allocation2 + $0x3d0] sm:$0xff] }
 0x78f   :  { %4599 = vmatpush1.bf16.msra.mxu0 %v4566_v9  ;;  %v4681_v9 = vld [vmem:[#allocation2 + $0x3e8] sm:$0xff] }
 0x790   :  { %4600 = vmatprep.subr.bf16.mxu0 %v4569_v20  ;;  %v4680_v20 = vld [vmem:[#allocation2 + $0x3e0] sm:$0xff] }
 0x793   :  { %4601 = vmatpush1.bf16.msra.mxu0 %v4568_v23  ;;  %v4683_v23 = vld [vmem:[#allocation2 + $0x3f8] sm:$0xff] }
 0x794   :  { %4602 = vmatprep.subr.bf16.mxu0 %v4571_v0  ;;  %v4682_v0 = vld [vmem:[#allocation2 + $0x3f0] sm:$0xff] }
 0x797   :  { %4603 = vmatpush1.bf16.msra.mxu0 %v4570_v37  ;;  %v4809_v37 = vld [vmem:[%s10127_s5 + $0x90] sm:$0xff] }
 0x798   :  { %4604 = vmatprep.subr.bf16.mxu0 %v4573_v40  ;;  %v4810_v40 = vld [vmem:[%s10127_s5 + $0x98] sm:$0xff] }
 0x79b   :  { %4605 = vmatpush1.bf16.msra.mxu0 %v4572_v7  ;;  %v6692_v7 = vpack.c.bf16 %v4810_v40, %v4809_v37 }
 0x79c   :  { %4606 = vmatprep.subr.bf16.mxu0 %v4575_v54  ;;  %v4813_v54 = vld [vmem:[%s10127_s5 + $0xb0] sm:$0xff] }
 0x79d   :  { %6693 = vmatprep.subr.bf16.mxu1 %v6692_v7 }
 0x79f   :  { %4607 = vmatpush1.bf16.msra.mxu0 %v4574_v62  ;;  %v4814_v62 = vld [vmem:[%s10127_s5 + $0xb8] sm:$0xff] }
 0x7a0   :  { %4608 = vmatprep.subr.bf16.mxu0 %v4577_v36  ;;  %v6700_v36 = vpack.c.bf16 %v4814_v62, %v4813_v54 }
 0x7a3   :  { %4609 = vmatpush1.bf16.msra.mxu0 %v4576_v11  ;;  %v4797_v11 = vld [vmem:[%s10127_s5 + $0x30] sm:$0xff] }
 0x7a4   :  { %4610 = vmatprep.subr.bf16.mxu0 %v4579_v28  ;;  %v4798_v28 = vld [vmem:[%s10127_s5 + $0x38] sm:$0xff] }
 0x7a7   :  { %4611 = vmatpush1.bf16.msra.mxu0 %v4578_v15  ;;  %v6702_v15 = vpack.c.bf16 %v4798_v28, %v4797_v11 }
 0x7a8   :  { %4612 = vmatprep.subr.bf16.mxu0 %v4581_v56  ;;  %v4815_v56 = vld [vmem:[%s10127_s5 + $0xc0] sm:$0xff] }
 0x7ab   :  { %4613 = vmatpush1.bf16.msra.mxu0 %v4580_v49  ;;  %v4816_v49 = vld [vmem:[%s10127_s5 + $0xc8] sm:$0xff] }
 0x7ac   :  { %4614 = vmatprep.subr.bf16.mxu0 %v4583_v21  ;;  %v6704_v21 = vpack.c.bf16 %v4816_v49, %v4815_v56 }
 0x7af   :  { %4615 = vmatpush1.bf16.msra.mxu0 %v4582_v43  ;;  %v4799_v43 = vld [vmem:[%s10127_s5 + $0x40] sm:$0xff] }
 0x7b0   :  { %4616 = vmatprep.subr.bf16.mxu0 %v4585_v8  ;;  %v4800_v8 = vld [vmem:[%s10127_s5 + $0x48] sm:$0xff] }
 0x7b3   :  { %4617 = vmatpush1.bf16.msra.mxu0 %v4584_v32  ;;  %v6706_v32 = vpack.c.bf16 %v4800_v8, %v4799_v43 }
 0x7b4   :  { %4618 = vmatprep.subr.bf16.mxu0 %v4587_v38  ;;  %v4817_v38 = vld [vmem:[%s10127_s5 + $0xd0] sm:$0xff] }
 0x7b7   :  { %4619 = vmatpush1.bf16.msra.mxu0 %v4586_v14  ;;  %v4818_v14 = vld [vmem:[%s10127_s5 + $0xd8] sm:$0xff] }
 0x7b8   :  { %4620 = vmatprep.subr.bf16.mxu0 %v4589_v39  ;;  %v6708_v39 = vpack.c.bf16 %v4818_v14, %v4817_v38 }
 0x7bb   :  { %4621 = vmatpush1.bf16.msra.mxu0 %v4588_v12  ;;  %v4801_v12 = vld [vmem:[%s10127_s5 + $0x50] sm:$0xff] }
 0x7bc   :  { %4684 = vmatprep.subr.bf16.mxu0 %v4653_v44  ;;  %v4802_v44 = vld [vmem:[%s10127_s5 + $0x58] sm:$0xff] }
 0x7be   :  { %4623 = vmatmul.mubr.bf16.vlgmr.msra.gmra.mrb[100].mxu0 %v4378_v29  ;;  %v4660_v29 = vld [vmem:[#allocation2 + $0x340] sm:$0xff] }
 0x7bf   :  { %4685 = vmatpush1.bf16.msra.mxu0 %v4652_v45  ;;  %4632 = vmatprep.mubr.bf16.mxu0 %v4381_v59  ;;  %v4665_v59 = vld [vmem:[#allocation2 + $0x368] sm:$0xff]  ;;  %v6710_v45 = vpack.c.bf16 %v4802_v44, %v4801_v12 }
 0x7c0   :  { %4686 = vmatprep.subr.bf16.mxu0 %v4655_v18  ;;  %v4819_v18 = vld [vmem:[%s10127_s5 + $0xe0] sm:$0xff] }
 0x7c3   :  { %4687 = vmatpush1.bf16.msra.mxu0 %v4654_v26  ;;  %v4820_v26 = vld [vmem:[%s10127_s5 + $0xe8] sm:$0xff] }
 0x7c4   :  { %4688 = vmatprep.subr.bf16.mxu0 %v4657_v2  ;;  %v4803_v2 = vld [vmem:[%s10127_s5 + $0x60] sm:$0xff] }
 0x7c6   :  { %4633 = vmatmul.mubr.bf16.gmra.mrb[104].mxu0 %v4380_v33  ;;  %v4666_v33 = vld [vmem:[#allocation2 + $0x370] sm:$0xff] }
 0x7c7   :  { %4689 = vmatpush1.bf16.msra.mxu0 %v4656_v24  ;;  %4716 = vmatprep.mubr.bf16.mxu0 %v4383_v63  ;;  %v4671_v63 = vld [vmem:[#allocation2 + $0x398] sm:$0xff]  ;;  %v6712_v24 = vpack.c.bf16 %v4820_v26, %v4819_v18 }
 0x7c8   :  { %4690 = vmatprep.subr.bf16.mxu0 %v4659_v35  ;;  %v4804_v35 = vld [vmem:[%s10127_s5 + $0x68] sm:$0xff] }
 0x7cb   :  { %4691 = vmatpush1.bf16.msra.mxu0 %v4658_v58  ;;  %v4821_v58 = vld [vmem:[%s10127_s5 + $0xf0] sm:$0xff] }
 0x7cc   :  { %4692 = vmatprep.subr.bf16.mxu0 %v4661_v1  ;;  %v4822_v1 = vld [vmem:[%s10127_s5 + $0xf8] sm:$0xff] }
 0x7cf   :  { %4693 = vmatpush1.bf16.msra.mxu0 %v4660_v29  ;;  %v6714_v29 = vpack.c.bf16 %v4804_v35, %v4803_v2 }
 0x7d0   :  { %4694 = vmatprep.subr.bf16.mxu0 %v4663_v47  ;;  %v6716_v47 = vpack.c.bf16 %v4822_v1, %v4821_v58  ;;  %v4895_v1 = vld [vmem:[%s10128_s0 + $0x8] sm:$0xff] }
 0x7d3   :  { %4695 = vmatpush1.bf16.msra.mxu0 %v4662_v41  ;;  %v4805_v41 = vld [vmem:[%s10127_s5 + $0x70] sm:$0xff] }
 0x7d4   :  { %4696 = vmatprep.subr.bf16.mxu0 %v4665_v59  ;;  %v4806_v59 = vld [vmem:[%s10127_s5 + $0x78] sm:$0xff] }
 0x7d7   :  { %4697 = vmatpush1.bf16.msra.mxu0 %v4664_v46  ;;  %v6718_v46 = vpack.c.bf16 %v4806_v59, %v4805_v41  ;;  %v4894_v41 = vld [vmem:[%s10128_s0] sm:$0xff]  ;;  %v4896_v59 = vld [vmem:[%s10128_s0 + $0x10] sm:$0xff] }
 0x7d8   :  { %4698 = vmatprep.subr.bf16.mxu0 %v4667_v31 }
 0x7db   :  { %4699 = vmatpush1.bf16.msra.mxu0 %v4666_v33 }
 0x7dc   :  { %4700 = vmatprep.subr.bf16.mxu0 %v4669_v60 }
 0x7df   :  { %4701 = vmatpush1.bf16.msra.mxu0 %v4668_v5 }
 0x7e0   :  { %4702 = vmatprep.subr.bf16.mxu0 %v4671_v63 }
 0x7e3   :  { %4703 = vmatpush1.bf16.msra.mxu0 %v4670_v53 }
 0x7e4   :  { %4704 = vmatprep.subr.bf16.mxu0 %v4673_v55 }
 0x7e7   :  { %4705 = vmatpush1.bf16.msra.mxu0 %v4672_v42 }
 0x7e8   :  { %4706 = vmatprep.subr.bf16.mxu0 %v4675_v10 }
 0x7eb   :  { %4707 = vmatpush1.bf16.msra.mxu0 %v4674_v13 }
 0x7ec   :  { %4708 = vmatprep.subr.bf16.mxu0 %v4677_v3 }
 0x7ef   :  { %4709 = vmatpush1.bf16.msra.mxu0 %v4676_v22 }
 0x7f0   :  { %4710 = vmatprep.subr.bf16.mxu0 %v4679_v6 }
 0x7f3   :  { %4711 = vmatpush1.bf16.msra.mxu0 %v4678_v30 }
 0x7f4   :  { %4712 = vmatprep.subr.bf16.mxu0 %v4681_v9 }
 0x7f7   :  { %4713 = vmatpush1.bf16.msra.mxu0 %v4680_v20 }
 0x7f8   :  { %4714 = vmatprep.subr.bf16.mxu0 %v4683_v23 }
 0x7fb   :  { %4715 = vmatpush1.bf16.msra.mxu0 %v4682_v0 }
 0x7fe   :  { %4717 = vmatmul.mubr.bf16.vlgmr.msra.gmra.mrb[100].mxu0 %v4382_v19  ;;  %v6694_v19 = vpack.c.bf16 %v4794_v16, %v4793_v34 }
 0x7ff   :  { %4726 = vmatprep.mubr.bf16.mxu0 %v4385_v27 }
 0x800   :  { %6695 = vmatpush3.bf16.msra.mxu1 %v6694_v19 }
 0x801   :  { %6697 = vmatprep.subr.bf16.mxu1 %v6696_v50 }
 0x806   :  { %4727 = vmatmul.mubr.bf16.gmra.mrb[104].mxu0 %v4384_v51  ;;  %v4795_v51 = vld [vmem:[%s10127_s5 + $0x20] sm:$0xff] }
 0x807   :  { %v6698_v27 = vpack.c.bf16 %v4796_v57, %v4795_v51 }
 0x809   :  { %6699 = vmatpush3.bf16.msra.mxu1 %v6698_v27 }
 0x80a   :  { %6701 = vmatprep.subr.bf16.mxu1 %v6700_v36 }
 0x80d   :  { %6703 = vmatpush3.bf16.msra.mxu1 %v6702_v15 }
 0x80e   :  { %6705 = vmatprep.subr.bf16.mxu1 %v6704_v21 }
 0x811   :  { %6707 = vmatpush3.bf16.msra.mxu1 %v6706_v32 }
 0x812   :  { %6709 = vmatprep.subr.bf16.mxu1 %v6708_v39 }
 0x815   :  { %6711 = vmatpush3.bf16.msra.mxu1 %v6710_v45 }
 0x816   :  { %6713 = vmatprep.subr.bf16.mxu1 %v6712_v24 }
 0x819   :  { %6715 = vmatpush3.bf16.msra.mxu1 %v6714_v29  ;;  %v4897_v29 = vld [vmem:[%s10128_s0 + $0x18] sm:$0xff] }
 0x81a   :  { %6717 = vmatprep.subr.bf16.mxu1 %v6716_v47  ;;  %v6720_v47 = vpack.c.bf16 %v4897_v29, %v4895_v1 }
 0x81d   :  { %6719 = vmatpush3.bf16.msra.mxu1 %v6718_v46  ;;  %v6722_v46 = vpack.c.bf16 %v4896_v59, %v4894_v41 }
 0x81e   :  { %6721 = vmatprep.subr.bf16.mxu1 %v6720_v47 }
 0x8d1   :  { %v9665_v31 = vpop.f32.mrb[100].mxu0 }
 0x8d2   :  { %v9667_v33 = vpop.f32.mrb[101].mxu0  ;;  %v4763_v5 = vmul.f32 %v9665_v31, %v9665_v31 }
 0x8d3   :  { %v9669_v60 = vpop.f32.mrb[102].mxu0  ;;  %v4764_v42 = vmul.f32 %v9667_v33, %v9667_v33 }
 0x8d4   :  { %v4745_v63 = vadd.f32 %v9669_v60, %v9665_v31  ;;  %v4765_v53 = vmul.f32 %v9669_v60, %v9669_v60  ;;  %v9677_v55 = vpop.f32.mrb[103].mxu0 }
 0x8d5   :  { %v4754_v10 = vadd.f32 %v9677_v55, %v9667_v33  ;;  %v4766_v13 = vmul.f32 %v9677_v55, %v9677_v55 }
 0x8d6   :  { %v4771_v3 = vadd.f32 %v4765_v53, %v4763_v5 }
 0x8d7   :  { %v4780_v22 = vadd.f32 %v4766_v13, %v4764_v42 }
 0x8d9   :  { %v9685_v6 = vpop.f32.mrb[104].mxu0 }
 0x8da   :  { %v4746_v30 = vadd.f32 %v4745_v63, %v9685_v6  ;;  %v4767_v9 = vmul.f32 %v9685_v6, %v9685_v6  ;;  %v9690_v20 = vpop.f32.mrb[105].mxu0 }
 0x8db   :  { %v4755_v23 = vadd.f32 %v4754_v10, %v9690_v20  ;;  %v4768_v0 = vmul.f32 %v9690_v20, %v9690_v20  ;;  %v9695_v37 = vpop.f32.mrb[106].mxu0 }
 0x8dc   :  { %v4772_v40 = vadd.f32 %v4771_v3, %v4767_v9  ;;  %v4747_v7 = vadd.f32 %v4746_v30, %v9695_v37  ;;  %v4769_v34 = vmul.f32 %v9695_v37, %v9695_v37  ;;  %v9700_v16 = vpop.f32.mrb[107].mxu0 }
 0x8dd   :  { %v4781_v19 = vadd.f32 %v4780_v22, %v4768_v0  ;;  %v4756_v48 = vadd.f32 %v4755_v23, %v9700_v16  ;;  %v4770_v61 = vmul.f32 %v9700_v16, %v9700_v16 }
 0x8de   :  { %v4748_v50 = vrot.slane %v4747_v7, 4  ;;  %v4773_v51 = vadd.f32 %v4772_v40, %v4769_v34 }
 0x8df   :  { %v4757_v57 = vrot.slane %v4756_v48, 4  ;;  %v4782_v27 = vadd.f32 %v4781_v19, %v4770_v61 }
 0x8e0   :  { %v4749_v54 = vadd.f32 %v4748_v50, %v4747_v7  ;;  %v4774_v62 = vrot.slane %v4773_v51, 4 }
 0x8e1   :  { %v4758_v36 = vadd.f32 %v4757_v57, %v4756_v48  ;;  %v4783_v11 = vrot.slane %v4782_v27, 4 }
 0x8e2   :  { %v4750_v28 = vrot.slane %v4749_v54, 2  ;;  %v4775_v15 = vadd.f32 %v4774_v62, %v4773_v51 }
 0x8e3   :  { %v4759_v56 = vrot.slane %v4758_v36, 2  ;;  %v4784_v49 = vadd.f32 %v4783_v11, %v4782_v27 }
 0x8e4   :  { %v4751_v21 = vadd.f32 %v4750_v28, %v4749_v54  ;;  %v4776_v43 = vrot.slane %v4775_v15, 2 }
 0x8e5   :  { %v4760_v8 = vadd.f32 %v4759_v56, %v4758_v36  ;;  %v4785_v32 = vrot.slane %v4784_v49, 2 }
 0x8e6   :  { %v4752_v38 = vrot.slane %v4751_v21, 1  ;;  %v4777_v14 = vadd.f32 %v4776_v43, %v4775_v15 }
 0x8e7   :  { %v4761_v39 = vrot.slane %v4760_v8, 1  ;;  %v4786_v12 = vadd.f32 %v4785_v32, %v4784_v49 }
 0x8e8   :  { %v4778_v44 = vrot.slane %v4777_v14, 1  ;;  %v4753_v18 = vadd.f32 %v4752_v38, %v4751_v21 }
 0x8e9   :  { %v4787_v45 = vrot.slane %v4786_v12, 1  ;;  %v4762_v2 = vadd.f32 %v4761_v39, %v4760_v8 }
 0x8ea   :  { %v4779_v26 = vadd.f32 %v4778_v44, %v4777_v14 }
 0x8eb   :  { %v4788_v24 = vadd.f32 %v4787_v45, %v4786_v12 }
 0x8ec   :  { %v4789_v35 = vsel %vm3813_vm1, %v4753_v18, %v4779_v26 }
 0x8ed   :  { %v4790_v58 = vsel %vm3813_vm1, %v4762_v2, %v4788_v24 }
 0x8ee   :  { %4887 = vmatprep.mubr.f32.mxu1 %v4790_v58 }
 0x8ef   :  { %4888 = vmatmul.mubr.f32.vlgmr.msra.gmra.mrb[16].mxu1 %v4789_v35 }
 0x8f0   :  { %4966 = vmatprep.mubr.f32.mxu1 %v7370_v25  ;;  %6723 = vmatpush1.bf16.msra.mxu1 %v6722_v46 }
 0x9c2   :  { %v6551_v5 = vpop.f32.mrb[16].mxu1 }
 0x9c3   :  { %v6552_v63 = vpop.f32.mrb[17].mxu1 }
 0x9c4   :  { %v6553_v53 = vadd.f32 %v6552_v63, %v6551_v5 }
 0x9c6   :  { %v4893_v42 = vmul.f32 0.001953125, %v6553_v53 }
 0x9c8   :  { %6443 = vmatmul.mubr.msk.f32.vlgmr.msra.gmra.mrb[18].mxu1 %vm4898_vm0, %v4893_v42 }
 0xa9b   :  { %v4968_v10 = vpop.f32.mrb[18].mxu1 }
 0xa9c   :  { %v4973_v13 = vmul.f32 %v4968_v10, %v4968_v10  ;;  %v4988_v3 = vrot.slane %v4968_v10, %v9315_v52  ;;  %v4970_v22 = vpop.f32.mrb[19].mxu1 }
 0xa9d   :  { %v4974_v30 = vmul.f32 %v4970_v22, %v4970_v22  ;;  %v4992_v9 = vrot.slane %v4970_v22, %v9315_v52 }
 0xa9e   :  { %v4977_v23 = vrot.slane %v4973_v13, 7  ;;  %v4993_v0 = vsub.f32 %v9665_v31, %v4988_v3  ;;  %v4995_v40 = vsub.f32 %v9669_v60, %v4988_v3  ;;  %v4997_v7 = vsub.f32 %v9685_v6, %v4988_v3  ;;  %v5021_v60 = vld [vmem:[#allocation11] sm:$0x3]  ;;  %v5041_v6 = vld [vmem:[#allocation13] sm:$0x3] }
 0xa9f   :  { %v4999_v34 = vsub.f32 %v9695_v37, %v4988_v3  ;;  %v4978_v19 = vrot.slane %v4974_v30, 7  ;;  %v4994_v48 = vsub.f32 %v9667_v33, %v4992_v9  ;;  %v4996_v61 = vsub.f32 %v9677_v55, %v4992_v9 }
 0xaa0   :  { %v4981_v50 = vsub.f32 %v4968_v10, %v4977_v23  ;;  %v4998_v51 = vsub.f32 %v9690_v20, %v4992_v9  ;;  %v5000_v57 = vsub.f32 %v9700_v16, %v4992_v9  ;;  %v5026_v55 = vrot.slane %v5021_v60, %v9315_v52 }
 0xaa1   :  { %v4982_v27 = vsub.f32 %v4970_v22, %v4978_v19  ;;  %v5046_v28 = vrot.slane %v5041_v6, %v9315_v52  ;;  %v5030_v16 = vrot.slane %v5021_v60, %v9345_v17  ;;  %v5050_v15 = vrot.slane %v5041_v6, %v9345_v17 }
 0xaa2   :  { %v4983_v54 = vmax.f32 %v4981_v50, 0.0 }
 0xaa3   :  { %v4984_v62 = vmax.f32 %v4982_v27, 0.0 }
 0xaa4   :  { %v5001_v31 = vadd.f32 1e-05, %v4983_v54 }
 0xaa5   :  { %v5002_v36 = vadd.f32 1e-05, %v4984_v62 }
 0xaa6   :  { %7060 = vrsqrt.f32 %v5001_v31 }
 0xaa7   :  { %7062 = vrsqrt.f32 %v5002_v36 }
 0xab0   :  { %v7061_v37 = vpop.eup %7060 }
 0xab1   :  { %v7063_v11 = vpop.eup %7062  ;;  %v5008_v33 = vrot.slane %v7061_v37, %v9345_v17 }
 0xab2   :  { %v5012_v20 = vrot.slane %v7063_v11, %v9345_v17 }
 0xab3   :  { %v5013_v56 = vmul.f32 %v5008_v33, %v4993_v0  ;;  %v5015_v49 = vmul.f32 %v5008_v33, %v4995_v40  ;;  %v5017_v21 = vmul.f32 %v5008_v33, %v4997_v7  ;;  %v5019_v43 = vmul.f32 %v5008_v33, %v4999_v34 }
 0xab4   :  { %v5014_v8 = vmul.f32 %v5012_v20, %v4994_v48  ;;  %v5016_v32 = vmul.f32 %v5012_v20, %v4996_v61  ;;  %v5018_v38 = vmul.f32 %v5012_v20, %v4998_v51  ;;  %v5020_v14 = vmul.f32 %v5012_v20, %v5000_v57 }
 0xab5   :  { %v5033_v39 = vmul.f32 %v5026_v55, %v5013_v56  ;;  %v5035_v12 = vmul.f32 %v5026_v55, %v5015_v49  ;;  %v5037_v44 = vmul.f32 %v5026_v55, %v5017_v21  ;;  %v5039_v45 = vmul.f32 %v5026_v55, %v5019_v43 }
 0xab6   :  { %v5034_v18 = vmul.f32 %v5030_v16, %v5014_v8  ;;  %v5036_v26 = vmul.f32 %v5030_v16, %v5016_v32  ;;  %v5038_v2 = vmul.f32 %v5030_v16, %v5018_v38  ;;  %v5040_v24 = vmul.f32 %v5030_v16, %v5020_v14 }
 0xab7   :  { %v5053_v35 = vadd.f32 %v5046_v28, %v5033_v39  ;;  %v5055_v58 = vadd.f32 %v5046_v28, %v5035_v12  ;;  %v5057_v1 = vadd.f32 %v5046_v28, %v5037_v44  ;;  %v5059_v29 = vadd.f32 %v5046_v28, %v5039_v45 }
 0xab8   :  { %v5054_v47 = vadd.f32 %v5050_v15, %v5034_v18  ;;  %v5056_v41 = vadd.f32 %v5050_v15, %v5036_v26  ;;  %v5058_v59 = vadd.f32 %v5050_v15, %v5038_v2  ;;  %v5060_v46 = vadd.f32 %v5050_v15, %v5040_v24 }
 0xab9   :  { %vm5061_vm5 = vcmp.gt.f32.partialorder %v5053_v35, 0.0  ;;  %vm5063_vm6 = vcmp.gt.f32.partialorder %v5055_v58, 0.0  ;;  %vm5065_vm7 = vcmp.gt.f32.partialorder %v5057_v1, 0.0  ;;  %vm5067_vm8 = vcmp.gt.f32.partialorder %v5059_v29, 0.0 }
 0xaba   :  { %v5069_v5 = vmul.f32 0.2, %v5053_v35  ;;  %v5071_v63 = vmul.f32 0.2, %v5055_v58  ;;  %v5073_v53 = vmul.f32 0.2, %v5057_v1 }
 0xabb   :  { %v5075_v42 = vmul.f32 0.2, %v5059_v29  ;;  %vm5062_vm9 = vcmp.gt.f32.partialorder %v5054_v47, 0.0  ;;  %vm5064_vm10 = vcmp.gt.f32.partialorder %v5056_v41, 0.0  ;;  %vm5066_vm11 = vcmp.gt.f32.partialorder %v5058_v59, 0.0 }
 0xabc   :  { %v5077_v10 = vsel %vm5061_vm5, %v5053_v35, %v5069_v5  ;;  %v5079_v13 = vsel %vm5063_vm6, %v5055_v58, %v5071_v63  ;;  %v5081_v3 = vsel %vm5065_vm7, %v5057_v1, %v5073_v53  ;;  %vm5068_vm12 = vcmp.gt.f32.partialorder %v5060_v46, 0.0 }
 0xabd   :  { %v5083_v22 = vsel %vm5067_vm8, %v5059_v29, %v5075_v42  ;;  %v5085_v30 = vpack.c.bf16 %v5079_v13, %v5077_v10  ;;  %v5070_v9 = vmul.f32 0.2, %v5054_v47  ;;  %v5072_v23 = vmul.f32 0.2, %v5056_v41 }
 0xabe   :  { %v5087_v0 = vpack.c.bf16 %v5083_v22, %v5081_v3  ;;  %v5074_v40 = vmul.f32 0.2, %v5058_v59  ;;  %v5076_v7 = vmul.f32 0.2, %v5060_v46 }
 0xabf   :  { %v5078_v34 = vsel %vm5062_vm9, %v5054_v47, %v5070_v9  ;;  %v5080_v19 = vsel %vm5064_vm10, %v5056_v41, %v5072_v23 }
 0xac0   :  { %v5082_v48 = vsel %vm5066_vm11, %v5058_v59, %v5074_v40  ;;  %v5084_v61 = vsel %vm5068_vm12, %v5060_v46, %v5076_v7  ;;  %v5086_v50 = vpack.c.bf16 %v5080_v19, %v5078_v34 }
 0xac1   :  { %v5088_v51 = vpack.c.bf16 %v5084_v61, %v5082_v48 }
 0xac2   :  { %7353 = dma.done.wait [#allocation4 + $0x1], 16384 }
 0xac3   :  { %7354 = vsyncadd [#allocation4 + $0x1], 4294950912  ;;  %5132 = vmatprep.subr.bf16.mxu1 %v5086_v50  ;;  %5164 = vmatprep.mubr.bf16.mxu1 %v7369_v4  ;;  %vm5119_vm13 = vcmask 261120   ;;  %v7064_v57 = vld [vmem:[%s10082_s13] sm:$0xff]   ;;  %v5247_v27 = vld [vmem:[#allocation3 + $0x108] sm:$0xff]  ;;  %vm7371_vm3 = vmmov 0  }
 0xac4   :  { %5133 = vmatpush1.bf16.msra.mxu1 %v5085_v30  ;;  %v5246_v54 = vld [vmem:[#allocation3 + $0x100] sm:$0xff]  ;;  %v5249_v62 = vld [vmem:[#allocation3 + $0x118] sm:$0xff]  ;;  %v7065_v31 = vld [vmem:[%s10082_s13 + $0x8] sm:$0xff]   ;;  %vm6219_vm4 = vcmask 41984  }
 0xac5   :  { %5134 = vmatprep.subr.bf16.mxu1 %v5088_v51  ;;  %v5248_v36 = vld [vmem:[#allocation3 + $0x110] sm:$0xff]  ;;  %v5251_v60 = vld [vmem:[#allocation3 + $0x128] sm:$0xff]  ;;  %v5250_v6 = vld [vmem:[#allocation3 + $0x120] sm:$0xff] }
 0xac6   :  { %v5253_v37 = vld [vmem:[#allocation3 + $0x138] sm:$0xff]  ;;  %v7066_v11 = vld [vmem:[%s10082_s13 + $0x10] sm:$0xff]   ;;  %v5255_v55 = vld [vmem:[#allocation3 + $0x148] sm:$0xff] }
 0xac7   :  { %v5252_v33 = vld [vmem:[#allocation3 + $0x130] sm:$0xff]  ;;  %v5254_v28 = vld [vmem:[#allocation3 + $0x140] sm:$0xff]  ;;  %v5257_v20 = vld [vmem:[#allocation3 + $0x158] sm:$0xff] }
 0xac8   :  { %5135 = vmatpush1.bf16.msra.mxu1 %v5087_v0  ;;  %v5256_v16 = vld [vmem:[#allocation3 + $0x150] sm:$0xff]  ;;  %v7067_v15 = vld [vmem:[%s10082_s13 + $0x18] sm:$0xff]   ;;  %v5259_v56 = vld [vmem:[#allocation3 + $0x168] sm:$0xff] }
 0xac9   :  { %5278 = vmatprep.subr.bf16.mxu1 %v5247_v27  ;;  %v5258_v49 = vld [vmem:[#allocation3 + $0x160] sm:$0xff]  ;;  %v5261_v21 = vld [vmem:[#allocation3 + $0x178] sm:$0xff]  ;;  %v5260_v43 = vld [vmem:[#allocation3 + $0x170] sm:$0xff] }
 0xaca   :  { %v5263_v8 = vld [vmem:[#allocation3 + $0x188] sm:$0xff]  ;;  %v5265_v32 = vld [vmem:[#allocation3 + $0x198] sm:$0xff]  ;;  %v5264_v38 = vld [vmem:[#allocation3 + $0x190] sm:$0xff] }
 0xacb   :  { %6448 = vmatmul.mubr.msk.bf16.vlgmr.msra.gmra.mrb[20].mxu1 %vm5119_vm13, %v7064_v57  ;;  %v5267_v14 = vld [vmem:[#allocation3 + $0x1a8] sm:$0xff]  ;;  %v5266_v39 = vld [vmem:[#allocation3 + $0x1a0] sm:$0xff]  ;;  %v5269_v12 = vld [vmem:[#allocation3 + $0x1b8] sm:$0xff] }
 0xacc   :  { %5174 = vmatprep.mubr.bf16.mxu1 %v7369_v4  ;;  %5279 = vmatpush1.bf16.msra.mxu1 %v5246_v54  ;;  %v5268_v44 = vld [vmem:[#allocation3 + $0x1b0] sm:$0xff]  ;;  %v5271_v45 = vld [vmem:[#allocation3 + $0x1c8] sm:$0xff]  ;;  %v5270_v18 = vld [vmem:[#allocation3 + $0x1c0] sm:$0xff] }
 0xacd   :  { %5280 = vmatprep.subr.bf16.mxu1 %v5249_v62  ;;  %v5273_v26 = vld [vmem:[#allocation3 + $0x1d8] sm:$0xff]  ;;  %v5272_v2 = vld [vmem:[#allocation3 + $0x1d0] sm:$0xff]  ;;  %v5275_v24 = vld [vmem:[#allocation3 + $0x1e8] sm:$0xff] }
 0xace   :  { %v5274_v35 = vld [vmem:[#allocation3 + $0x1e0] sm:$0xff]  ;;  %v5277_v58 = vld [vmem:[#allocation3 + $0x1f8] sm:$0xff]  ;;  %v5276_v1 = vld [vmem:[#allocation3 + $0x1f0] sm:$0xff] }
 0xacf   :  { %v5214_v29 = vld [vmem:[#allocation3 + $0x8] sm:$0xff]  ;;  %v5213_v30 = vld [vmem:[#allocation3] sm:$0xff]  ;;  %v5216_v9 = vld [vmem:[#allocation3 + $0x18] sm:$0xff] }
 0xad0   :  { %5281 = vmatpush1.bf16.msra.mxu1 %v5248_v36  ;;  %v5215_v0 = vld [vmem:[#allocation3 + $0x10] sm:$0xff]  ;;  %v5218_v7 = vld [vmem:[#allocation3 + $0x28] sm:$0xff]  ;;  %v5217_v50 = vld [vmem:[#allocation3 + $0x20] sm:$0xff] }
 0xad1   :  { %5282 = vmatprep.subr.bf16.mxu1 %v5251_v60  ;;  %v5220_v51 = vld [vmem:[#allocation3 + $0x38] sm:$0xff]  ;;  %v5219_v57 = vld [vmem:[#allocation3 + $0x30] sm:$0xff]  ;;  %v5222_v27 = vld [vmem:[#allocation3 + $0x48] sm:$0xff] }
 0xad2   :  { %v5221_v54 = vld [vmem:[#allocation3 + $0x40] sm:$0xff]  ;;  %v5224_v62 = vld [vmem:[#allocation3 + $0x58] sm:$0xff]  ;;  %v5226_v36 = vld [vmem:[#allocation3 + $0x68] sm:$0xff] }
 0xad3   :  { %6449 = vmatmul.mubr.msk.bf16.gmra.mrb[24].mxu1 %vm5119_vm13, %v7065_v31  ;;  %v5223_v31 = vld [vmem:[#allocation3 + $0x50] sm:$0xff]  ;;  %v5225_v60 = vld [vmem:[#allocation3 + $0x60] sm:$0xff] }
 0xad4   :  { %5184 = vmatprep.mubr.bf16.mxu1 %v7369_v4  ;;  %5283 = vmatpush1.bf16.msra.mxu1 %v5250_v6  ;;  %v5228_v6 = vld [vmem:[#allocation3 + $0x78] sm:$0xff] }
 0xad5   :  { %5284 = vmatprep.subr.bf16.mxu1 %v5253_v37  ;;  %v5227_v37 = vld [vmem:[#allocation3 + $0x70] sm:$0xff] }
 0xad8   :  { %5285 = vmatpush1.bf16.msra.mxu1 %v5252_v33  ;;  %v5229_v33 = vld [vmem:[#allocation3 + $0x80] sm:$0xff] }
 0xad9   :  { %5286 = vmatprep.subr.bf16.mxu1 %v5255_v55  ;;  %v5232_v55 = vld [vmem:[#allocation3 + $0x98] sm:$0xff] }
 0xadb   :  { %6450 = vmatmul.mubr.msk.bf16.gmra.mrb[28].mxu1 %vm5119_vm13, %v7066_v11  ;;  %v5230_v11 = vld [vmem:[#allocation3 + $0x88] sm:$0xff] }
 0xadc   :  { %5194 = vmatprep.mubr.bf16.mxu1 %v7369_v4  ;;  %5287 = vmatpush1.bf16.msra.mxu1 %v5254_v28  ;;  %v5262_v4 = vld [vmem:[#allocation3 + $0x180] sm:$0xff]  ;;  %v5231_v28 = vld [vmem:[#allocation3 + $0x90] sm:$0xff] }
 0xadd   :  { %5288 = vmatprep.subr.bf16.mxu1 %v5257_v20  ;;  %v5234_v20 = vld [vmem:[#allocation3 + $0xa8] sm:$0xff] }
 0xae0   :  { %5289 = vmatpush1.bf16.msra.mxu1 %v5256_v16  ;;  %v5233_v16 = vld [vmem:[#allocation3 + $0xa0] sm:$0xff] }
 0xae1   :  { %5290 = vmatprep.subr.bf16.mxu1 %v5259_v56  ;;  %v5235_v56 = vld [vmem:[#allocation3 + $0xb0] sm:$0xff] }
 0xae3   :  { %6451 = vmatmul.mubr.msk.bf16.gmra.mrb[32].mxu1 %vm5119_vm13, %v7067_v15  ;;  %v5236_v15 = vld [vmem:[#allocation3 + $0xb8] sm:$0xff] }
 0xae4   :  { %5291 = vmatpush1.bf16.msra.mxu1 %v5258_v49  ;;  %v5238_v49 = vld [vmem:[#allocation3 + $0xc8] sm:$0xff] }
 0xae5   :  { %5292 = vmatprep.subr.bf16.mxu1 %v5261_v21  ;;  %v5237_v21 = vld [vmem:[#allocation3 + $0xc0] sm:$0xff] }
 0xae8   :  { %5293 = vmatpush1.bf16.msra.mxu1 %v5260_v43  ;;  %v5240_v43 = vld [vmem:[#allocation3 + $0xd8] sm:$0xff] }
 0xae9   :  { %5294 = vmatprep.subr.bf16.mxu1 %v5263_v8  ;;  %v5239_v8 = vld [vmem:[#allocation3 + $0xd0] sm:$0xff] }
 0xaec   :  { %5295 = vmatpush1.bf16.msra.mxu1 %v5262_v4  ;;  %v5242_v4 = vld [vmem:[#allocation3 + $0xe8] sm:$0xff] }
 0xaed   :  { %5296 = vmatprep.subr.bf16.mxu1 %v5265_v32 }
 0xaf0   :  { %5297 = vmatpush1.bf16.msra.mxu1 %v5264_v38  ;;  %v5241_v38 = vld [vmem:[#allocation3 + $0xe0] sm:$0xff] }
 0xaf1   :  { %5298 = vmatprep.subr.bf16.mxu1 %v5267_v14 }
 0xaf4   :  { %5299 = vmatpush1.bf16.msra.mxu1 %v5266_v39  ;;  %v5244_v39 = vld [vmem:[#allocation3 + $0xf8] sm:$0xff] }
 0xaf5   :  { %5300 = vmatprep.subr.bf16.mxu1 %v5269_v12 }
 0xaf8   :  { %5301 = vmatpush1.bf16.msra.mxu1 %v5268_v44 }
 0xaf9   :  { %5302 = vmatprep.subr.bf16.mxu1 %v5271_v45 }
 0xafc   :  { %5303 = vmatpush1.bf16.msra.mxu1 %v5270_v18 }
 0xafd   :  { %5304 = vmatprep.subr.bf16.mxu1 %v5273_v26  ;;  %v5243_v26 = vld [vmem:[#allocation3 + $0xf0] sm:$0xff] }
 0xb00   :  { %5305 = vmatpush1.bf16.msra.mxu1 %v5272_v2  ;;  %v5366_v2 = vld [vmem:[#allocation3 + $0x208] sm:$0xff] }
 0xb01   :  { %5306 = vmatprep.subr.bf16.mxu1 %v5275_v24  ;;  %v5365_v24 = vld [vmem:[#allocation3 + $0x200] sm:$0xff] }
 0xb04   :  { %5307 = vmatpush1.bf16.msra.mxu1 %v5274_v35  ;;  %v5368_v35 = vld [vmem:[#allocation3 + $0x218] sm:$0xff] }
 0xb05   :  { %5308 = vmatprep.subr.bf16.mxu1 %v5277_v58  ;;  %v5367_v58 = vld [vmem:[#allocation3 + $0x210] sm:$0xff] }
 0xb08   :  { %5309 = vmatpush1.bf16.msra.mxu1 %v5276_v1  ;;  %v5574_v1 = vld [vmem:[%s10084_s15 + $0x80] sm:$0xff] }
 0xb09   :  { %5321 = vmatprep.subr.bf16.mxu1 %v5214_v29  ;;  %v5575_v29 = vld [vmem:[%s10084_s15 + $0x88] sm:$0xff] }
 0xb9e   :  { %v9757_v47 = vpop.f32.mrb[20].mxu1 }
 0xb9f   :  { %v5168_v41 = vpop.f32.mrb[21].mxu1 }
 0xba0   :  { %v9759_v59 = vpop.f32.mrb[22].mxu1 }
 0xba1   :  { %v5205_v46 = vpack.c.bf16 %v9759_v59, %v9757_v47  ;;  %v5172_v5 = vpop.f32.mrb[23].mxu1  ;;  %v6724_v47 = vpack.c.bf16 %v5575_v29, %v5574_v1  ;;  %v5559_v59 = vld [vmem:[%s10084_s15 + $0x8] sm:$0xff]  ;;  %v5452_v1 = vld [vmem:[#allocation3 + $0x338] sm:$0xff]  ;;  %v5451_v29 = vld [vmem:[#allocation3 + $0x330] sm:$0xff] }
 0xba2   :  { %v5206_v63 = vpack.c.bf16 %v5172_v5, %v5168_v41  ;;  %v5558_v41 = vld [vmem:[%s10084_s15] sm:$0xff]  ;;  %v5577_v5 = vld [vmem:[%s10084_s15 + $0x98] sm:$0xff] }
 0xba3   :  { %6725 = vmatprep.subr.bf16.mxu0 %v6724_v47  ;;  %v5459_v47 = vld [vmem:[#allocation3 + $0x370] sm:$0xff] }
 0xba6   :  { %v5176_v53 = vpop.f32.mrb[24].mxu1 }
 0xba7   :  { %v5178_v42 = vpop.f32.mrb[25].mxu1 }
 0xba8   :  { %v5180_v10 = vpop.f32.mrb[26].mxu1 }
 0xba9   :  { %v5207_v13 = vpack.c.bf16 %v5180_v10, %v5176_v53  ;;  %v5182_v3 = vpop.f32.mrb[27].mxu1  ;;  %v5561_v10 = vld [vmem:[%s10084_s15 + $0x18] sm:$0xff] }
 0xbaa   :  { %v5208_v22 = vpack.c.bf16 %v5182_v3, %v5178_v42  ;;  %v5560_v42 = vld [vmem:[%s10084_s15 + $0x10] sm:$0xff]  ;;  %v5370_v3 = vld [vmem:[#allocation3 + $0x228] sm:$0xff] }
 0xbac   :  { %5310 = vmatprep.mubr.bf16.mxu1 %v5208_v22  ;;  %v5579_v22 = vld [vmem:[%s10084_s15 + $0xa8] sm:$0xff] }
 0xbad   :  { %5311 = vmatmul.mubr.bf16.vlgmr.msra.gmra.mrb[36].mxu1 %v5207_v13  ;;  %v5578_v13 = vld [vmem:[%s10084_s15 + $0xa0] sm:$0xff] }
 0xbae   :  { %5322 = vmatpush1.bf16.msra.mxu1 %v5213_v30  ;;  %5353 = vmatprep.mubr.bf16.mxu1 %v5206_v63  ;;  %v9763_v23 = vpop.f32.mrb[28].mxu1  ;;  %v6726_v63 = vpack.c.bf16 %v5559_v59, %v5558_v41  ;;  %v6730_v30 = vpack.c.bf16 %v5561_v10, %v5560_v42  ;;  %v5454_v41 = vld [vmem:[#allocation3 + $0x348] sm:$0xff]  ;;  %v5465_v42 = vld [vmem:[#allocation3 + $0x3a0] sm:$0xff]  ;;  %v5468_v10 = vld [vmem:[#allocation3 + $0x3b8] sm:$0xff] }
 0xbaf   :  { %5323 = vmatprep.subr.bf16.mxu1 %v5216_v9  ;;  %v9765_v40 = vpop.f32.mrb[29].mxu1  ;;  %v6732_v9 = vpack.c.bf16 %v5579_v22, %v5578_v13  ;;  %v5462_v59 = vld [vmem:[#allocation3 + $0x388] sm:$0xff]  ;;  %v5467_v13 = vld [vmem:[#allocation3 + $0x3b0] sm:$0xff]  ;;  %v5469_v22 = vld [vmem:[#allocation3 + $0x3c0] sm:$0xff] }
 0xbb0   :  { %v9767_v34 = vpop.f32.mrb[30].mxu1  ;;  %6727 = vmatpush3.bf16.msra.mxu0 %v6726_v63  ;;  %v5463_v63 = vld [vmem:[#allocation3 + $0x390] sm:$0xff] }
 0xbb1   :  { %v5209_v19 = vpack.c.bf16 %v9767_v34, %v9763_v23  ;;  %v9771_v48 = vpop.f32.mrb[31].mxu1  ;;  %v5453_v23 = vld [vmem:[#allocation3 + $0x340] sm:$0xff]  ;;  %v5456_v34 = vld [vmem:[#allocation3 + $0x358] sm:$0xff] }
 0xbb2   :  { %5324 = vmatpush1.bf16.msra.mxu1 %v5215_v0  ;;  %v5210_v61 = vpack.c.bf16 %v9771_v48, %v9765_v40  ;;  %v5562_v0 = vld [vmem:[%s10084_s15 + $0x20] sm:$0xff]  ;;  %v5563_v40 = vld [vmem:[%s10084_s15 + $0x28] sm:$0xff]  ;;  %v5372_v48 = vld [vmem:[#allocation3 + $0x238] sm:$0xff] }
 0xbb3   :  { %5325 = vmatprep.subr.bf16.mxu1 %v5218_v7  ;;  %v5369_v7 = vld [vmem:[#allocation3 + $0x220] sm:$0xff] }
 0xbb6   :  { %5326 = vmatpush1.bf16.msra.mxu1 %v5217_v50  ;;  %v9775_v32 = vpop.f32.mrb[32].mxu1  ;;  %v5371_v50 = vld [vmem:[#allocation3 + $0x230] sm:$0xff] }
 0xbb7   :  { %5327 = vmatprep.subr.bf16.mxu1 %v5220_v51  ;;  %v9777_v14 = vpop.f32.mrb[33].mxu1  ;;  %v5374_v51 = vld [vmem:[#allocation3 + $0x248] sm:$0xff] }
 0xbb8   :  { %v9779_v12 = vpop.f32.mrb[34].mxu1 }
 0xbb9   :  { %v5211_v44 = vpack.c.bf16 %v9779_v12, %v9775_v32  ;;  %v9783_v45 = vpop.f32.mrb[35].mxu1  ;;  %v5582_v32 = vld [vmem:[%s10084_s15 + $0xc0] sm:$0xff]  ;;  %v5583_v12 = vld [vmem:[%s10084_s15 + $0xc8] sm:$0xff] }
 0xbba   :  { %5328 = vmatpush1.bf16.msra.mxu1 %v5219_v57  ;;  %v5212_v18 = vpack.c.bf16 %v9783_v45, %v9777_v14  ;;  %v5373_v57 = vld [vmem:[#allocation3 + $0x240] sm:$0xff]  ;;  %v5458_v14 = vld [vmem:[#allocation3 + $0x368] sm:$0xff] }
 0xbbb   :  { %5329 = vmatprep.subr.bf16.mxu1 %v5222_v27  ;;  %v5376_v27 = vld [vmem:[#allocation3 + $0x258] sm:$0xff]  ;;  %v5457_v45 = vld [vmem:[#allocation3 + $0x360] sm:$0xff] }
 0xbbe   :  { %5330 = vmatpush1.bf16.msra.mxu1 %v5221_v54  ;;  %v5375_v54 = vld [vmem:[#allocation3 + $0x250] sm:$0xff] }
 0xbbf   :  { %5331 = vmatprep.subr.bf16.mxu1 %v5224_v62  ;;  %v5378_v62 = vld [vmem:[#allocation3 + $0x268] sm:$0xff] }
 0xbc2   :  { %5332 = vmatpush1.bf16.msra.mxu1 %v5223_v31  ;;  %v5377_v31 = vld [vmem:[#allocation3 + $0x260] sm:$0xff] }
 0xbc3   :  { %5333 = vmatprep.subr.bf16.mxu1 %v5226_v36  ;;  %v5380_v36 = vld [vmem:[#allocation3 + $0x278] sm:$0xff] }
 0xbc6   :  { %5334 = vmatpush1.bf16.msra.mxu1 %v5225_v60  ;;  %v5379_v60 = vld [vmem:[#allocation3 + $0x270] sm:$0xff] }
 0xbc7   :  { %5335 = vmatprep.subr.bf16.mxu1 %v5228_v6  ;;  %v5382_v6 = vld [vmem:[#allocation3 + $0x288] sm:$0xff] }
 0xbca   :  { %5336 = vmatpush1.bf16.msra.mxu1 %v5227_v37  ;;  %v5381_v37 = vld [vmem:[#allocation3 + $0x280] sm:$0xff] }
 0xbcb   :  { %5337 = vmatprep.subr.bf16.mxu1 %v5230_v11  ;;  %v5384_v11 = vld [vmem:[#allocation3 + $0x298] sm:$0xff] }
 0xbce   :  { %5338 = vmatpush1.bf16.msra.mxu1 %v5229_v33  ;;  %v5383_v33 = vld [vmem:[#allocation3 + $0x290] sm:$0xff] }
 0xbcf   :  { %5339 = vmatprep.subr.bf16.mxu1 %v5232_v55  ;;  %v5386_v55 = vld [vmem:[#allocation3 + $0x2a8] sm:$0xff] }
 0xbd2   :  { %5340 = vmatpush1.bf16.msra.mxu1 %v5231_v28  ;;  %v5385_v28 = vld [vmem:[#allocation3 + $0x2a0] sm:$0xff] }
 0xbd3   :  { %5341 = vmatprep.subr.bf16.mxu1 %v5234_v20  ;;  %v5388_v20 = vld [vmem:[#allocation3 + $0x2b8] sm:$0xff] }
 0xbd6   :  { %5342 = vmatpush1.bf16.msra.mxu1 %v5233_v16  ;;  %v5387_v16 = vld [vmem:[#allocation3 + $0x2b0] sm:$0xff] }
 0xbd7   :  { %5343 = vmatprep.subr.bf16.mxu1 %v5236_v15  ;;  %v5390_v15 = vld [vmem:[#allocation3 + $0x2c8] sm:$0xff] }
 0xbda   :  { %5344 = vmatpush1.bf16.msra.mxu1 %v5235_v56  ;;  %v5389_v56 = vld [vmem:[#allocation3 + $0x2c0] sm:$0xff] }
 0xbdb   :  { %5345 = vmatprep.subr.bf16.mxu1 %v5238_v49  ;;  %v5392_v49 = vld [vmem:[#allocation3 + $0x2d8] sm:$0xff] }
 0xbde   :  { %5346 = vmatpush1.bf16.msra.mxu1 %v5237_v21  ;;  %v5391_v21 = vld [vmem:[#allocation3 + $0x2d0] sm:$0xff] }
 0xbdf   :  { %5347 = vmatprep.subr.bf16.mxu1 %v5240_v43  ;;  %v5394_v43 = vld [vmem:[#allocation3 + $0x2e8] sm:$0xff] }
 0xbe2   :  { %5348 = vmatpush1.bf16.msra.mxu1 %v5239_v8  ;;  %v5393_v8 = vld [vmem:[#allocation3 + $0x2e0] sm:$0xff] }
 0xbe3   :  { %5349 = vmatprep.subr.bf16.mxu1 %v5242_v4  ;;  %v5396_v4 = vld [vmem:[#allocation3 + $0x2f8] sm:$0xff] }
 0xbe6   :  { %5350 = vmatpush1.bf16.msra.mxu1 %v5241_v38  ;;  %v5395_v38 = vld [vmem:[#allocation3 + $0x2f0] sm:$0xff] }
 0xbe7   :  { %5351 = vmatprep.subr.bf16.mxu1 %v5244_v39  ;;  %v5446_v39 = vld [vmem:[#allocation3 + $0x308] sm:$0xff] }
 0xbea   :  { %5352 = vmatpush1.bf16.msra.mxu1 %v5243_v26  ;;  %v5445_v26 = vld [vmem:[#allocation3 + $0x300] sm:$0xff] }
 0xbeb   :  { %5397 = vmatprep.subr.bf16.mxu1 %v5366_v2  ;;  %v5448_v2 = vld [vmem:[#allocation3 + $0x318] sm:$0xff] }
 0xbed   :  { %5354 = vmatmul.mubr.bf16.vlgmr.msra.gmra.mrb[36].mxu1 %v5205_v46  ;;  %v5576_v46 = vld [vmem:[%s10084_s15 + $0x90] sm:$0xff] }
 0xbee   :  { %5398 = vmatpush1.bf16.msra.mxu1 %v5365_v24  ;;  %5429 = vmatprep.mubr.bf16.mxu1 %v5210_v61  ;;  %v6728_v53 = vpack.c.bf16 %v5577_v5, %v5576_v46  ;;  %v6734_v61 = vpack.c.bf16 %v5563_v40, %v5562_v0  ;;  %v5447_v24 = vld [vmem:[#allocation3 + $0x310] sm:$0xff]  ;;  %v5461_v46 = vld [vmem:[#allocation3 + $0x380] sm:$0xff]  ;;  %v5464_v5 = vld [vmem:[#allocation3 + $0x398] sm:$0xff] }
 0xbef   :  { %5399 = vmatprep.subr.bf16.mxu1 %v5368_v35  ;;  %v5450_v35 = vld [vmem:[#allocation3 + $0x328] sm:$0xff]  ;;  %v5473_v40 = vld [vmem:[#allocation3 + $0x3e0] sm:$0xff] }
 0xbf0   :  { %6729 = vmatprep.subr.bf16.mxu0 %v6728_v53  ;;  %v5466_v53 = vld [vmem:[#allocation3 + $0x3a8] sm:$0xff] }
 0xbf1   :  { %6731 = vmatpush3.bf16.msra.mxu0 %v6730_v30  ;;  %v5472_v30 = vld [vmem:[#allocation3 + $0x3d8] sm:$0xff]  ;;  %v5474_v0 = vld [vmem:[#allocation3 + $0x3e8] sm:$0xff] }
 0xbf2   :  { %5400 = vmatpush1.bf16.msra.mxu1 %v5367_v58  ;;  %6733 = vmatprep.subr.bf16.mxu0 %v6732_v9  ;;  %v5449_v58 = vld [vmem:[#allocation3 + $0x320] sm:$0xff]  ;;  %v5471_v9 = vld [vmem:[#allocation3 + $0x3d0] sm:$0xff] }
 0xbf3   :  { %5401 = vmatprep.subr.bf16.mxu1 %v5370_v3  ;;  %v5470_v3 = vld [vmem:[#allocation3 + $0x3c8] sm:$0xff] }
 0xbf5   :  { %6735 = vmatpush3.bf16.msra.mxu0 %v6734_v61  ;;  %v5580_v61 = vld [vmem:[%s10084_s15 + $0xb0] sm:$0xff] }
 0xbf6   :  { %5402 = vmatpush1.bf16.msra.mxu1 %v5369_v7  ;;  %v5476_v7 = vld [vmem:[#allocation3 + $0x3f8] sm:$0xff] }
 0xbf7   :  { %5403 = vmatprep.subr.bf16.mxu1 %v5372_v48  ;;  %v5475_v48 = vld [vmem:[#allocation3 + $0x3f0] sm:$0xff] }
 0xbfa   :  { %5404 = vmatpush1.bf16.msra.mxu1 %v5371_v50  ;;  %v5581_v50 = vld [vmem:[%s10084_s15 + $0xb8] sm:$0xff] }
 0xbfb   :  { %5405 = vmatprep.subr.bf16.mxu1 %v5374_v51  ;;  %v6736_v51 = vpack.c.bf16 %v5581_v50, %v5580_v61 }
 0xbfd   :  { %6737 = vmatprep.subr.bf16.mxu0 %v6736_v51 }
 0xbfe   :  { %5406 = vmatpush1.bf16.msra.mxu1 %v5373_v57  ;;  %v5564_v57 = vld [vmem:[%s10084_s15 + $0x30] sm:$0xff] }
 0xbff   :  { %5407 = vmatprep.subr.bf16.mxu1 %v5376_v27  ;;  %v5565_v27 = vld [vmem:[%s10084_s15 + $0x38] sm:$0xff] }
 0xc02   :  { %5408 = vmatpush1.bf16.msra.mxu1 %v5375_v54  ;;  %v6738_v54 = vpack.c.bf16 %v5565_v27, %v5564_v57  ;;  %v5661_v27 = vld [vmem:[%s10085_s16] sm:$0xff] }
 0xc03   :  { %5409 = vmatprep.subr.bf16.mxu1 %v5378_v62  ;;  %v5566_v62 = vld [vmem:[%s10084_s15 + $0x40] sm:$0xff] }
 0xc04   :  { %6739 = vmatpush3.bf16.msra.mxu0 %v6738_v54  ;;  %v5663_v54 = vld [vmem:[%s10085_s16 + $0x10] sm:$0xff] }
 0xc06   :  { %5410 = vmatpush1.bf16.msra.mxu1 %v5377_v31  ;;  %v5567_v31 = vld [vmem:[%s10084_s15 + $0x48] sm:$0xff] }
 0xc07   :  { %5411 = vmatprep.subr.bf16.mxu1 %v5380_v36  ;;  %v6742_v36 = vpack.c.bf16 %v5567_v31, %v5566_v62 }
 0xc0a   :  { %5412 = vmatpush1.bf16.msra.mxu1 %v5379_v60  ;;  %v5584_v60 = vld [vmem:[%s10084_s15 + $0xd0] sm:$0xff] }
 0xc0b   :  { %5413 = vmatprep.subr.bf16.mxu1 %v5382_v6  ;;  %v5585_v6 = vld [vmem:[%s10084_s15 + $0xd8] sm:$0xff] }
 0xc0e   :  { %5414 = vmatpush1.bf16.msra.mxu1 %v5381_v37  ;;  %v6744_v37 = vpack.c.bf16 %v5585_v6, %v5584_v60  ;;  %v5666_v6 = vld [vmem:[%s10085_s16 + $0x28] sm:$0xff] }
 0xc0f   :  { %5415 = vmatprep.subr.bf16.mxu1 %v5384_v11  ;;  %v5568_v11 = vld [vmem:[%s10084_s15 + $0x50] sm:$0xff] }
 0xc12   :  { %5416 = vmatpush1.bf16.msra.mxu1 %v5383_v33  ;;  %v5569_v33 = vld [vmem:[%s10084_s15 + $0x58] sm:$0xff] }
 0xc13   :  { %5417 = vmatprep.subr.bf16.mxu1 %v5386_v55  ;;  %v6746_v55 = vpack.c.bf16 %v5569_v33, %v5568_v11  ;;  %v5665_v33 = vld [vmem:[%s10085_s16 + $0x20] sm:$0xff] }
 0xc16   :  { %5418 = vmatpush1.bf16.msra.mxu1 %v5385_v28  ;;  %v5586_v28 = vld [vmem:[%s10084_s15 + $0xe0] sm:$0xff] }
 0xc17   :  { %5419 = vmatprep.subr.bf16.mxu1 %v5388_v20  ;;  %v5587_v20 = vld [vmem:[%s10084_s15 + $0xe8] sm:$0xff] }
 0xc1a   :  { %5420 = vmatpush1.bf16.msra.mxu1 %v5387_v16  ;;  %v5570_v16 = vld [vmem:[%s10084_s15 + $0x60] sm:$0xff] }
 0xc1b   :  { %5421 = vmatprep.subr.bf16.mxu1 %v5390_v15  ;;  %v6748_v15 = vpack.c.bf16 %v5587_v20, %v5586_v28 }
 0xc1e   :  { %5422 = vmatpush1.bf16.msra.mxu1 %v5389_v56  ;;  %v5571_v56 = vld [vmem:[%s10084_s15 + $0x68] sm:$0xff] }
 0xc1f   :  { %5423 = vmatprep.subr.bf16.mxu1 %v5392_v49  ;;  %v5588_v49 = vld [vmem:[%s10084_s15 + $0xf0] sm:$0xff] }
 0xc22   :  { %5424 = vmatpush1.bf16.msra.mxu1 %v5391_v21  ;;  %v5589_v21 = vld [vmem:[%s10084_s15 + $0xf8] sm:$0xff] }
 0xc23   :  { %5425 = vmatprep.subr.bf16.mxu1 %v5394_v43  ;;  %v6750_v43 = vpack.c.bf16 %v5571_v56, %v5570_v16 }
 0xc26   :  { %5426 = vmatpush1.bf16.msra.mxu1 %v5393_v8  ;;  %v6752_v8 = vpack.c.bf16 %v5589_v21, %v5588_v49  ;;  %v7068_v49 = vld [vmem:[%s10088_s19 + $0x40] sm:$0xff]  }
 0xc27   :  { %5427 = vmatprep.subr.bf16.mxu1 %v5396_v4  ;;  %v5572_v4 = vld [vmem:[%s10084_s15 + $0x70] sm:$0xff]  ;;  %v7069_v21 = vld [vmem:[%s10088_s19] sm:$0xff]  }
 0xc2a   :  { %5428 = vmatpush1.bf16.msra.mxu1 %v5395_v38  ;;  %v5573_v38 = vld [vmem:[%s10084_s15 + $0x78] sm:$0xff] }
 0xc2b   :  { %5477 = vmatprep.subr.bf16.mxu1 %v5446_v39  ;;  %v6754_v39 = vpack.c.bf16 %v5573_v38, %v5572_v4  ;;  %v7072_v4 = vld [vmem:[%s10088_s19 + $0x50] sm:$0xff]  }
 0xc2c   :  { %v7073_v38 = vld [vmem:[%s10088_s19 + $0x10] sm:$0xff]  }
 0xc2d   :  { %5430 = vmatmul.mubr.bf16.vlgmr.msra.gmra.mrb[36].mxu1 %v5209_v19  ;;  %v5455_v19 = vld [vmem:[#allocation3 + $0x350] sm:$0xff] }
 0xc2e   :  { %5478 = vmatpush1.bf16.msra.mxu1 %v5445_v26  ;;  %5509 = vmatprep.mubr.bf16.mxu1 %v5212_v18  ;;  %v5460_v18 = vld [vmem:[#allocation3 + $0x378] sm:$0xff]  ;;  %v5662_v26 = vld [vmem:[%s10085_s16 + $0x8] sm:$0xff] }
 0xc2f   :  { %5479 = vmatprep.subr.bf16.mxu1 %v5448_v2  ;;  %v5664_v2 = vld [vmem:[%s10085_s16 + $0x18] sm:$0xff] }
 0xc32   :  { %5480 = vmatpush1.bf16.msra.mxu1 %v5447_v24  ;;  %v6756_v24 = vpack.c.bf16 %v5664_v2, %v5662_v26  ;;  %v7075_v26 = vld [vmem:[%s10088_s19 + $0x18] sm:$0xff]   ;;  %v7076_v2 = vld [vmem:[%s10088_s19 + $0x60] sm:$0xff]  }
 0xc33   :  { %5481 = vmatprep.subr.bf16.mxu1 %v5450_v35 }
 0xc36   :  { %5482 = vmatpush1.bf16.msra.mxu1 %v5449_v58 }
 0xc37   :  { %5483 = vmatprep.subr.bf16.mxu1 %v5452_v1 }
 0xc3a   :  { %5484 = vmatpush1.bf16.msra.mxu1 %v5451_v29 }
 0xc3b   :  { %5485 = vmatprep.subr.bf16.mxu1 %v5454_v41 }
 0xc3e   :  { %5486 = vmatpush1.bf16.msra.mxu1 %v5453_v23 }
 0xc3f   :  { %5487 = vmatprep.subr.bf16.mxu1 %v5456_v34 }
 0xc42   :  { %5488 = vmatpush1.bf16.msra.mxu1 %v5455_v19 }
 0xc43   :  { %5489 = vmatprep.subr.bf16.mxu1 %v5458_v14 }
 0xc46   :  { %5490 = vmatpush1.bf16.msra.mxu1 %v5457_v45 }
 0xc47   :  { %5491 = vmatprep.subr.bf16.mxu1 %v5460_v18 }
 0xc4a   :  { %5492 = vmatpush1.bf16.msra.mxu1 %v5459_v47 }
 0xc4b   :  { %5493 = vmatprep.subr.bf16.mxu1 %v5462_v59 }
 0xc4e   :  { %5494 = vmatpush1.bf16.msra.mxu1 %v5461_v46 }
 0xc4f   :  { %5495 = vmatprep.subr.bf16.mxu1 %v5464_v5 }
 0xc52   :  { %5496 = vmatpush1.bf16.msra.mxu1 %v5463_v63 }
 0xc53   :  { %5497 = vmatprep.subr.bf16.mxu1 %v5466_v53 }
 0xc56   :  { %5498 = vmatpush1.bf16.msra.mxu1 %v5465_v42 }
 0xc57   :  { %5499 = vmatprep.subr.bf16.mxu1 %v5468_v10 }
 0xc5a   :  { %5500 = vmatpush1.bf16.msra.mxu1 %v5467_v13 }
 0xc5b   :  { %5501 = vmatprep.subr.bf16.mxu1 %v5470_v3 }
 0xc5e   :  { %5502 = vmatpush1.bf16.msra.mxu1 %v5469_v22 }
 0xc5f   :  { %5503 = vmatprep.subr.bf16.mxu1 %v5472_v30 }
 0xc62   :  { %5504 = vmatpush1.bf16.msra.mxu1 %v5471_v9 }
 0xc63   :  { %5505 = vmatprep.subr.bf16.mxu1 %v5474_v0 }
 0xc66   :  { %5506 = vmatpush1.bf16.msra.mxu1 %v5473_v40 }
 0xc67   :  { %5507 = vmatprep.subr.bf16.mxu1 %v5476_v7 }
 0xc6a   :  { %5508 = vmatpush1.bf16.msra.mxu1 %v5475_v48 }
 0xc6b   :  { %6630 = vmatprep.subr.bf16.mxu1 %v7370_v25 }
 0xc6d   :  { %5510 = vmatmul.mubr.bf16.vlgmr.msra.gmra.mrb[36].mxu1 %v5211_v44  ;;  %v6740_v44 = vpack.c.bf16 %v5583_v12, %v5582_v32 }
 0xc6e   :  { %6646 = vmatprep.mubr.msk.bf16.mxu1 %vm7371_vm3, %v7370_v25 }
 0xc6f   :  { %6741 = vmatprep.subr.bf16.mxu0 %v6740_v44 }
 0xc70   :  { %6743 = vmatpush3.bf16.msra.mxu0 %v6742_v36  ;;  %v6758_v36 = vpack.c.bf16 %v5663_v54, %v5661_v27 }
 0xc71   :  { %6745 = vmatprep.subr.bf16.mxu0 %v6744_v37  ;;  %v5668_v37 = vld [vmem:[%s10085_s16 + $0x38] sm:$0xff] }
 0xc72   :  { %v6760_v11 = vpack.c.bf16 %v5668_v37, %v5666_v6 }
 0xc74   :  { %6747 = vmatpush3.bf16.msra.mxu0 %v6746_v55  ;;  %v5667_v55 = vld [vmem:[%s10085_s16 + $0x30] sm:$0xff] }
 0xc75   :  { %6749 = vmatprep.subr.bf16.mxu0 %v6748_v15  ;;  %v6762_v28 = vpack.c.bf16 %v5667_v55, %v5665_v33 }
 0xc78   :  { %6751 = vmatpush3.bf16.msra.mxu0 %v6750_v43  ;;  %v7070_v43 = vld [vmem:[%s10088_s19 + $0x48] sm:$0xff]  }
 0xc79   :  { %6753 = vmatprep.subr.bf16.mxu0 %v6752_v8  ;;  %v7071_v8 = vld [vmem:[%s10088_s19 + $0x8] sm:$0xff]  }
 0xc7c   :  { %6755 = vmatpush3.bf16.msra.mxu0 %v6754_v39  ;;  %v7074_v39 = vld [vmem:[%s10088_s19 + $0x58] sm:$0xff]  }
 0xc7d   :  { %6757 = vmatprep.subr.bf16.mxu0 %v6756_v24  ;;  %v7077_v24 = vld [vmem:[%s10088_s19 + $0x20] sm:$0xff]  }
 0xd40   :  { %v9905_v35 = vpop.f32.mrb[36].mxu1 }
 0xd41   :  { %v9907_v58 = vpop.f32.mrb[37].mxu1  ;;  %v5538_v29 = vmul.f32 %v9905_v35, %v9905_v35 }
 0xd42   :  { %v9909_v1 = vpop.f32.mrb[38].mxu1  ;;  %v5539_v19 = vmul.f32 %v9907_v58, %v9907_v58 }
 0xd43   :  { %v5524_v41 = vadd.f32 %v9909_v1, %v9905_v35  ;;  %v5540_v23 = vmul.f32 %v9909_v1, %v9909_v1  ;;  %v9917_v34 = vpop.f32.mrb[39].mxu1 }
 0xd44   :  { %v5531_v14 = vadd.f32 %v9917_v34, %v9907_v58  ;;  %v5541_v45 = vmul.f32 %v9917_v34, %v9917_v34 }
 0xd45   :  { %v5525_v18 = vrot.slane %v5524_v41, 4  ;;  %v5542_v47 = vadd.f32 %v5540_v23, %v5538_v29  ;;  %v7078_v29 = vld [vmem:[%s10088_s19 + $0x68] sm:$0xff]   ;;  %v7080_v23 = vld [vmem:[%s10088_s19 + $0x70] sm:$0xff]  }
 0xd46   :  { %v5532_v59 = vrot.slane %v5531_v14, 4  ;;  %v5549_v46 = vadd.f32 %v5541_v45, %v5539_v19  ;;  %v7081_v19 = vld [vmem:[%s10088_s19 + $0x30] sm:$0xff]   ;;  %v7083_v45 = vld [vmem:[%s10088_s19 + $0x38] sm:$0xff]  }
 0xd47   :  { %v5526_v5 = vadd.f32 %v5525_v18, %v5524_v41  ;;  %v5543_v63 = vrot.slane %v5542_v47, 4  ;;  %v7079_v41 = vld [vmem:[%s10088_s19 + $0x28] sm:$0xff]  }
 0xd48   :  { %v5533_v53 = vadd.f32 %v5532_v59, %v5531_v14  ;;  %v5550_v42 = vrot.slane %v5549_v46, 4  ;;  %v7082_v14 = vld [vmem:[%s10088_s19 + $0x78] sm:$0xff]  }
 0xd49   :  { %v5527_v10 = vrot.slane %v5526_v5, 2  ;;  %v5544_v13 = vadd.f32 %v5543_v63, %v5542_v47 }
 0xd4a   :  { %v5534_v3 = vrot.slane %v5533_v53, 2  ;;  %v5551_v22 = vadd.f32 %v5550_v42, %v5549_v46 }
 0xd4b   :  { %v5528_v30 = vadd.f32 %v5527_v10, %v5526_v5  ;;  %v5545_v9 = vrot.slane %v5544_v13, 2 }
 0xd4c   :  { %v5535_v0 = vadd.f32 %v5534_v3, %v5533_v53  ;;  %v5552_v40 = vrot.slane %v5551_v22, 2 }
 0xd4d   :  { %v5529_v7 = vrot.slane %v5528_v30, 1  ;;  %v5546_v48 = vadd.f32 %v5545_v9, %v5544_v13 }
 0xd4e   :  { %v5536_v61 = vrot.slane %v5535_v0, 1  ;;  %v5553_v50 = vadd.f32 %v5552_v40, %v5551_v22 }
 0xd4f   :  { %v5547_v51 = vrot.slane %v5546_v48, 1  ;;  %v5530_v32 = vadd.f32 %v5529_v7, %v5528_v30 }
 0xd50   :  { %v5554_v57 = vrot.slane %v5553_v50, 1  ;;  %v5537_v44 = vadd.f32 %v5536_v61, %v5535_v0  ;;  %v5783_v61 = vld [vmem:[#allocation14] sm:$0x3] }
 0xd51   :  { %v5548_v12 = vadd.f32 %v5547_v51, %v5546_v48  ;;  %v5799_v51 = vld [vmem:[#allocation16] sm:$0x3] }
 0xd52   :  { %v5555_v62 = vadd.f32 %v5554_v57, %v5553_v50 }
 0xd53   :  { %v5556_v31 = vsel %vm3813_vm1, %v5530_v32, %v5548_v12  ;;  %v5804_v32 = vrot.slane %v5799_v51, %v9315_v52 }
 0xd54   :  { %v5557_v60 = vsel %vm3813_vm1, %v5537_v44, %v5555_v62  ;;  %v5808_v62 = vrot.slane %v5799_v51, %v9345_v17  ;;  %v6479_v51 = vld [vmem:[#allocation20] ss:$0 sm:$0xff] }
 0xd55   :  { %5654 = vmatprep.mubr.f32.mxu0 %v5557_v60 }
 0xd56   :  { %5655 = vmatmul.mubr.f32.vlgmr.msra.gmra.mrb[108].mxu0 %v5556_v31 }
 0xd57   :  { %6759 = vmatpush1.bf16.msra.mxu0 %v6758_v36  ;;  %5736 = vmatprep.mubr.f32.mxu0 %v7370_v25 }
 0xd58   :  { %6761 = vmatprep.subr.bf16.mxu0 %v6760_v11 }
 0xd5b   :  { %6763 = vmatpush1.bf16.msra.mxu0 %v6762_v28 }
 0xd5c   :  { %6589 = vmatprep.subr.bf16.mxu0 %v7068_v49 }
 0xe29   :  { %v6586_v20 = vpop.f32.mrb[108].mxu0 }
 0xe2a   :  { %v6587_v16 = vpop.f32.mrb[109].mxu0 }
 0xe2b   :  { %v6588_v15 = vadd.f32 %v6587_v16, %v6586_v20 }
 0xe2d   :  { %v5660_v56 = vmul.f32 0.0078125, %v6588_v15 }
 0xe2f   :  { %6452 = vmatmul.mubr.msk.f32.vlgmr.msra.gmra.mrb[110].mxu0 %vm5119_vm13, %v5660_v56 }
 0xe30   :  { %6590 = vmatpush3.bf16.msra.mxu0 %v7069_v21 }
 0xe31   :  { %6591 = vmatprep.subr.bf16.mxu0 %v7070_v43 }
 0xe34   :  { %6592 = vmatpush3.bf16.msra.mxu0 %v7071_v8  ;;  %v7084_v8 = vld [vmem:[%s10091_s22] sm:$0xff]  }
 0xe35   :  { %6593 = vmatprep.subr.bf16.mxu0 %v7072_v4  ;;  %6631 = vmatpush3.bf16.msra.mxu1 %v7084_v8  ;;  %v7085_v4 = vld [vmem:[%s10091_s22 + $0x8] sm:$0xff]  }
 0xe36   :  { %6632 = vmatprep.subr.bf16.mxu1 %v7370_v25 }
 0xe38   :  { %6594 = vmatpush3.bf16.msra.mxu0 %v7073_v38  ;;  %v7086_v38 = vld [vmem:[%s10091_s22 + $0x10] sm:$0xff]  }
 0xe39   :  { %6595 = vmatprep.subr.bf16.mxu0 %v7074_v39  ;;  %6633 = vmatpush3.bf16.msra.mxu1 %v7085_v4  ;;  %v7087_v39 = vld [vmem:[%s10091_s22 + $0x18] sm:$0xff]  }
 0xe3a   :  { %6634 = vmatprep.subr.bf16.mxu1 %v7370_v25 }
 0xe3c   :  { %6596 = vmatpush3.bf16.msra.mxu0 %v7075_v26  ;;  %v7088_v26 = vld [vmem:[%s10091_s22 + $0x20] sm:$0xff]  }
 0xe3d   :  { %6597 = vmatprep.subr.bf16.mxu0 %v7076_v2  ;;  %6635 = vmatpush3.bf16.msra.mxu1 %v7086_v38  ;;  %v7089_v2 = vld [vmem:[%s10091_s22 + $0x28] sm:$0xff]  }
 0xe3e   :  { %6636 = vmatprep.subr.bf16.mxu1 %v7370_v25 }
 0xe40   :  { %6598 = vmatpush3.bf16.msra.mxu0 %v7077_v24  ;;  %v7090_v24 = vld [vmem:[%s10091_s22 + $0x30] sm:$0xff]  }
 0xe41   :  { %6599 = vmatprep.subr.bf16.mxu0 %v7078_v29  ;;  %6637 = vmatpush3.bf16.msra.mxu1 %v7087_v39 }
 0xe42   :  { %6638 = vmatprep.subr.bf16.mxu1 %v7370_v25 }
 0xe44   :  { %6600 = vmatpush3.bf16.msra.mxu0 %v7079_v41 }
 0xe45   :  { %6601 = vmatprep.subr.bf16.mxu0 %v7080_v23  ;;  %6639 = vmatpush3.bf16.msra.mxu1 %v7088_v26 }
 0xe46   :  { %6640 = vmatprep.subr.bf16.mxu1 %v7370_v25 }
 0xe48   :  { %6602 = vmatpush3.bf16.msra.mxu0 %v7081_v19 }
 0xe49   :  { %6603 = vmatprep.subr.bf16.mxu0 %v7082_v14  ;;  %6641 = vmatpush3.bf16.msra.mxu1 %v7089_v2  ;;  %v5998_v14 = vld [vmem:[%s10089_s20] sm:$0xff] }
 0xe4a   :  { %6642 = vmatprep.subr.bf16.mxu1 %v7370_v25 }
 0xe4c   :  { %6604 = vmatpush3.bf16.msra.mxu0 %v7083_v45 }
 0xe4d   :  { %6624 = vmatprep.subr.bf16.mxu0 %v7370_v25  ;;  %6643 = vmatpush3.bf16.msra.mxu1 %v7090_v24 }
 0xe4e   :  { %6644 = vmatprep.subr.bf16.mxu1 %v7370_v25 }
 0xf02   :  { %v5738_v18 = vpop.f32.mrb[110].mxu0 }
 0xf03   :  { %v5743_v47 = vmul.f32 %v5738_v18, %v5738_v18  ;;  %v5758_v59 = vrot.slane %v5738_v18, %v9315_v52  ;;  %v5740_v46 = vpop.f32.mrb[111].mxu0 }
 0xf04   :  { %v5744_v5 = vmul.f32 %v5740_v46, %v5740_v46  ;;  %v5762_v63 = vrot.slane %v5740_v46, %v9315_v52 }
 0xf05   :  { %v5747_v53 = vrot.slane %v5743_v47, 7  ;;  %v5763_v42 = vsub.f32 %v9905_v35, %v5758_v59  ;;  %v5765_v10 = vsub.f32 %v9909_v1, %v5758_v59  ;;  %v5788_v1 = vrot.slane %v5783_v61, %v9315_v52 }
 0xf06   :  { %v5748_v13 = vrot.slane %v5744_v5, 7  ;;  %v5764_v3 = vsub.f32 %v9907_v58, %v5762_v63  ;;  %v5766_v22 = vsub.f32 %v9917_v34, %v5762_v63  ;;  %v5792_v34 = vrot.slane %v5783_v61, %v9345_v17  ;;  %v6003_v63 = vld [vmem:[#allocation17] sm:$0x1] }
 0xf07   :  { %v5751_v30 = vsub.f32 %v5738_v18, %v5747_v53  ;;  %v5999_v18 = vld [vmem:[%s10089_s20 + $0x8] sm:$0xff]  ;;  %v7091_v53 = vld [vmem:[%s10091_s22 + $0x38] sm:$0xff]   ;;  %s7372_s22 = smov [#allocation22]  }
 0xf08   :  { %v5752_v9 = vsub.f32 %v5740_v46, %v5748_v13  ;;  %6645 = vmatpush3.bf16.msra.mxu1 %v7091_v53  ;;  %s6227_s5 = sshll.u32 %s7372_s22, 4  ;;  %s6228_s5 = int_to_ptr.vmem [resolvable:$true] %s6227_s5 }
 0xf09   :  { %v5753_v0 = vmax.f32 %v5751_v30, 0.0  ;;  %v7092_v30 = vld [vmem:[%s10093_s24] sm:$0xff]   ;;  %s7317_s24 = scalar_lea.vmem %s6228_s5, 32  ;;  %p7322_p11 = scmp.lt.s32.totalorder %s6228_s5, %s6228_s5 }
 0xf0a   :  { %v5754_v40 = vmax.f32 %v5752_v9, 0.0  ;;  %v6470_v9 = vld [vmem:[#allocation19] ss:$0 sm:$0xff]  ;;  %p7318_p10 = scmp.ne.s32.totalorder %s6228_s5, %s7317_s24  ;;  %p7323_p12 = scmp.lt.s32.totalorder %s7317_s24, %s7317_s24 }
 0xf0b   :  { %v5767_v7 = vadd.f32 1e-05, %v5753_v0 }
 0xf0c   :  { %v5768_v48 = vadd.f32 1e-05, %v5754_v40  ;;  %p7324_p13 = por %p7323_p12, %p7322_p11 }
 0xf0d   :  { %7093 = vrsqrt.f32 %v5767_v7 }
 0xf0e   :  { %7095 = vrsqrt.f32 %v5768_v48  ;;  %p7325_p0 = pnand %p7324_p13, %p7318_p10 }
 0xf17   :  { %v7094_v50 = vpop.eup %7093 }
 0xf18   :  { %v7096_v57 = vpop.eup %7095  ;;  %v5774_v35 = vrot.slane %v7094_v50, %v9345_v17 }
 0xf19   :  { %v5778_v58 = vrot.slane %v7096_v57, %v9345_v17 }
 0xf1a   :  { %v5779_v27 = vmul.f32 %v5774_v35, %v5763_v42  ;;  %v5781_v54 = vmul.f32 %v5774_v35, %v5765_v10 }
 0xf1b   :  { %v5780_v12 = vmul.f32 %v5778_v58, %v5764_v3  ;;  %v5782_v44 = vmul.f32 %v5778_v58, %v5766_v22 }
 0xf1c   :  { %v5795_v31 = vmul.f32 %v5788_v1, %v5779_v27  ;;  %v5797_v36 = vmul.f32 %v5788_v1, %v5781_v54 }
 0xf1d   :  { %v5796_v60 = vmul.f32 %v5792_v34, %v5780_v12  ;;  %v5798_v6 = vmul.f32 %v5792_v34, %v5782_v44 }
 0xf1e   :  { %v5811_v37 = vadd.f32 %v5804_v32, %v5795_v31  ;;  %v5813_v11 = vadd.f32 %v5804_v32, %v5797_v36 }
 0xf1f   :  { %v5812_v33 = vadd.f32 %v5808_v62, %v5796_v60  ;;  %v5814_v55 = vadd.f32 %v5808_v62, %v5798_v6 }
 0xf20   :  { %vm5815_vm1 = vcmp.gt.f32.partialorder %v5811_v37, 0.0  ;;  %vm5817_vm14 = vcmp.gt.f32.partialorder %v5813_v11, 0.0  ;;  %v5819_v28 = vmul.f32 0.2, %v5811_v37  ;;  %v5821_v20 = vmul.f32 0.2, %v5813_v11 }
 0xf21   :  { %vm5816_vm15 = vcmp.gt.f32.partialorder %v5812_v33, 0.0  ;;  %vm5818_vm2 = vcmp.gt.f32.partialorder %v5814_v55, 0.0  ;;  %v5820_v16 = vmul.f32 0.2, %v5812_v33  ;;  %v5822_v52 = vmul.f32 0.2, %v5814_v55 }
 0xf22   :  { %v5823_v15 = vsel %vm5815_vm1, %v5811_v37, %v5819_v28  ;;  %v5825_v56 = vsel %vm5817_vm14, %v5813_v11, %v5821_v20 }
 0xf23   :  { %v5824_v49 = vsel %vm5816_vm15, %v5812_v33, %v5820_v16  ;;  %v5826_v17 = vsel %vm5818_vm2, %v5814_v55, %v5822_v52  ;;  %v5827_v21 = vpack.c.bf16 %v5825_v56, %v5823_v15 }
 0xf24   :  { %v5828_v43 = vpack.c.bf16 %v5826_v17, %v5824_v49 }
 0xf26   :  { %5989 = vmatprep.mubr.bf16.mxu0 %v5828_v43 }
 0xf27   :  { %5990 = vmatmul.mubr.bf16.vlgmr.msra.gmra.mrb[112].mxu0 %v5827_v21 }
 0xf28   :  { %6626 = vmatprep.mubr.msk.bf16.mxu0 %vm7371_vm3, %v7370_v25 }
 0xffa   :  { %v6605_v29 = vpop.f32.mrb[112].mxu0 }
 0xffb   :  { %v6606_v41 = vpop.f32.mrb[113].mxu0 }
 0xffc   :  { %v6607_v23 = vadd.f32 %v6606_v41, %v6605_v29  ;;  %v6608_v19 = vpop.f32.mrb[114].mxu0 }
 0xffd   :  { %v6609_v45 = vpop.f32.mrb[115].mxu0 }
 0xffe   :  { %v6610_v47 = vadd.f32 %v6609_v45, %v6608_v19  ;;  %v6000_v59 = vmul.f32 %v6607_v23, %v5998_v14 }
0x1000   :  { %v6001_v46 = vmul.f32 %v6610_v47, %v5999_v18 }
0x1002   :  { %v6002_v5 = vpack.c.bf16 %v6001_v46, %v6000_v59 }
0x1004   :  { %6625 = vmatpush3.bf16.msra.mxu0 %v6002_v5 }
0x1005   :  { %6650 = vmatprep.subr.bf16.mxu0 %v7370_v25 }
0x1007   :  { %6627 = vmatmul.mubr.msk.bf16.vlgmr.msra.gmra.mrb[116].mxu0 %vm4898_vm0, %v6003_v63 }
0x1008   :  { %6652 = vmatprep.mubr.msk.bf16.mxu0 %vm7371_vm3, %v7370_v25  ;;  %6651 = vmatpush3.bf16.msra.mxu0 %v7092_v30 }
0x10da   :  { %v6041_v42 = vpop.f32.mrb[116].mxu0 }
0x10db   :  { %v6047_v10 = vpack.c.bf16 %v6041_v42, %v6041_v42  ;;  %v6628_v13 = vpop.f32.mrb[117].mxu0 }
0x10dc   :  { %v6044_v3 = vpop.f32.mrb[118].mxu0 }
0x10dd   :  { %v6629_v22 = vpop.f32.mrb[119].mxu0  ;;  %6647 = vmatmul.mubr.bf16.vlgmr.msra.gmra.mrb[40].mxu1 %v6047_v10 }
0x11b0   :  { %v6153_v0 = vpop.f32.mrb[40].mxu1 }
0x11b1   :  { %v6154_v40 = vadd.f32 %v6470_v9, %v6153_v0  ;;  %v6648_v25 = vpop.f32.mrb[41].mxu1 }
0x11b2   :  { %v6156_v7 = vpop.f32.mrb[42].mxu1 }
0x11b3   :  { %v6159_v48 = vmax.f32 %v6154_v40, 0.0  ;;  %v6649_v61 = vpop.f32.mrb[43].mxu1 }
0x11b5   :  { %v6160_v50 = vpack.c.bf16 %v6159_v48, %v6159_v48 }
0x11b7   :  { %6653 = vmatmul.mubr.msk.bf16.vlgmr.msra.gmra.mrb[120].mxu0 %vm4898_vm0, %v6160_v50 }
0x128a   :  { %v6213_v57 = vpop.f32.mrb[120].mxu0 }
0x128b   :  { %v6214_v35 = vadd.f32 %v6479_v51, %v6213_v57  ;;  %v6654_v1 = vpop.f32.mrb[121].mxu0 }
0x128c   :  { %v6216_v58 = vpop.f32.mrb[122].mxu0 }
0x128d   :  { %v6655_v34 = vpop.f32.mrb[123].mxu0  ;;  %6220 = vst.msk [vmem:[#allocation22] sm:$0x3] %vm6219_vm4, %v6214_v35 }
0x128e   :  { %7328 = shalt.err (!%p7325_p0)
}
0x128f   :  { %s7329_s10 = scalar_lea.hbm %s10095_s26, 32 }
0x1290   :  { %p7330_p1 = scmp.ne.s32.totalorder %s10095_s26, %s7329_s10  ;;  %p7333_p2 = scmp.lt.u32.totalorder %s7329_s10, %s10095_s26 }
0x1292   :  { %p7335_p3 = pnand %p7333_p2, %p7330_p1 }
0x1294   :  { %7338 = shalt.err (!%p7335_p3)
}
0x1295   :  { %6230 = dma.vmem_to_hbm [thread:$0]  %s6228_s5, 32, %s10095_s26, [#allocation7]  }
0x1296   :  { %7355 = dma.done.wait [#allocation7], 32  }
0x1297   :  { %7356 = vsyncadd [#allocation7], 4294967264 }
0x1298   :  { %6234 = vsyncpa [#allocation6], 1 }
0x1299   :  { %6235 = vsyncpa [#allocation9], 1 }
0x129a   :  { %6236 = vsyncpa [#allocation12], 1 }
0x129b   :  { %6237 = vsyncpa [#allocation15], 1 }
0x129c   :  { %6238 = vsyncpa [#allocation18], 1 }
0x129d   :  { %6239 = vsyncpa [#allocation21], 1 }
0x129e   :  { %6240 = vsyncpa [#allocation7], 1 }
0x129f   :  { %6241 = vsyncmov [#allocation4] }
0x12a2   :  { %s6242_s7 = vpop.sfrf %6241 }
0x12a3   :  { %p6482_p4 = scmp.ne.s32.totalorder %s6242_s7, 0 }
0x12a5   :  { %6246 = shalt.err (%p6482_p4)  }
0x12a6   :  { %6248 = vsyncmov [#allocation4 + $0x1] }
0x12a9   :  { %s6249_s29 = vpop.sfrf %6248 }
0x12aa   :  { %p6483_p5 = scmp.ne.s32.totalorder %s6249_s29, 0 }
0x12ac   :  { %6253 = shalt.err (%p6483_p5)  }

</bundles_post_ra>
